<compile_context>
chip_gen: v5e
topology: v5e:2x2
jax: 0.10.0
libtpu: 0.0.40
codegen_flags: <defaults>
</compile_context>

<pallas_src>
import math

import jax
import jax.numpy as jnp
from jax.experimental import pallas as pl
from jax.experimental.pallas import tpu as pltpu

HID1, HID2 = 800, 600  # hidden sizes fixed by the module (kept unpadded)


def _round_up(x: int, m: int) -> int:
    return ((x + m - 1) // m) * m


# ----------------------------------------------------------------------------
# Pallas kernel: one batch tile per grid step; actor + critic back-to-back.
# ----------------------------------------------------------------------------
def _make_kernel(max_action: float):
    def kernel(s_ref,
               aw1_ref, ab1_ref, aw2_ref, ab2_ref, aw3_ref, ab3_ref,
               cw1_ref, cb1_ref, cw2_ref, cb2_ref, cw3_ref, cb3_ref,
               act_ref, val_ref):
        x = s_ref[...].astype(jnp.bfloat16)                       # [TB, state_dim]

        # ---- actor MLP ----
        h = jnp.dot(x, aw1_ref[...], preferred_element_type=jnp.float32) + ab1_ref[...]
        h = jnp.maximum(h, 0.0).astype(jnp.bfloat16)              # [TB, 800]
        h = jnp.dot(h, aw2_ref[...], preferred_element_type=jnp.float32) + ab2_ref[...]
        h = jnp.maximum(h, 0.0).astype(jnp.bfloat16)              # [TB, 600]
        y = jnp.dot(h, aw3_ref[...], preferred_element_type=jnp.float32) + ab3_ref[...]
        act_ref[...] = jnp.tanh(y) * max_action                   # [TB, head_pad]

        # ---- critic MLP ----
        g = jnp.dot(x, cw1_ref[...], preferred_element_type=jnp.float32) + cb1_ref[...]
        g = jnp.maximum(g, 0.0).astype(jnp.bfloat16)              # [TB, 800]
        g = jnp.dot(g, cw2_ref[...], preferred_element_type=jnp.float32) + cb2_ref[...]
        g = jnp.maximum(g, 0.0).astype(jnp.bfloat16)              # [TB, 600]
        val_ref[...] = (jnp.dot(g, cw3_ref[...], preferred_element_type=jnp.float32)
                        + cb3_ref[...])                           # [TB, head_pad]

    return kernel


# ----------------------------------------------------------------------------
# Host-side packing: bf16 weights, f32 biases, heads padded to 8 lanes only.
# ----------------------------------------------------------------------------
def pack_params(p):
    action_dim = p["aw3"].shape[1]
    head_pad = max(8, _round_up(action_dim, 8))   # tiny, lane-minimal head slab

    def pad_head(a):
        return jnp.pad(a, ((0, 0), (0, head_pad - a.shape[1])))

    packed = (
        p["aw1"].astype(jnp.bfloat16), p["ab1"].astype(jnp.float32),
        p["aw2"].astype(jnp.bfloat16), p["ab2"].astype(jnp.float32),
        pad_head(p["aw3"]).astype(jnp.bfloat16), pad_head(p["ab3"]).astype(jnp.float32),
        p["cw1"].astype(jnp.bfloat16), p["cb1"].astype(jnp.float32),
        p["cw2"].astype(jnp.bfloat16), p["cb2"].astype(jnp.float32),
        pad_head(p["cw3"]).astype(jnp.bfloat16), pad_head(p["cb3"]).astype(jnp.float32),
    )
    return packed


def actor_critic_forward(state, packed, action_dim, max_action, batch_tile=256):
    """state: [B, state_dim] f32.  Returns (action [B, action_dim], value [B, 1])."""
    B, state_dim = state.shape
    head_pad = packed[4].shape[-1]

    # Batch tiling: weights stay resident across tiles, so large B amortizes
    # the (single) per-call weight stream.
    tb = min(batch_tile, _round_up(B, 8))
    tb = _round_up(tb, 8)
    b_pad = _round_up(B, tb)
    if b_pad != B:
        state = jnp.pad(state, ((0, b_pad - B), (0, 0)))
    grid = (b_pad // tb,)

    const = lambda i: (0, 0)     # weights / biases: same block every step -> DMA'd once
    batched = lambda i: (i, 0)   # state / outputs: tiled over the batch

    action_p, value_p = pl.pallas_call(
        _make_kernel(float(max_action)),
        out_shape=(jax.ShapeDtypeStruct((b_pad, head_pad), jnp.float32),
                   jax.ShapeDtypeStruct((b_pad, head_pad), jnp.float32)),
        grid=grid,
        in_specs=[
            pl.BlockSpec((tb, state_dim), batched),      # state
            pl.BlockSpec((state_dim, HID1), const),      # aw1
            pl.BlockSpec((1, HID1), const),              # ab1
            pl.BlockSpec((HID1, HID2), const),           # aw2
            pl.BlockSpec((1, HID2), const),              # ab2
            pl.BlockSpec((HID2, head_pad), const),       # aw3
            pl.BlockSpec((1, head_pad), const),          # ab3
            pl.BlockSpec((state_dim, HID1), const),      # cw1
            pl.BlockSpec((1, HID1), const),              # cb1
            pl.BlockSpec((HID1, HID2), const),           # cw2
            pl.BlockSpec((1, HID2), const),              # cb2
            pl.BlockSpec((HID2, head_pad), const),       # cw3
            pl.BlockSpec((1, head_pad), const),          # cb3
        ],
        out_specs=(pl.BlockSpec((tb, head_pad), batched),
                   pl.BlockSpec((tb, head_pad), batched)),
        compiler_params=pltpu.CompilerParams(
            dimension_semantics=("parallel",),   # batch tiles split across cores
            vmem_limit_bytes=32 << 20,           # ~5 MB footprint + headroom for big tiles
        ),
    )(state, *packed)

    action = action_p[:B, :action_dim]
    value = value_p[:B, :1]
    return action, value


# ----------------------------------------------------------------------------
# Deterministic parameter init (PyTorch nn.Linear default: U(-1/sqrt(fan_in), .))
# ----------------------------------------------------------------------------
def _linear_init(key, fan_in, fan_out):
    bound = 1.0 / math.sqrt(fan_in)
    kw, kb = jax.random.split(key)
    w = jax.random.uniform(kw, (fan_in, fan_out), jnp.float32, -bound, bound)
    b = jax.random.uniform(kb, (1, fan_out), jnp.float32, -bound, bound)
    return w, b


def init_actor_critic_params(key, state_dim, action_dim):
    keys = jax.random.split(key, 6)
    aw1, ab1 = _linear_init(keys[0], state_dim, HID1)
    aw2, ab2 = _linear_init(keys[1], HID1, HID2)
    aw3, ab3 = _linear_init(keys[2], HID2, action_dim)
    cw1, cb1 = _linear_init(keys[3], state_dim, HID1)
    cw2, cb2 = _linear_init(keys[4], HID1, HID2)
    cw3, cb3 = _linear_init(keys[5], HID2, 1)
    return dict(
        aw1=aw1, ab1=ab1, aw2=aw2, ab2=ab2, aw3=aw3, ab3=ab3,
        cw1=cw1, cb1=cb1, cw2=cw2, cb2=cb2, cw3=cw3, cb3=cb3,
    )


# ----------------------------------------------------------------------------
# Reference for correctness check (mirrors the kernel's bf16/f32 arithmetic).
# TODO(synk): the f32 PyTorch module is matched only up to bf16 weight/activation
# quantization (intentional for HBM-bound streaming); atol/rtol=1e-2 covers it.
# ----------------------------------------------------------------------------
def reference_forward_mixed(state, p, max_action):
    bf = jnp.bfloat16

    def lin(x, w, b):
        return jnp.dot(x.astype(bf), w.astype(bf),
                       preferred_element_type=jnp.float32) + b

    h = jnp.maximum(lin(state, p["aw1"], p["ab1"]), 0.0)
    h = jnp.maximum(lin(h, p["aw2"], p["ab2"]), 0.0)
    action = jnp.tanh(lin(h, p["aw3"], p["ab3"])) * max_action
    g = jnp.maximum(lin(state, p["cw1"], p["cb1"]), 0.0)
    g = jnp.maximum(lin(g, p["cw2"], p["cb2"]), 0.0)
    value = lin(g, p["cw3"], p["cb3"])
    return action, value


if __name__ == "__main__":
    # Small shapes consistent with the module's forward.
    B, STATE_DIM, ACTION_DIM, MAX_ACTION = 8, 24, 4, 2.0

    key = jax.random.PRNGKey(0)
    k_state, k_params = jax.random.split(key)

    state = jax.random.normal(k_state, (B, STATE_DIM), jnp.float32)
    params = init_actor_critic_params(k_params, STATE_DIM, ACTION_DIM)

    packed = pack_params(params)  # pack once; reuse across rollout calls

    action, value = actor_critic_forward(state, packed, ACTION_DIM, MAX_ACTION)
    action = jax.block_until_ready(action)
    value = jax.block_until_ready(value)

    ref_action, ref_value = reference_forward_mixed(state, params, MAX_ACTION)
    assert action.shape == (B, ACTION_DIM) and value.shape == (B, 1)
    assert jnp.allclose(action, ref_action, atol=1e-2, rtol=1e-2)
    assert jnp.allclose(value, ref_value, atol=1e-2, rtol=1e-2)

    print("KERNEL_OK")
</pallas_src>

<mosaic_0001>
module attributes {stable_mosaic.version = 11 : i64} {
  func.func @kernel(%arg0: i32, %arg1: memref<8x24xf32, #tpu.memory_space<vmem>>, %arg2: memref<24x800xbf16, #tpu.memory_space<vmem>>, %arg3: memref<1x800xf32, #tpu.memory_space<vmem>>, %arg4: memref<800x600xbf16, #tpu.memory_space<vmem>>, %arg5: memref<1x600xf32, #tpu.memory_space<vmem>>, %arg6: memref<600x8xbf16, #tpu.memory_space<vmem>>, %arg7: memref<1x8xf32, #tpu.memory_space<vmem>>, %arg8: memref<24x800xbf16, #tpu.memory_space<vmem>>, %arg9: memref<1x800xf32, #tpu.memory_space<vmem>>, %arg10: memref<800x600xbf16, #tpu.memory_space<vmem>>, %arg11: memref<1x600xf32, #tpu.memory_space<vmem>>, %arg12: memref<600x8xbf16, #tpu.memory_space<vmem>>, %arg13: memref<1x8xf32, #tpu.memory_space<vmem>>, %arg14: memref<8x8xf32, #tpu.memory_space<vmem>>, %arg15: memref<8x8xf32, #tpu.memory_space<vmem>>) attributes {dimension_semantics = [#tpu.dimension_semantics<parallel>], iteration_bounds = array<i64: 1>, scalar_prefetch = 0 : i64, scratch_operands = 0 : i64, tpu.core_type = #tpu.core_type<tc>, window_params = [{transform_indices = @transform_0, window_bounds = array<i64: 8, 24>}, {pipeline_mode = #tpu.pipeline_mode<synchronous>, transform_indices = @transform_1, window_bounds = array<i64: 24, 800>}, {pipeline_mode = #tpu.pipeline_mode<synchronous>, transform_indices = @transform_2, window_bounds = array<i64: 1, 800>}, {pipeline_mode = #tpu.pipeline_mode<synchronous>, transform_indices = @transform_3, window_bounds = array<i64: 800, 600>}, {pipeline_mode = #tpu.pipeline_mode<synchronous>, transform_indices = @transform_4, window_bounds = array<i64: 1, 600>}, {pipeline_mode = #tpu.pipeline_mode<synchronous>, transform_indices = @transform_5, window_bounds = array<i64: 600, 8>}, {pipeline_mode = #tpu.pipeline_mode<synchronous>, transform_indices = @transform_6, window_bounds = array<i64: 1, 8>}, {pipeline_mode = #tpu.pipeline_mode<synchronous>, transform_indices = @transform_7, window_bounds = array<i64: 24, 800>}, {pipeline_mode = #tpu.pipeline_mode<synchronous>, transform_indices = @transform_8, window_bounds = array<i64: 1, 800>}, {pipeline_mode = #tpu.pipeline_mode<synchronous>, transform_indices = @transform_9, window_bounds = array<i64: 800, 600>}, {pipeline_mode = #tpu.pipeline_mode<synchronous>, transform_indices = @transform_10, window_bounds = array<i64: 1, 600>}, {pipeline_mode = #tpu.pipeline_mode<synchronous>, transform_indices = @transform_11, window_bounds = array<i64: 600, 8>}, {pipeline_mode = #tpu.pipeline_mode<synchronous>, transform_indices = @transform_12, window_bounds = array<i64: 1, 8>}, {transform_indices = @transform_13, window_bounds = array<i64: 8, 8>}, {transform_indices = @transform_14, window_bounds = array<i64: 8, 8>}]} {
    %c0 = arith.constant 0 : index
    %c0_0 = arith.constant 0 : index
    %0 = vector.load %arg1[%c0, %c0_0] : memref<8x24xf32, #tpu.memory_space<vmem>>, vector<8x24xf32>
    %1 = arith.truncf %0 : vector<8x24xf32> to vector<8x24xbf16>
    %c0_1 = arith.constant 0 : index
    %c0_2 = arith.constant 0 : index
    %2 = vector.load %arg2[%c0_1, %c0_2] : memref<24x800xbf16, #tpu.memory_space<vmem>>, vector<24x800xbf16>
    %cst = arith.constant dense<0.000000e+00> : vector<8x800xf32>
    %3 = tpu.matmul %1, %2, %cst {dimension_numbers = #tpu.dot_dimension_numbers<[1], [0], [0], [1], [0, 0, 1, 1], [], []>} : vector<8x24xbf16>, vector<24x800xbf16>, vector<8x800xf32> -> vector<8x800xf32>
    %c0_3 = arith.constant 0 : index
    %c0_4 = arith.constant 0 : index
    %4 = vector.load %arg3[%c0_3, %c0_4] : memref<1x800xf32, #tpu.memory_space<vmem>>, vector<1x800xf32>
    %5 = vector.broadcast %4 : vector<1x800xf32> to vector<8x800xf32>
    %6 = arith.addf %3, %5 : vector<8x800xf32>
    %cst_5 = arith.constant 0.000000e+00 : f32
    %7 = vector.broadcast %cst_5 : f32 to vector<8x800xf32>
    %8 = arith.maximumf %6, %7 : vector<8x800xf32>
    %9 = arith.truncf %8 : vector<8x800xf32> to vector<8x800xbf16>
    %c0_6 = arith.constant 0 : index
    %c0_7 = arith.constant 0 : index
    %10 = vector.load %arg4[%c0_6, %c0_7] : memref<800x600xbf16, #tpu.memory_space<vmem>>, vector<800x600xbf16>
    %cst_8 = arith.constant dense<0.000000e+00> : vector<8x600xf32>
    %11 = tpu.matmul %9, %10, %cst_8 {dimension_numbers = #tpu.dot_dimension_numbers<[1], [0], [0], [1], [0, 0, 1, 1], [], []>} : vector<8x800xbf16>, vector<800x600xbf16>, vector<8x600xf32> -> vector<8x600xf32>
    %c0_9 = arith.constant 0 : index
    %c0_10 = arith.constant 0 : index
    %12 = vector.load %arg5[%c0_9, %c0_10] : memref<1x600xf32, #tpu.memory_space<vmem>>, vector<1x600xf32>
    %13 = vector.broadcast %12 : vector<1x600xf32> to vector<8x600xf32>
    %14 = arith.addf %11, %13 : vector<8x600xf32>
    %cst_11 = arith.constant 0.000000e+00 : f32
    %15 = vector.broadcast %cst_11 : f32 to vector<8x600xf32>
    %16 = arith.maximumf %14, %15 : vector<8x600xf32>
    %17 = arith.truncf %16 : vector<8x600xf32> to vector<8x600xbf16>
    %c0_12 = arith.constant 0 : index
    %c0_13 = arith.constant 0 : index
    %18 = vector.load %arg6[%c0_12, %c0_13] : memref<600x8xbf16, #tpu.memory_space<vmem>>, vector<600x8xbf16>
    %cst_14 = arith.constant dense<0.000000e+00> : vector<8x8xf32>
    %19 = tpu.matmul %17, %18, %cst_14 {dimension_numbers = #tpu.dot_dimension_numbers<[1], [0], [0], [1], [0, 0, 1, 1], [], []>} : vector<8x600xbf16>, vector<600x8xbf16>, vector<8x8xf32> -> vector<8x8xf32>
    %c0_15 = arith.constant 0 : index
    %c0_16 = arith.constant 0 : index
    %20 = vector.load %arg7[%c0_15, %c0_16] : memref<1x8xf32, #tpu.memory_space<vmem>>, vector<1x8xf32>
    %21 = vector.broadcast %20 : vector<1x8xf32> to vector<8x8xf32>
    %22 = arith.addf %19, %21 : vector<8x8xf32>
    %23 = math.tanh %22 : vector<8x8xf32>
    %cst_17 = arith.constant 2.000000e+00 : f32
    %24 = vector.broadcast %cst_17 : f32 to vector<8x8xf32>
    %25 = arith.mulf %23, %24 : vector<8x8xf32>
    %c0_18 = arith.constant 0 : index
    %c0_19 = arith.constant 0 : index
    %26 = vector.load %arg14[%c0_18, %c0_19] : memref<8x8xf32, #tpu.memory_space<vmem>>, vector<8x8xf32>
    tpu.vector_store %arg14[%c0_18, %c0_19], %25 {strides = array<i32>} : memref<8x8xf32, #tpu.memory_space<vmem>>, vector<8x8xf32>,
    %c0_20 = arith.constant 0 : index
    %c0_21 = arith.constant 0 : index
    %27 = vector.load %arg8[%c0_20, %c0_21] : memref<24x800xbf16, #tpu.memory_space<vmem>>, vector<24x800xbf16>
    %cst_22 = arith.constant dense<0.000000e+00> : vector<8x800xf32>
    %28 = tpu.matmul %1, %27, %cst_22 {dimension_numbers = #tpu.dot_dimension_numbers<[1], [0], [0], [1], [0, 0, 1, 1], [], []>} : vector<8x24xbf16>, vector<24x800xbf16>, vector<8x800xf32> -> vector<8x800xf32>
    %c0_23 = arith.constant 0 : index
    %c0_24 = arith.constant 0 : index
    %29 = vector.load %arg9[%c0_23, %c0_24] : memref<1x800xf32, #tpu.memory_space<vmem>>, vector<1x800xf32>
    %30 = vector.broadcast %29 : vector<1x800xf32> to vector<8x800xf32>
    %31 = arith.addf %28, %30 : vector<8x800xf32>
    %cst_25 = arith.constant 0.000000e+00 : f32
    %32 = vector.broadcast %cst_25 : f32 to vector<8x800xf32>
    %33 = arith.maximumf %31, %32 : vector<8x800xf32>
    %34 = arith.truncf %33 : vector<8x800xf32> to vector<8x800xbf16>
    %c0_26 = arith.constant 0 : index
    %c0_27 = arith.constant 0 : index
    %35 = vector.load %arg10[%c0_26, %c0_27] : memref<800x600xbf16, #tpu.memory_space<vmem>>, vector<800x600xbf16>
    %cst_28 = arith.constant dense<0.000000e+00> : vector<8x600xf32>
    %36 = tpu.matmul %34, %35, %cst_28 {dimension_numbers = #tpu.dot_dimension_numbers<[1], [0], [0], [1], [0, 0, 1, 1], [], []>} : vector<8x800xbf16>, vector<800x600xbf16>, vector<8x600xf32> -> vector<8x600xf32>
    %c0_29 = arith.constant 0 : index
    %c0_30 = arith.constant 0 : index
    %37 = vector.load %arg11[%c0_29, %c0_30] : memref<1x600xf32, #tpu.memory_space<vmem>>, vector<1x600xf32>
    %38 = vector.broadcast %37 : vector<1x600xf32> to vector<8x600xf32>
    %39 = arith.addf %36, %38 : vector<8x600xf32>
    %cst_31 = arith.constant 0.000000e+00 : f32
    %40 = vector.broadcast %cst_31 : f32 to vector<8x600xf32>
    %41 = arith.maximumf %39, %40 : vector<8x600xf32>
    %42 = arith.truncf %41 : vector<8x600xf32> to vector<8x600xbf16>
    %c0_32 = arith.constant 0 : index
    %c0_33 = arith.constant 0 : index
    %43 = vector.load %arg12[%c0_32, %c0_33] : memref<600x8xbf16, #tpu.memory_space<vmem>>, vector<600x8xbf16>
    %cst_34 = arith.constant dense<0.000000e+00> : vector<8x8xf32>
    %44 = tpu.matmul %42, %43, %cst_34 {dimension_numbers = #tpu.dot_dimension_numbers<[1], [0], [0], [1], [0, 0, 1, 1], [], []>} : vector<8x600xbf16>, vector<600x8xbf16>, vector<8x8xf32> -> vector<8x8xf32>
    %c0_35 = arith.constant 0 : index
    %c0_36 = arith.constant 0 : index
    %45 = vector.load %arg13[%c0_35, %c0_36] : memref<1x8xf32, #tpu.memory_space<vmem>>, vector<1x8xf32>
    %46 = vector.broadcast %45 : vector<1x8xf32> to vector<8x8xf32>
    %47 = arith.addf %44, %46 : vector<8x8xf32>
    %c0_37 = arith.constant 0 : index
    %c0_38 = arith.constant 0 : index
    %48 = vector.load %arg15[%c0_37, %c0_38] : memref<8x8xf32, #tpu.memory_space<vmem>>, vector<8x8xf32>
    tpu.vector_store %arg15[%c0_37, %c0_38], %47 {strides = array<i32>} : memref<8x8xf32, #tpu.memory_space<vmem>>, vector<8x8xf32>,
    return
  }
  func.func @transform_0(%arg0: i32) -> (i32, i32) {
    %c0_i32 = arith.constant 0 : i32
    %c0_i32_0 = arith.constant 0 : i32
    return %arg0, %c0_i32 : i32, i32
  }
  func.func @transform_1(%arg0: i32) -> (i32, i32) {
    %c0_i32 = arith.constant 0 : i32
    %c0_i32_0 = arith.constant 0 : i32
    %c0_i32_1 = arith.constant 0 : i32
    return %c0_i32, %c0_i32_0 : i32, i32
  }
  func.func @transform_2(%arg0: i32) -> (i32, i32) {
    %c0_i32 = arith.constant 0 : i32
    %c0_i32_0 = arith.constant 0 : i32
    %c0_i32_1 = arith.constant 0 : i32
    return %c0_i32, %c0_i32_0 : i32, i32
  }
  func.func @transform_3(%arg0: i32) -> (i32, i32) {
    %c0_i32 = arith.constant 0 : i32
    %c0_i32_0 = arith.constant 0 : i32
    %c0_i32_1 = arith.constant 0 : i32
    return %c0_i32, %c0_i32_0 : i32, i32
  }
  func.func @transform_4(%arg0: i32) -> (i32, i32) {
    %c0_i32 = arith.constant 0 : i32
    %c0_i32_0 = arith.constant 0 : i32
    %c0_i32_1 = arith.constant 0 : i32
    return %c0_i32, %c0_i32_0 : i32, i32
  }
  func.func @transform_5(%arg0: i32) -> (i32, i32) {
    %c0_i32 = arith.constant 0 : i32
    %c0_i32_0 = arith.constant 0 : i32
    %c0_i32_1 = arith.constant 0 : i32
    return %c0_i32, %c0_i32_0 : i32, i32
  }
  func.func @transform_6(%arg0: i32) -> (i32, i32) {
    %c0_i32 = arith.constant 0 : i32
    %c0_i32_0 = arith.constant 0 : i32
    %c0_i32_1 = arith.constant 0 : i32
    return %c0_i32, %c0_i32_0 : i32, i32
  }
  func.func @transform_7(%arg0: i32) -> (i32, i32) {
    %c0_i32 = arith.constant 0 : i32
    %c0_i32_0 = arith.constant 0 : i32
    %c0_i32_1 = arith.constant 0 : i32
    return %c0_i32, %c0_i32_0 : i32, i32
  }
  func.func @transform_8(%arg0: i32) -> (i32, i32) {
    %c0_i32 = arith.constant 0 : i32
    %c0_i32_0 = arith.constant 0 : i32
    %c0_i32_1 = arith.constant 0 : i32
    return %c0_i32, %c0_i32_0 : i32, i32
  }
  func.func @transform_9(%arg0: i32) -> (i32, i32) {
    %c0_i32 = arith.constant 0 : i32
    %c0_i32_0 = arith.constant 0 : i32
    %c0_i32_1 = arith.constant 0 : i32
    return %c0_i32, %c0_i32_0 : i32, i32
  }
  func.func @transform_10(%arg0: i32) -> (i32, i32) {
    %c0_i32 = arith.constant 0 : i32
    %c0_i32_0 = arith.constant 0 : i32
    %c0_i32_1 = arith.constant 0 : i32
    return %c0_i32, %c0_i32_0 : i32, i32
  }
  func.func @transform_11(%arg0: i32) -> (i32, i32) {
    %c0_i32 = arith.constant 0 : i32
    %c0_i32_0 = arith.constant 0 : i32
    %c0_i32_1 = arith.constant 0 : i32
    return %c0_i32, %c0_i32_0 : i32, i32
  }
  func.func @transform_12(%arg0: i32) -> (i32, i32) {
    %c0_i32 = arith.constant 0 : i32
    %c0_i32_0 = arith.constant 0 : i32
    %c0_i32_1 = arith.constant 0 : i32
    return %c0_i32, %c0_i32_0 : i32, i32
  }
  func.func @transform_13(%arg0: i32) -> (i32, i32) {
    %c0_i32 = arith.constant 0 : i32
    %c0_i32_0 = arith.constant 0 : i32
    return %arg0, %c0_i32 : i32, i32
  }
  func.func @transform_14(%arg0: i32) -> (i32, i32) {
    %c0_i32 = arith.constant 0 : i32
    %c0_i32_0 = arith.constant 0 : i32
    return %arg0, %c0_i32 : i32, i32
  }
}

</mosaic_0001>

<bundles_post_ra>
// kernel: tpu_custom_call.1
= control target key start
LH: loop header
LB: loop body
LE: loop exit
PB: predicated region body
PF: predicated region fallthrough
CT: control target
= control target key end

     0   :  { %20 = vsyncpa [#allocation3], 0  ;;  %s9304_s0 = inlined_call_operand.vmem [shape: f32[8,24], index: 0, kind: input, shape index: {}]   ;;  %s9305_s1 = inlined_call_operand.vmem [shape: bf16[24,800], index: 1, kind: input, shape index: {}]   ;;  %s9306_s2 = inlined_call_operand.vmem [shape: f32[1,800], index: 2, kind: input, shape index: {}]   ;;  %s9307_s3 = inlined_call_operand.hbm [shape: bf16[800,600], index: 3, kind: input, shape index: {}]   ;;  %s9308_s4 = inlined_call_operand.vmem [shape: f32[1,600], index: 4, kind: input, shape index: {}]   ;;  %s9309_s5 = inlined_call_operand.vmem [shape: bf16[600,8], index: 5, kind: input, shape index: {}]   ;;  %s9310_s6 = inlined_call_operand.vmem [shape: f32[1,8], index: 6, kind: input, shape index: {}]   ;;  %s9311_s7 = inlined_call_operand.vmem [shape: bf16[24,800], index: 7, kind: input, shape index: {}]   ;;  %s9312_s8 = inlined_call_operand.vmem [shape: f32[1,800], index: 8, kind: input, shape index: {}]   ;;  %s9313_s9 = inlined_call_operand.hbm [shape: bf16[800,600], index: 9, kind: input, shape index: {}]   ;;  %s9314_s10 = inlined_call_operand.vmem [shape: f32[1,600], index: 10, kind: input, shape index: {}]   ;;  %s9315_s11 = inlined_call_operand.vmem [shape: bf16[600,8], index: 11, kind: input, shape index: {}]   ;;  %s9316_s12 = inlined_call_operand.vmem [shape: f32[1,8], index: 12, kind: input, shape index: {}]   ;;  %s9317_s13 = inlined_call_operand.hbm [shape: f32[8,8], index: 13, kind: output, shape index: {0}]   ;;  %s9318_s14 = inlined_call_operand.hbm [shape: f32[8,8], index: 14, kind: output, shape index: {1}]  }
   0x1   :  { %21 = vsyncpa [#allocation6], 0 }
   0x2   :  { %22 = vsyncpa [#allocation4], 0 }
   0x3   :  { %23 = vsyncpa [#allocation9], 0  ;;  %s34_s15 = sshll.u32 %s9307_s3, 4  ;;  %s8535_s16 = smov [#allocation2]   ;;  %s35_s15 = int_to_ptr.hbm [resolvable:$true] %s34_s15 }
   0x4   :  { %s36_s17 = sshll.u32 %s8535_s16, 4  ;;  %s57_s20 = sshll.u32 %s9313_s9, 4  ;;  %s37_s17 = int_to_ptr.vmem [resolvable:$true] %s36_s17  ;;  %s58_s20 = int_to_ptr.hbm [resolvable:$true] %s57_s20 }
   0x5   :  { %s8536_s21 = smov 320   ;;  %s8537_s22 = smov 20  }
   0x6   :  { %42 = dma.hbm_to_vmem [thread:$0]  %s35_s15, 32000, %s37_s17, [#allocation3], %s8536_s21, %s8536_s21, %s8537_s22  }
   0x7   :  { %s8538_s23 = smov [#allocation5]  }
   0x8   :  { %s59_s24 = sshll.u32 %s8538_s23, 4  ;;  %s60_s24 = int_to_ptr.vmem [resolvable:$true] %s59_s24 }
   0x9   :  { %65 = dma.hbm_to_vmem [thread:$0]  %s58_s20, 32000, %s60_s24, [#allocation6], %s8536_s21, %s8536_s21, %s8537_s22  }
   0xa   :  { %8527 = dma.done.wait [#allocation3], 32000  }
   0xb   :  { %8528 = vsyncadd [#allocation3], 4294935296 }
   0xc   :  { %8529 = dma.done.wait [#allocation6], 32000  }
   0xd   :  { %8530 = vsyncadd [#allocation6], 4294935296  ;;  %v91_v0 = vld [vmem:[%s9305_s1 + $0x38] sm:$0xff]  ;;  %v92_v1 = vld [vmem:[%s9305_s1 + $0x40] sm:$0xff]  ;;  %vm169_vm0 = vcmask 1043456   ;;  %vm165_vm1 = vcmask 195584  }
   0xe   :  { %v137_v2 = vunpack.c.l.b16 %v91_v0  ;;  %v138_v3 = vunpack.c.h.b16 %v91_v0  ;;  %v140_v4 = vunpack.c.h.b16 %v92_v1  ;;  %v139_v5 = vunpack.c.l.b16 %v92_v1  ;;  %v5457_v6 = vld [vmem:[%s9305_s1] sm:$0xf]  ;;  %v7836_v7 = vld [vmem:[%s9305_s1 + $0x18] sm:$0xf0]  ;;  %v7833_v11 = vld [vmem:[%s9305_s1 + $0x4] sm:$0xf] }
   0xf   :  { %v5459_v12 = vld [vmem:[%s9305_s1 + $0x1c] sm:$0xf0]  ;;  %v93_v13 = vld [vmem:[%s9305_s1 + $0x48] sm:$0xff]  ;;  %v5458_v21 = vor.u32 %v7836_v7, %v5457_v6  ;;  %v94_v27 = vld [vmem:[%s9305_s1 + $0x50] sm:$0xf]  ;;  %vm1908_vm2 = vcmask 261120  }
  0x10   :  { %v151_v8 = vpack.c.b16 %v137_v2, %v137_v2  ;;  %v152_v9 = vpack.c.b16 %v138_v3, %v138_v3  ;;  %v154_v10 = vpack.c.b16 %v140_v4, %v140_v4  ;;  %v7834_v14 = vld [vmem:[%s9305_s1 + $0xc] sm:$0xf]  ;;  %v5467_v15 = vld [vmem:[%s9305_s1 + $0x24] sm:$0xf0]  ;;  %v153_v16 = vpack.c.b16 %v139_v5, %v139_v5  ;;  %v81_v23 = vld [vmem:[%s9304_s0] sm:$0xff]  ;;  %s8539_s9 = smov [#allocation7]  }
  0x11   :  { %v142_v17 = vunpack.c.h.b16 %v93_v13  ;;  %v5462_v22 = vor.u32 %v7833_v11, %v5459_v12  ;;  %v5465_v25 = vld [vmem:[%s9305_s1 + $0x8] sm:$0xf]  ;;  %v141_v26 = vunpack.c.l.b16 %v93_v13  ;;  %v5470_v28 = vor.u32 %v7834_v14, %v5467_v15  ;;  %v7837_v29 = vld [vmem:[%s9305_s1 + $0x20] sm:$0xf0]  ;;  %v7835_v32 = vld [vmem:[%s9305_s1 + $0x14] sm:$0xf] }
  0x12   :  { %v171_v18 = vsel %vm169_vm0, %v151_v8, 0  ;;  %v174_v19 = vsel %vm169_vm0, %v152_v9, 0  ;;  %v180_v20 = vsel %vm169_vm0, %v154_v10, 0  ;;  %v143_v30 = vunpack.c.l.b16 %v94_v27  ;;  %v5475_v33 = vld [vmem:[%s9305_s1 + $0x2c] sm:$0xf0]  ;;  %s8540_s29 = smov [#allocation8]  }
  0x13   :  { %197 = vmatpush.bf16.msra.mxu2 %v171_v18  ;;  %210 = vmatpush.bf16.msra.mxu1 %v174_v19  ;;  %v156_v24 = vpack.c.b16 %v142_v17, %v142_v17  ;;  %v177_v31 = vsel %vm169_vm0, %v153_v16, 0  ;;  %v155_v34 = vpack.c.b16 %v141_v26, %v141_v26  ;;  %v8671_v35 = vpack.c.bf16 %v81_v23, %v81_v23  ;;  %v5473_v37 = vld [vmem:[%s9305_s1 + $0x10] sm:$0xf]  ;;  %v7838_v38 = vld [vmem:[%s9305_s1 + $0x28] sm:$0xf0]  ;;  %s5437_s30 = sshll.u32 %s8540_s29, 4  ;;  %s5438_s30 = int_to_ptr.vmem [resolvable:$true] %s5437_s30 }
  0x14   :  { %236 = vmatpush.bf16.msra.mxu3 %v180_v20  ;;  %v157_v39 = vpack.c.b16 %v143_v30, %v143_v30  ;;  %v5466_v41 = vor.u32 %v7837_v29, %v5465_v25  ;;  %v5478_v42 = vor.u32 %v7835_v32, %v5475_v33  ;;  %v5474_v43 = vor.u32 %v7838_v38, %v5473_v37  ;;  %v5481_v45 = vld [vmem:[%s9305_s1 + $0x18] sm:$0xf]  ;;  %v7839_v46 = vld [vmem:[%s9305_s1 + $0x30] sm:$0xf0]  ;;  %v7917_v48 = vld [vmem:[#allocation2 + $0x268] sm:$0xf0] }
  0x15   :  { %v186_v36 = vsel %vm169_vm0, %v156_v24, 0  ;;  %v183_v40 = vsel %vm169_vm0, %v155_v34, 0  ;;  %v5792_v47 = vld [vmem:[#allocation2 + $0x258] sm:$0xf]  ;;  %v5772_v49 = vld [vmem:[#allocation2 + $0x230] sm:$0xf]  ;;  %v5482_v57 = vor.u32 %v7839_v46, %v5481_v45 }
  0x16   :  { %249 = vmatpush.bf16.msra.mxu0 %v183_v40  ;;  %v189_v44 = vsel %vm169_vm0, %v157_v39, 0  ;;  %v5793_v50 = vor.u32 %v7917_v48, %v5792_v47  ;;  %v7912_v51 = vld [vmem:[#allocation2 + $0x240] sm:$0xf0]  ;;  %v5632_v52 = vld [vmem:[#allocation2 + $0x118] sm:$0xf]  ;;  %vm2681_vm3 = vcmask 719872  }
  0x17   :  { %198 = vmatpush.bf16.msra.mxu2 %v5458_v21  ;;  %211 = vmatpush.bf16.msra.mxu1 %v5462_v22  ;;  %v7877_v53 = vld [vmem:[#allocation2 + $0x128] sm:$0xf0]  ;;  %v5612_v55 = vld [vmem:[#allocation2 + $0xf0] sm:$0xf]  ;;  %v7872_v56 = vld [vmem:[#allocation2 + $0x100] sm:$0xf0]  ;;  %v5773_v58 = vor.u32 %v7912_v51, %v5772_v49 }
  0x18   :  { %237 = vmatpush.bf16.msra.mxu3 %v5470_v28  ;;  %v5633_v54 = vor.u32 %v7877_v53, %v5632_v52  ;;  %v5752_v59 = vld [vmem:[#allocation2 + $0x208] sm:$0xf]  ;;  %v7907_v60 = vld [vmem:[#allocation2 + $0x218] sm:$0xf0]  ;;  %v5613_v61 = vor.u32 %v7872_v56, %v5612_v55  ;;  %v6112_v1 = vld [vmem:[#allocation2 + $0x4d8] sm:$0xf] }
  0x19   :  { %v5592_v62 = vld [vmem:[#allocation2 + $0xc8] sm:$0xf]  ;;  %v7867_v63 = vld [vmem:[#allocation2 + $0xd8] sm:$0xf0]  ;;  %v5753_v0 = vor.u32 %v7907_v60, %v5752_v59  ;;  %v7997_v3 = vld [vmem:[#allocation2 + $0x4e8] sm:$0xf0] }
  0x1a   :  { %5483 = vmatmul.msk.bf16.vlgmr.msra.gmra.mxu2 %vm165_vm1, %v8671_v35  ;;  %5484 = vmatmul.msk.bf16.vlgmr.msra.gmra.mxu1 %vm165_vm1, %v8671_v35  ;;  %v5593_v2 = vor.u32 %v7867_v63, %v5592_v62  ;;  %v5732_v4 = vld [vmem:[#allocation2 + $0x1e0] sm:$0xf]  ;;  %v7902_v5 = vld [vmem:[#allocation2 + $0x1f0] sm:$0xf0]  ;;  %v6113_v8 = vor.u32 %v7997_v3, %v6112_v1  ;;  %v6092_v9 = vld [vmem:[#allocation2 + $0x4b0] sm:$0xf] }
  0x1b   :  { %223 = vmatpush.bf16.msrb.mxu2 %v177_v31  ;;  %262 = vmatpush.bf16.msrb.mxu1 %v186_v36  ;;  %v5572_v6 = vld [vmem:[#allocation2 + $0xa0] sm:$0xf]  ;;  %v7862_v7 = vld [vmem:[#allocation2 + $0xb0] sm:$0xf0]  ;;  %v5733_v10 = vor.u32 %v7902_v5, %v5732_v4  ;;  %v7992_v11 = vld [vmem:[#allocation2 + $0x4c0] sm:$0xf0] }
  0x1c   :  { %5486 = vmatmul.msk.bf16.vlgmr.msra.gmra.mxu3 %vm165_vm1, %v8671_v35  ;;  %250 = vmatpush.bf16.msra.mxu0 %v5474_v43  ;;  %v5712_v12 = vld [vmem:[#allocation2 + $0x1b8] sm:$0xf]  ;;  %v7897_v13 = vld [vmem:[#allocation2 + $0x1c8] sm:$0xf0]  ;;  %v5573_v14 = vor.u32 %v7862_v7, %v5572_v6  ;;  %v6093_v17 = vor.u32 %v7992_v11, %v6092_v9  ;;  %v6072_v18 = vld [vmem:[#allocation2 + $0x488] sm:$0xf] }
  0x1d   :  { %1912 = vmatpush.bf16.msrb.mxu3 %v5633_v54  ;;  %v5552_v15 = vld [vmem:[#allocation2 + $0x78] sm:$0xf]  ;;  %v7857_v16 = vld [vmem:[#allocation2 + $0x88] sm:$0xf0]  ;;  %v5713_v19 = vor.u32 %v7897_v13, %v5712_v12  ;;  %v7987_v20 = vld [vmem:[#allocation2 + $0x498] sm:$0xf0] }
  0x1e   :  { %v5692_v21 = vld [vmem:[#allocation2 + $0x190] sm:$0xf]  ;;  %v7892_v22 = vld [vmem:[#allocation2 + $0x1a0] sm:$0xf0]  ;;  %v5553_v23 = vor.u32 %v7857_v16, %v5552_v15  ;;  %v6073_v26 = vor.u32 %v7987_v20, %v6072_v18  ;;  %v6052_v27 = vld [vmem:[#allocation2 + $0x460] sm:$0xf] }
  0x1f   :  { %224 = vmatpush.bf16.msrb.mxu2 %v5466_v41  ;;  %263 = vmatpush.bf16.msrb.mxu1 %v5478_v42  ;;  %v5532_v24 = vld [vmem:[#allocation2 + $0x50] sm:$0xf]  ;;  %v7852_v25 = vld [vmem:[#allocation2 + $0x60] sm:$0xf0]  ;;  %v7982_v28 = vld [vmem:[#allocation2 + $0x470] sm:$0xf0]  ;;  %v5693_v29 = vor.u32 %v7892_v22, %v5692_v21 }
  0x20   :  { %1925 = vmatpush.bf16.msrb.mxu0 %v5793_v50  ;;  %v5672_v30 = vld [vmem:[#allocation2 + $0x168] sm:$0xf]  ;;  %v7887_v31 = vld [vmem:[#allocation2 + $0x178] sm:$0xf0]  ;;  %v5533_v32 = vor.u32 %v7852_v25, %v5532_v24  ;;  %v5952_v36 = vld [vmem:[#allocation2 + $0x398] sm:$0xf]  ;;  %v6053_v40 = vor.u32 %v7982_v28, %v6052_v27 }
  0x21   :  { %5487 = vmatmul.msk.bf16.vlgmr.msra.gmra.mxu0 %vm165_vm1, %v8671_v35  ;;  %1913 = vmatpush.bf16.msrb.mxu3 %v5613_v61  ;;  %v5512_v33 = vld [vmem:[#allocation2 + $0x28] sm:$0xf]  ;;  %v7847_v34 = vld [vmem:[#allocation2 + $0x38] sm:$0xf0]  ;;  %v7957_v37 = vld [vmem:[#allocation2 + $0x3a8] sm:$0xf0]  ;;  %v5673_v42 = vor.u32 %v7887_v31, %v5672_v30 }
  0x22   :  { %v6032_v38 = vld [vmem:[#allocation2 + $0x438] sm:$0xf]  ;;  %v5953_v39 = vor.u32 %v7957_v37, %v5952_v36  ;;  %v7977_v41 = vld [vmem:[#allocation2 + $0x448] sm:$0xf0]  ;;  %v5652_v43 = vld [vmem:[#allocation2 + $0x140] sm:$0xf]  ;;  %v5513_v47 = vor.u32 %v7847_v34, %v5512_v33 }
  0x23   :  { %275 = vmatpush.bf16.msra.mxu2 %v189_v44  ;;  %v7882_v44 = vld [vmem:[#allocation2 + $0x150] sm:$0xf0]  ;;  %v6432_v45 = vld [vmem:[#allocation2 + $0x758] sm:$0xf]  ;;  %v8077_v46 = vld [vmem:[#allocation2 + $0x768] sm:$0xf0]  ;;  %v6033_v55 = vor.u32 %v7977_v41, %v6032_v38 }
  0x24   :  { %1926 = vmatpush.bf16.msrb.mxu0 %v5773_v58  ;;  %1938 = vmatpush.bf16.msra.mxu1 %v5953_v39  ;;  %v5932_v48 = vld [vmem:[#allocation2 + $0x370] sm:$0xf]  ;;  %v5492_v49 = vld [vmem:[#allocation2] sm:$0xf]  ;;  %v7842_v50 = vld [vmem:[#allocation2 + $0x10] sm:$0xf0]  ;;  %v5653_v56 = vor.u32 %v7882_v44, %v5652_v43  ;;  %v6433_v59 = vor.u32 %v8077_v46, %v6432_v45 }
  0x25   :  { %1914 = vmatpush.bf16.msrb.mxu3 %v5593_v2  ;;  %v7952_v51 = vld [vmem:[#allocation2 + $0x380] sm:$0xf0]  ;;  %v6272_v52 = vld [vmem:[#allocation2 + $0x618] sm:$0xf]  ;;  %v8037_v53 = vld [vmem:[#allocation2 + $0x628] sm:$0xf0]  ;;  %v5493_v60 = vor.u32 %v7842_v50, %v5492_v49 }
  0x26   :  { %v5933_v54 = vor.u32 %v7952_v51, %v5932_v48  ;;  %v7972_v58 = vld [vmem:[#allocation2 + $0x420] sm:$0xf0]  ;;  %v6412_v61 = vld [vmem:[#allocation2 + $0x730] sm:$0xf]  ;;  %v6273_v63 = vor.u32 %v8037_v53, %v6272_v52  ;;  %v5992_v3 = vld [vmem:[#allocation2 + $0x3e8] sm:$0xf] }
  0x27   :  { %276 = vmatpush.bf16.msra.mxu2 %v5482_v57  ;;  %v6012_v57 = vld [vmem:[#allocation2 + $0x410] sm:$0xf]  ;;  %v8072_v62 = vld [vmem:[#allocation2 + $0x740] sm:$0xf0]  ;;  %v7967_v4 = vld [vmem:[#allocation2 + $0x3f8] sm:$0xf0] }
  0x28   :  { %1927 = vmatpush.bf16.msrb.mxu0 %v5753_v0  ;;  %1939 = vmatpush.bf16.msra.mxu1 %v5933_v54  ;;  %v6252_v0 = vld [vmem:[#allocation2 + $0x5f0] sm:$0xf]  ;;  %v8032_v1 = vld [vmem:[#allocation2 + $0x600] sm:$0xf0]  ;;  %v6013_v2 = vor.u32 %v7972_v58, %v6012_v57  ;;  %v6413_v5 = vor.u32 %v8072_v62, %v6412_v61  ;;  %v6392_v6 = vld [vmem:[#allocation2 + $0x708] sm:$0xf]  ;;  %v5993_v11 = vor.u32 %v7967_v4, %v5992_v3 }
  0x29   :  { %1915 = vmatpush.bf16.msrb.mxu3 %v5573_v14  ;;  %v8067_v7 = vld [vmem:[#allocation2 + $0x718] sm:$0xf0]  ;;  %v6232_v9 = vld [vmem:[#allocation2 + $0x5c8] sm:$0xf]  ;;  %v5972_v12 = vld [vmem:[#allocation2 + $0x3c0] sm:$0xf] }
  0x2a   :  { %5485 = vmatmul.msk.bf16.vlgmr.msrb.gmra.mxu2 %vm165_vm1, %v8671_v35  ;;  %5488 = vmatmul.msk.bf16.vlgmr.msrb.gmra.mxu1 %vm165_vm1, %v8671_v35  ;;  %v7962_v13 = vld [vmem:[#allocation2 + $0x3d0] sm:$0xf0]  ;;  %v7875_v14 = vld [vmem:[#allocation2 + $0x11c] sm:$0xf]  ;;  %v6393_v15 = vor.u32 %v8067_v7, %v6392_v6  ;;  %v5634_v16 = vld [vmem:[#allocation2 + $0x12c] sm:$0xf0] }
  0x2b   :  { %1951 = vmatpush.bf16.msrb.mxu2 %v6113_v8  ;;  %v6253_v8 = vor.u32 %v8032_v1, %v6252_v0  ;;  %v8062_v18 = vld [vmem:[#allocation2 + $0x6f0] sm:$0xf0]  ;;  %v6212_v20 = vld [vmem:[#allocation2 + $0x5a0] sm:$0xf]  ;;  %v5973_v22 = vor.u32 %v7962_v13, %v5972_v12  ;;  %v6352_v27 = vld [vmem:[#allocation2 + $0x6b8] sm:$0xf] }
  0x2c   :  { %1928 = vmatpush.bf16.msrb.mxu0 %v5733_v10  ;;  %v8027_v10 = vld [vmem:[#allocation2 + $0x5d8] sm:$0xf0]  ;;  %v8022_v21 = vld [vmem:[#allocation2 + $0x5b0] sm:$0xf0]  ;;  %v8057_v28 = vld [vmem:[#allocation2 + $0x6c8] sm:$0xf0] }
  0x2d   :  { %1916 = vmatpush.bf16.msrb.mxu3 %v5553_v23  ;;  %v5637_v23 = vor.u32 %v7875_v14, %v5634_v16  ;;  %v7870_v24 = vld [vmem:[#allocation2 + $0xf4] sm:$0xf]  ;;  %v7865_v31 = vld [vmem:[#allocation2 + $0xcc] sm:$0xf]  ;;  %v5594_v33 = vld [vmem:[#allocation2 + $0xdc] sm:$0xf0] }
  0x2e   :  { %v6332_v34 = vld [vmem:[#allocation2 + $0x690] sm:$0xf]  ;;  %v8052_v36 = vld [vmem:[#allocation2 + $0x6a0] sm:$0xf0]  ;;  %v5597_v37 = vor.u32 %v7865_v31, %v5594_v33  ;;  %v8017_v43 = vld [vmem:[#allocation2 + $0x588] sm:$0xf0] }
  0x2f   :  { %1952 = vmatpush.bf16.msrb.mxu2 %v6093_v17  ;;  %v6372_v17 = vld [vmem:[#allocation2 + $0x6e0] sm:$0xf]  ;;  %v6333_v38 = vor.u32 %v8052_v36, %v6332_v34  ;;  %v7860_v39 = vld [vmem:[#allocation2 + $0xa4] sm:$0xf]  ;;  %v7855_v44 = vld [vmem:[#allocation2 + $0x7c] sm:$0xf] }
  0x30   :  { %1929 = vmatpush.bf16.msrb.mxu0 %v5713_v19  ;;  %v6233_v19 = vor.u32 %v8027_v10, %v6232_v9  ;;  %v6373_v25 = vor.u32 %v8062_v18, %v6372_v17  ;;  %v5554_v46 = vld [vmem:[#allocation2 + $0x8c] sm:$0xf0]  ;;  %v6312_v48 = vld [vmem:[#allocation2 + $0x668] sm:$0xf]  ;;  %v8047_v49 = vld [vmem:[#allocation2 + $0x678] sm:$0xf0] }
  0x31   :  { %1917 = vmatpush.bf16.msrb.mxu3 %v5533_v32  ;;  %v6353_v32 = vor.u32 %v8057_v28, %v6352_v27  ;;  %v6313_v50 = vor.u32 %v8047_v49, %v6312_v48  ;;  %v5912_v51 = vld [vmem:[#allocation2 + $0x348] sm:$0xf]  ;;  %v7947_v52 = vld [vmem:[#allocation2 + $0x358] sm:$0xf0]  ;;  %v6172_v54 = vld [vmem:[#allocation2 + $0x550] sm:$0xf] }
  0x32   :  { %v5913_v53 = vor.u32 %v7947_v52, %v5912_v51  ;;  %v5534_v58 = vld [vmem:[#allocation2 + $0x64] sm:$0xf0]  ;;  %v8042_v61 = vld [vmem:[#allocation2 + $0x650] sm:$0xf0]  ;;  %v8007_v3 = vld [vmem:[#allocation2 + $0x538] sm:$0xf0] }
  0x33   :  { %1953 = vmatpush.bf16.msrb.mxu2 %v6073_v26  ;;  %v5614_v26 = vld [vmem:[#allocation2 + $0x104] sm:$0xf0]  ;;  %v7942_v0 = vld [vmem:[#allocation2 + $0x330] sm:$0xf0]  ;;  %v7845_v4 = vld [vmem:[#allocation2 + $0x2c] sm:$0xf] }
  0x34   :  { %1930 = vmatpush.bf16.msrb.mxu0 %v5693_v29  ;;  %v6213_v29 = vor.u32 %v8022_v21, %v6212_v20  ;;  %v5617_v30 = vor.u32 %v7870_v24, %v5614_v26  ;;  %1940 = vmatpush.bf16.msra.mxu1 %v5913_v53  ;;  %v5514_v6 = vld [vmem:[#allocation2 + $0x3c] sm:$0xf0]  ;;  %v7937_v9 = vld [vmem:[#allocation2 + $0x308] sm:$0xf0]  ;;  %v8002_v12 = vld [vmem:[#allocation2 + $0x510] sm:$0xf0] }
  0x35   :  { %1918 = vmatpush.bf16.msrb.mxu3 %v5513_v47  ;;  %v5557_v47 = vor.u32 %v7855_v44, %v5554_v46  ;;  %v5517_v7 = vor.u32 %v7845_v4, %v5514_v6  ;;  %v7840_v14 = vld [vmem:[#allocation2 + $0x4] sm:$0xf]  ;;  %v5852_v17 = vld [vmem:[#allocation2 + $0x2d0] sm:$0xf]  ;;  %v5832_v20 = vld [vmem:[#allocation2 + $0x2a8] sm:$0xf] }
  0x36   :  { %v7932_v18 = vld [vmem:[#allocation2 + $0x2e0] sm:$0xf0]  ;;  %v7927_v21 = vld [vmem:[#allocation2 + $0x2b8] sm:$0xf0]  ;;  %v7922_v24 = vld [vmem:[#allocation2 + $0x290] sm:$0xf0] }
  0x37   :  { %1954 = vmatpush.bf16.msrb.mxu2 %v6053_v40  ;;  %v5574_v40 = vld [vmem:[#allocation2 + $0xb4] sm:$0xf0]  ;;  %v6472_v26 = vld [vmem:[#allocation2 + $0x7a8] sm:$0xf]  ;;  %v8087_v27 = vld [vmem:[#allocation2 + $0x7b8] sm:$0xf0] }
  0x38   :  { %1931 = vmatpush.bf16.msrb.mxu0 %v5673_v42  ;;  %v5577_v41 = vor.u32 %v7860_v39, %v5574_v40  ;;  %v6192_v42 = vld [vmem:[#allocation2 + $0x578] sm:$0xf]  ;;  %v6473_v28 = vor.u32 %v8087_v27, %v6472_v26  ;;  %v8082_v31 = vld [vmem:[#allocation2 + $0x790] sm:$0xf0]  ;;  %v5954_v51 = vld [vmem:[#allocation2 + $0x3ac] sm:$0xf0] }
  0x39   :  { %1919 = vmatpush.bf16.msrb.mxu3 %v5493_v60  ;;  %v6193_v45 = vor.u32 %v8017_v43, %v6192_v42  ;;  %v6292_v60 = vld [vmem:[#allocation2 + $0x640] sm:$0xf]  ;;  %v7990_v44 = vld [vmem:[#allocation2 + $0x4b4] sm:$0xf]  ;;  %vm2755_vm4 = vcmask 64512   ;;  %s5439_s15 = sshll.u32 %s9318_s14, 4  ;;  %s5440_s15 = int_to_ptr.hbm [resolvable:$true] %s5439_s15 }
  0x3a   :  { %5489 = vmatmul.msk.bf16.vlgmr.msra.gmra.mxu2 %vm165_vm1, %v8671_v35  ;;  %v6293_v62 = vor.u32 %v8042_v61, %v6292_v60  ;;  %v8030_v4 = vld [vmem:[#allocation2 + $0x5f4] sm:$0xf] }
  0x3b   :  { %1955 = vmatpush.bf16.msrb.mxu2 %v6033_v55  ;;  %v8012_v55 = vld [vmem:[#allocation2 + $0x560] sm:$0xf0] }
  0x3c   :  { %1932 = vmatpush.bf16.msrb.mxu0 %v5653_v56  ;;  %v7850_v56 = vld [vmem:[#allocation2 + $0x54] sm:$0xf]  ;;  %v6173_v57 = vor.u32 %v8012_v55, %v6172_v54  ;;  %v8035_v55 = vld [vmem:[#allocation2 + $0x61c] sm:$0xf] }
  0x3d   :  { %1964 = vmatpush.bf16.msra.mxu3 %v6273_v63  ;;  %v5892_v63 = vld [vmem:[#allocation2 + $0x320] sm:$0xf] }
  0x3e   :  { %v5893_v1 = vor.u32 %v7942_v0, %v5892_v63  ;;  %v7950_v0 = vld [vmem:[#allocation2 + $0x374] sm:$0xf] }
  0x3f   :  { %1956 = vmatpush.bf16.msrb.mxu2 %v6013_v2  ;;  %v6152_v2 = vld [vmem:[#allocation2 + $0x528] sm:$0xf] }
  0x40   :  { %1977 = vmatpush.bf16.msra.mxu0 %v6433_v59  ;;  %v5537_v59 = vor.u32 %v7850_v56, %v5534_v58  ;;  %1941 = vmatpush.bf16.msra.mxu1 %v5893_v1  ;;  %v6274_v56 = vld [vmem:[#allocation2 + $0x62c] sm:$0xf0]  ;;  %v7985_v58 = vld [vmem:[#allocation2 + $0x48c] sm:$0xf]  ;;  %v5934_v1 = vld [vmem:[#allocation2 + $0x384] sm:$0xf0] }
  0x41   :  { %1965 = vmatpush.bf16.msra.mxu3 %v6253_v8  ;;  %v5872_v8 = vld [vmem:[#allocation2 + $0x2f8] sm:$0xf]  ;;  %v6277_v63 = vor.u32 %v8035_v55, %v6274_v56  ;;  %v7965_v55 = vld [vmem:[#allocation2 + $0x3ec] sm:$0xf]  ;;  %v5994_v56 = vld [vmem:[#allocation2 + $0x3fc] sm:$0xf0] }
  0x42   :  { %v5873_v10 = vor.u32 %v7937_v9, %v5872_v8  ;;  %v6054_v8 = vld [vmem:[#allocation2 + $0x474] sm:$0xf0] }
  0x43   :  { %1957 = vmatpush.bf16.msrb.mxu2 %v5993_v11  ;;  %v6132_v11 = vld [vmem:[#allocation2 + $0x500] sm:$0xf] }
  0x44   :  { %1978 = vmatpush.bf16.msra.mxu0 %v6413_v5  ;;  %v6153_v5 = vor.u32 %v8007_v3, %v6152_v2  ;;  %v6133_v13 = vor.u32 %v8002_v12, %v6132_v11  ;;  %1942 = vmatpush.bf16.msra.mxu1 %v5873_v10  ;;  %v5937_v11 = vor.u32 %v7950_v0, %v5934_v1  ;;  %v7930_v0 = vld [vmem:[#allocation2 + $0x2d4] sm:$0xf] }
  0x45   :  { %1966 = vmatpush.bf16.msra.mxu3 %v6233_v19  ;;  %v5853_v19 = vor.u32 %v7932_v18, %v5852_v17  ;;  %v5997_v1 = vor.u32 %v7965_v55, %v5994_v56  ;;  %v6454_v55 = vld [vmem:[#allocation2 + $0x794] sm:$0xf0] }
  0x46   :  { %v5780_v56 = vld [vmem:[#allocation2 + $0x238] sm:$0xf] }
  0x47   :  { %1958 = vmatpush.bf16.msrb.mxu2 %v5973_v22  ;;  %v5833_v22 = vor.u32 %v7927_v21, %v5832_v20  ;;  %v6234_v20 = vld [vmem:[#allocation2 + $0x5dc] sm:$0xf0] }
  0x48   :  { %1979 = vmatpush.bf16.msra.mxu0 %v6393_v15  ;;  %v5494_v15 = vld [vmem:[#allocation2 + $0x14] sm:$0xf0]  ;;  %1943 = vmatpush.bf16.msra.mxu1 %v5853_v19  ;;  %v8025_v19 = vld [vmem:[#allocation2 + $0x5cc] sm:$0xf] }
  0x49   :  { %1967 = vmatpush.bf16.msra.mxu3 %v6213_v29  ;;  %v5497_v16 = vor.u32 %v7840_v14, %v5494_v15  ;;  %v8705_v29 = vld [vmem:[%s9306_s2] sm:$0x7f]  ;;  %v7945_v14 = vld [vmem:[#allocation2 + $0x34c] sm:$0xf]  ;;  %v6237_v27 = vor.u32 %v8025_v19, %v6234_v20 }
  0x4a   :  { %v98_v33 = vperm.slane %v8705_v29, 1  ;;  %v97_v40 = vperm.slane %v8705_v29, 0  ;;  %v102_v6 = vperm.slane %v8705_v29, 5  ;;  %v101_v9 = vperm.slane %v8705_v29, 4  ;;  %v5914_v15 = vld [vmem:[#allocation2 + $0x35c] sm:$0xf0] }
  0x4b   :  { %2003 = vmatpush.bf16.msra.mxu2 %v5637_v23  ;;  %v5812_v23 = vld [vmem:[#allocation2 + $0x280] sm:$0xf]  ;;  %v8005_v19 = vld [vmem:[#allocation2 + $0x52c] sm:$0xf] }
  0x4c   :  { %1980 = vmatpush.bf16.msra.mxu0 %v6373_v25  ;;  %1944 = vmatpush.bf16.msra.mxu1 %v5833_v22  ;;  %v5813_v25 = vor.u32 %v7922_v24, %v5812_v23  ;;  %v7975_v23 = vld [vmem:[#allocation2 + $0x43c] sm:$0xf]  ;;  %v6034_v24 = vld [vmem:[#allocation2 + $0x44c] sm:$0xf0]  ;;  %v6154_v20 = vld [vmem:[#allocation2 + $0x53c] sm:$0xf0] }
  0x4d   :  { %1968 = vmatpush.bf16.msra.mxu3 %v6193_v45  ;;  %v6094_v45 = vld [vmem:[#allocation2 + $0x4c4] sm:$0xf0] }
  0x4e   :  { %v6097_v54 = vor.u32 %v7990_v44, %v6094_v45  ;;  %v7915_v45 = vld [vmem:[#allocation2 + $0x25c] sm:$0xf] }
  0x4f   :  { %2004 = vmatpush.bf16.msra.mxu2 %v5617_v30  ;;  %v6452_v30 = vld [vmem:[#allocation2 + $0x780] sm:$0xf] }
  0x50   :  { %1981 = vmatpush.bf16.msra.mxu0 %v6353_v32  ;;  %1945 = vmatpush.bf16.msra.mxu1 %v5813_v25  ;;  %v6453_v32 = vor.u32 %v8082_v31, %v6452_v30  ;;  %v5917_v25 = vor.u32 %v7945_v14, %v5914_v15  ;;  %v7940_v30 = vld [vmem:[#allocation2 + $0x324] sm:$0xf]  ;;  %v5894_v31 = vld [vmem:[#allocation2 + $0x334] sm:$0xf0]  ;;  %v7905_v14 = vld [vmem:[#allocation2 + $0x20c] sm:$0xf] }
  0x51   :  { %1969 = vmatpush.bf16.msra.mxu3 %v6173_v57  ;;  %v5754_v15 = vld [vmem:[#allocation2 + $0x21c] sm:$0xf0] }
  0x53   :  { %2005 = vmatpush.bf16.msra.mxu2 %v5597_v37  ;;  %v7995_v37 = vld [vmem:[#allocation2 + $0x4dc] sm:$0xf] }
  0x54   :  { %1982 = vmatpush.bf16.msra.mxu0 %v6333_v38  ;;  %1996 = vmatpush.bf16.msrb.mxu1 %v6473_v28  ;;  %v6114_v38 = vld [vmem:[#allocation2 + $0x4ec] sm:$0xf0]  ;;  %v99_v28 = vperm.slane %v8705_v29, 2 }
  0x55   :  { %1970 = vmatpush.bf16.msra.mxu3 %v6153_v5  ;;  %v6117_v42 = vor.u32 %v7995_v37, %v6114_v38  ;;  %v6254_v5 = vld [vmem:[#allocation2 + $0x604] sm:$0xf0]  ;;  %v7970_v38 = vld [vmem:[#allocation2 + $0x414] sm:$0xf] }
  0x57   :  { %2006 = vmatpush.bf16.msra.mxu2 %v5577_v41  ;;  %v100_v41 = vperm.slane %v8705_v29, 3 }
  0x58   :  { %1983 = vmatpush.bf16.msra.mxu0 %v6313_v50  ;;  %1997 = vmatpush.bf16.msrb.mxu1 %v6453_v32  ;;  %v7955_v50 = vld [vmem:[#allocation2 + $0x39c] sm:$0xf]  ;;  %v6037_v32 = vor.u32 %v7975_v23, %v6034_v24  ;;  %v5757_v23 = vor.u32 %v7905_v14, %v5754_v15  ;;  %v5620_v24 = vld [vmem:[#allocation2 + $0xf8] sm:$0xf] }
  0x59   :  { %1971 = vmatpush.bf16.msra.mxu3 %v6133_v13  ;;  %v5957_v61 = vor.u32 %v7955_v50, %v5954_v51  ;;  %v6257_v13 = vor.u32 %v8030_v4, %v6254_v5  ;;  %v8015_v50 = vld [vmem:[#allocation2 + $0x57c] sm:$0xf]  ;;  %v6194_v51 = vld [vmem:[#allocation2 + $0x58c] sm:$0xf0]  ;;  %v8010_v4 = vld [vmem:[#allocation2 + $0x554] sm:$0xf] }
  0x5a   :  { %v6174_v5 = vld [vmem:[#allocation2 + $0x564] sm:$0xf0] }
  0x5b   :  { %2007 = vmatpush.bf16.msra.mxu2 %v5557_v47 }
  0x5c   :  { %1984 = vmatpush.bf16.msra.mxu0 %v6293_v62 }
  0x5f   :  { %2008 = vmatpush.bf16.msra.mxu2 %v5537_v59  ;;  %v6074_v59 = vld [vmem:[#allocation2 + $0x49c] sm:$0xf0] }
  0x60   :  { %v6077_v3 = vor.u32 %v7985_v58, %v6074_v59 }
  0x63   :  { %2009 = vmatpush.bf16.msra.mxu2 %v5517_v7  ;;  %v7980_v7 = vld [vmem:[#allocation2 + $0x464] sm:$0xf] }
  0x64   :  { %v6057_v18 = vor.u32 %v7980_v7, %v6054_v8  ;;  %v5974_v7 = vld [vmem:[#allocation2 + $0x3d4] sm:$0xf0] }
  0x67   :  { %2010 = vmatpush.bf16.msra.mxu2 %v5497_v16 }
  0x97   :  { %v213_v34 = vpop.f32.mrf.mxu1 }
  0x98   :  { %v214_v36 = vadd.f32 %v213_v34, %v98_v33  ;;  %v8020_v33 = vld [vmem:[#allocation2 + $0x5a4] sm:$0xf]  ;;  %v6214_v34 = vld [vmem:[#allocation2 + $0x5b4] sm:$0xf0] }
  0x99   :  { %v6217_v44 = vor.u32 %v8020_v33, %v6214_v34  ;;  %v8000_v33 = vld [vmem:[#allocation2 + $0x504] sm:$0xf]  ;;  %v6134_v34 = vld [vmem:[#allocation2 + $0x514] sm:$0xf0] }
  0x9a   :  { %v283_v39 = vmax.f32 %v214_v36, 0.0 }
  0x9c   :  { %v8710_v43 = vpack.c.bf16 %v283_v39, %v283_v39  ;;  %v6014_v39 = vld [vmem:[#allocation2 + $0x424] sm:$0xf0] }
  0x9d   :  { %v200_v46 = vpop.f32.mrf.mxu2 }
  0x9e   :  { %v252_v47 = vpop.f32.mrf.mxu0  ;;  %v201_v48 = vadd.f32 %v200_v46, %v97_v40  ;;  %1933 = vmatmul.bf16.vlgmr.msrb.gmra.mxu0 %v8710_v43  ;;  %v5794_v46 = vld [vmem:[#allocation2 + $0x26c] sm:$0xf0] }
  0x9f   :  { %v239_v49 = vpop.f32.mrf.mxu3  ;;  %2042 = vmatpush.bf16.msrb.mxu0 %v6117_v42  ;;  %v215_v53 = vpop.f32.mrf.mxu1  ;;  %v253_v22 = vadd.f32 %v252_v47, %v101_v9  ;;  %v7935_v47 = vld [vmem:[#allocation2 + $0x2fc] sm:$0xf] }
  0xa0   :  { %v240_v52 = vadd.f32 %v239_v49, %v100_v41  ;;  %v282_v57 = vmax.f32 %v201_v48, 0.0  ;;  %v5897_v41 = vor.u32 %v7940_v30, %v5894_v31  ;;  %v6017_v48 = vor.u32 %v7970_v38, %v6014_v39  ;;  %v5874_v49 = vld [vmem:[#allocation2 + $0x30c] sm:$0xf0]  ;;  %v5734_v30 = vld [vmem:[#allocation2 + $0x1f4] sm:$0xf0] }
  0xa1   :  { %v286_v37 = vmax.f32 %v253_v22, 0.0  ;;  %v5877_v59 = vor.u32 %v7935_v47, %v5874_v49  ;;  %v103_v22 = vperm.slane %v8705_v29, 6  ;;  %v7920_v31 = vld [vmem:[#allocation2 + $0x284] sm:$0xf]  ;;  %v6474_v39 = vld [vmem:[#allocation2 + $0x7bc] sm:$0xf0] }
  0xa2   :  { %v285_v60 = vmax.f32 %v240_v52, 0.0  ;;  %v8713_v62 = vpack.c.bf16 %v282_v57, %v282_v57  ;;  %v5797_v57 = vor.u32 %v7915_v45, %v5794_v46  ;;  %v5800_v29 = vld [vmem:[#allocation2 + $0x260] sm:$0xf]  ;;  %v7868_v45 = vld [vmem:[#allocation2 + $0xe0] sm:$0xf0] }
  0xa3   :  { %2043 = vmatpush.bf16.msrb.mxu0 %v6097_v54  ;;  %v8725_v54 = vpack.c.bf16 %v286_v37, %v286_v37  ;;  %v8085_v37 = vld [vmem:[#allocation2 + $0x7ac] sm:$0xf]  ;;  %v7895_v49 = vld [vmem:[#allocation2 + $0x1bc] sm:$0xf] }
  0xa4   :  { %v8715_v2 = vpack.c.bf16 %v285_v60, %v285_v60  ;;  %1920 = vmatmul.bf16.vlgmr.msrb.gmra.mxu3 %v8713_v62  ;;  %v6197_v60 = vor.u32 %v8015_v50, %v6194_v51  ;;  %v5714_v50 = vld [vmem:[#allocation2 + $0x1cc] sm:$0xf0]  ;;  %v6477_v51 = vor.u32 %v8085_v37, %v6474_v39  ;;  %v8075_v37 = vld [vmem:[#allocation2 + $0x75c] sm:$0xf] }
  0xa5   :  { %2029 = vmatpush.bf16.msrb.mxu3 %v5957_v61  ;;  %v202_v10 = vpop.f32.mrf.mxu2  ;;  %v7910_v61 = vld [vmem:[#allocation2 + $0x234] sm:$0xf] }
  0xa6   :  { %1959 = vmatmul.bf16.vlgmr.msrb.gmra.mxu2 %v8715_v2  ;;  %v254_v12 = vpop.f32.mrf.mxu0  ;;  %v5640_v10 = vld [vmem:[#allocation2 + $0x120] sm:$0xf] }
  0xa7   :  { %2055 = vmatpush.bf16.msrb.mxu2 %v6277_v63  ;;  %v241_v16 = vpop.f32.mrf.mxu3  ;;  %2044 = vmatpush.bf16.msrb.mxu0 %v6077_v3  ;;  %v265_v17 = vpop.f32.mrf.mxu1  ;;  %v5774_v63 = vld [vmem:[#allocation2 + $0x244] sm:$0xf0] }
  0xa8   :  { %v266_v21 = vadd.f32 %v265_v17, %v102_v6  ;;  %v5854_v3 = vld [vmem:[#allocation2 + $0x2e4] sm:$0xf0]  ;;  %v7960_v6 = vld [vmem:[#allocation2 + $0x3c4] sm:$0xf]  ;;  %v5777_v9 = vor.u32 %v7910_v61, %v5774_v63  ;;  %v7925_v16 = vld [vmem:[#allocation2 + $0x2ac] sm:$0xf]  ;;  %v5717_v63 = vor.u32 %v7895_v49, %v5714_v50 }
  0xa9   :  { %2030 = vmatpush.bf16.msrb.mxu3 %v5937_v11  ;;  %v7878_v11 = vld [vmem:[#allocation2 + $0x130] sm:$0xf0]  ;;  %v5857_v12 = vor.u32 %v7930_v0, %v5854_v3  ;;  %v5977_v17 = vor.u32 %v7960_v6, %v5974_v7  ;;  %v5960_v61 = vld [vmem:[#allocation2 + $0x3a0] sm:$0xf]  ;;  %v7863_v3 = vld [vmem:[#allocation2 + $0xb8] sm:$0xf0] }
  0xaa   :  { %v287_v26 = vmax.f32 %v266_v21, 0.0  ;;  %v5641_v21 = vor.u32 %v7878_v11, %v5640_v10  ;;  %v7958_v0 = vld [vmem:[#allocation2 + $0x3b0] sm:$0xf0]  ;;  %v5694_v6 = vld [vmem:[#allocation2 + $0x1a4] sm:$0xf0] }
  0xab   :  { %2056 = vmatpush.bf16.msrb.mxu2 %v6257_v13  ;;  %2045 = vmatpush.bf16.msrb.mxu0 %v6057_v18  ;;  %v6177_v13 = vor.u32 %v8010_v4, %v6174_v5  ;;  %v5834_v18 = vld [vmem:[#allocation2 + $0x2bc] sm:$0xf0]  ;;  %v7890_v5 = vld [vmem:[#allocation2 + $0x194] sm:$0xf]  ;;  %v5760_v11 = vld [vmem:[#allocation2 + $0x210] sm:$0xf] }
  0xac   :  { %v8722_v36 = vpack.c.bf16 %v287_v26, %v287_v26  ;;  %v7900_v26 = vld [vmem:[#allocation2 + $0x1e4] sm:$0xf]  ;;  %v5697_v14 = vor.u32 %v7890_v5, %v5694_v6  ;;  %v8070_v50 = vld [vmem:[#allocation2 + $0x734] sm:$0xf]  ;;  %v8065_v5 = vld [vmem:[#allocation2 + $0x70c] sm:$0xf] }
  0xad   :  { %2031 = vmatpush.bf16.msrb.mxu3 %v5917_v25  ;;  %v226_v40 = vpop.f32.mrf.mxu2  ;;  %v7873_v25 = vld [vmem:[#allocation2 + $0x108] sm:$0xf0]  ;;  %v6394_v6 = vld [vmem:[#allocation2 + $0x71c] sm:$0xf0] }
  0xae   :  { %v227_v42 = vadd.f32 %v226_v40, %v99_v28  ;;  %1985 = vmatmul.bf16.vlgmr.msra.gmra.mxu0 %v8722_v36  ;;  %v6157_v28 = vor.u32 %v8005_v19, %v6154_v20  ;;  %v5621_v38 = vor.u32 %v7873_v25, %v5620_v24  ;;  %v7918_v40 = vld [vmem:[#allocation2 + $0x270] sm:$0xf0]  ;;  %v7885_v19 = vld [vmem:[#allocation2 + $0x16c] sm:$0xf]  ;;  %v5674_v20 = vld [vmem:[#allocation2 + $0x17c] sm:$0xf0] }
  0xaf   :  { %2057 = vmatpush.bf16.msrb.mxu2 %v6237_v27  ;;  %2046 = vmatpush.bf16.msrb.mxu0 %v6037_v32  ;;  %v267_v52 = vpop.f32.mrf.mxu1  ;;  %v5837_v27 = vor.u32 %v7925_v16, %v5834_v18  ;;  %v5814_v32 = vld [vmem:[#allocation2 + $0x294] sm:$0xf0]  ;;  %v7953_v16 = vld [vmem:[#allocation2 + $0x388] sm:$0xf0]  ;;  %v7858_v18 = vld [vmem:[#allocation2 + $0x90] sm:$0xf0] }
  0xb0   :  { %v284_v53 = vmax.f32 %v227_v42, 0.0  ;;  %v5737_v42 = vor.u32 %v7900_v26, %v5734_v30  ;;  %v5817_v47 = vor.u32 %v7920_v31, %v5814_v32  ;;  %v5801_v52 = vor.u32 %v7918_v40, %v5800_v29  ;;  %v5740_v24 = vld [vmem:[#allocation2 + $0x1e8] sm:$0xf]  ;;  %v7903_v25 = vld [vmem:[#allocation2 + $0x1f8] sm:$0xf0] }
  0xb1   :  { %2032 = vmatpush.bf16.msrb.mxu3 %v5897_v41  ;;  %v5920_v26 = vld [vmem:[#allocation2 + $0x350] sm:$0xf]  ;;  %v5540_v30 = vld [vmem:[#allocation2 + $0x58] sm:$0xf]  ;;  %v7853_v31 = vld [vmem:[#allocation2 + $0x68] sm:$0xf0] }
  0xb2   :  { %v8727_v58 = vpack.c.bf16 %v284_v53, %v284_v53  ;;  %v8080_v53 = vld [vmem:[#allocation2 + $0x784] sm:$0xf]  ;;  %v5541_v29 = vor.u32 %v7853_v31, %v5540_v30  ;;  %v5720_v40 = vld [vmem:[#allocation2 + $0x1c0] sm:$0xf]  ;;  %v6240_v30 = vld [vmem:[#allocation2 + $0x5d0] sm:$0xf] }
  0xb3   :  { %2058 = vmatpush.bf16.msrb.mxu2 %v6217_v44  ;;  %2047 = vmatpush.bf16.msrb.mxu0 %v6017_v48  ;;  %v5600_v44 = vld [vmem:[#allocation2 + $0xd0] sm:$0xf]  ;;  %v6137_v48 = vor.u32 %v8000_v33, %v6134_v34  ;;  %v6457_v7 = vor.u32 %v8080_v53, %v6454_v55  ;;  %v7880_v32 = vld [vmem:[#allocation2 + $0x144] sm:$0xf]  ;;  %v5654_v33 = vld [vmem:[#allocation2 + $0x154] sm:$0xf0]  ;;  %v5741_v34 = vor.u32 %v7903_v25, %v5740_v24 }
  0xb4   :  { %1946 = vmatmul.bf16.vlgmr.msra.gmra.mxu1 %v8727_v58  ;;  %1972 = vmatmul.bf16.vlgmr.msra.gmra.mxu3 %v8725_v54  ;;  %v5700_v55 = vld [vmem:[#allocation2 + $0x198] sm:$0xf]  ;;  %v7928_v25 = vld [vmem:[#allocation2 + $0x2c0] sm:$0xf0] }
  0xb5   :  { %2016 = vmatpush.bf16.msra.mxu1 %v5797_v57  ;;  %v228_v8 = vpop.f32.mrf.mxu2  ;;  %2033 = vmatpush.bf16.msrb.mxu3 %v5877_v59  ;;  %v5601_v59 = vor.u32 %v7868_v45, %v5600_v44  ;;  %v5657_v44 = vor.u32 %v7880_v32, %v5654_v33  ;;  %v7943_v45 = vld [vmem:[#allocation2 + $0x338] sm:$0xf0]  ;;  %v8028_v31 = vld [vmem:[#allocation2 + $0x5e0] sm:$0xf0] }
  0xb6   :  { %2011 = vmatmul.bf16.vlgmr.msra.gmra.mxu2 %v8713_v62  ;;  %v8055_v33 = vld [vmem:[#allocation2 + $0x6bc] sm:$0xf] }
  0xb7   :  { %2059 = vmatpush.bf16.msrb.mxu2 %v6197_v60  ;;  %2048 = vmatpush.bf16.msrb.mxu0 %v5997_v1  ;;  %v7913_v60 = vld [vmem:[#allocation2 + $0x248] sm:$0xf0]  ;;  %v5580_v1 = vld [vmem:[#allocation2 + $0xa8] sm:$0xf] }
  0xb8   :  { %v5781_v8 = vor.u32 %v7913_v60, %v5780_v56  ;;  %v5581_v10 = vor.u32 %v7863_v3, %v5580_v1  ;;  %v7893_v56 = vld [vmem:[#allocation2 + $0x1a8] sm:$0xf0]  ;;  %v5500_v60 = vld [vmem:[#allocation2 + $0x8] sm:$0xf]  ;;  %v8038_v1 = vld [vmem:[#allocation2 + $0x630] sm:$0xf0] }
  0xb9   :  { %2017 = vmatpush.bf16.msra.mxu1 %v5777_v9  ;;  %2034 = vmatpush.bf16.msrb.mxu3 %v5857_v12  ;;  %v5961_v9 = vor.u32 %v7958_v0, %v5960_v61  ;;  %v7908_v12 = vld [vmem:[#allocation2 + $0x220] sm:$0xf0]  ;;  %v7843_v61 = vld [vmem:[#allocation2 + $0x18] sm:$0xf0]  ;;  %v6280_v0 = vld [vmem:[#allocation2 + $0x620] sm:$0xf]  ;;  %v5701_v3 = vor.u32 %v7893_v56, %v5700_v55 }
  0xbb   :  { %2060 = vmatpush.bf16.msrb.mxu2 %v6177_v13  ;;  %2049 = vmatpush.bf16.msrb.mxu0 %v5977_v17  ;;  %v5940_v13 = vld [vmem:[#allocation2 + $0x378] sm:$0xf]  ;;  %v5560_v17 = vld [vmem:[#allocation2 + $0x80] sm:$0xf] }
  0xbd   :  { %2018 = vmatpush.bf16.msra.mxu1 %v5757_v23  ;;  %v278_v41 = vpop.f32.mrf.mxu2  ;;  %2035 = vmatpush.bf16.msrb.mxu3 %v5837_v27  ;;  %v5561_v23 = vor.u32 %v7858_v18, %v5560_v17  ;;  %v5677_v27 = vor.u32 %v7885_v19, %v5674_v20  ;;  %v8060_v18 = vld [vmem:[#allocation2 + $0x6e4] sm:$0xf]  ;;  %v6374_v19 = vld [vmem:[#allocation2 + $0x6f4] sm:$0xf0] }
  0xbe   :  { %v279_v46 = vadd.f32 %v278_v41, %v103_v22  ;;  %2050 = vmatmul.bf16.vlgmr.msrb.gmra.mxu0 %v8715_v2  ;;  %v5941_v22 = vor.u32 %v7953_v16, %v5940_v13  ;;  %v7898_v41 = vld [vmem:[#allocation2 + $0x1d0] sm:$0xf0]  ;;  %v7933_v13 = vld [vmem:[#allocation2 + $0x2e8] sm:$0xf0] }
  0xbf   :  { %2094 = vmatpush.bf16.msra.mxu0 %v5641_v21  ;;  %2061 = vmatpush.bf16.msrb.mxu2 %v6157_v28  ;;  %v5761_v21 = vor.u32 %v7908_v12, %v5760_v11  ;;  %v7948_v28 = vld [vmem:[#allocation2 + $0x360] sm:$0xf0]  ;;  %v5721_v49 = vor.u32 %v7898_v41, %v5720_v40  ;;  %v6281_v11 = vor.u32 %v8038_v1, %v6280_v0  ;;  %v5860_v12 = vld [vmem:[#allocation2 + $0x2d8] sm:$0xf]  ;;  %v8033_v16 = vld [vmem:[#allocation2 + $0x608] sm:$0xf0] }
  0xc0   :  { %v288_v57 = vmax.f32 %v279_v46, 0.0  ;;  %v5921_v39 = vor.u32 %v7948_v28, %v5920_v26  ;;  %v5520_v46 = vld [vmem:[#allocation2 + $0x30] sm:$0xf]  ;;  %v5861_v20 = vor.u32 %v7933_v13, %v5860_v12  ;;  %v6440_v26 = vld [vmem:[#allocation2 + $0x760] sm:$0xf]  ;;  %v6377_v28 = vor.u32 %v8060_v18, %v6374_v19 }
  0xc1   :  { %2019 = vmatpush.bf16.msra.mxu1 %v5737_v42  ;;  %2036 = vmatpush.bf16.msrb.mxu3 %v5817_v47  ;;  %v5900_v42 = vld [vmem:[#allocation2 + $0x328] sm:$0xf]  ;;  %v7848_v47 = vld [vmem:[#allocation2 + $0x40] sm:$0xf0]  ;;  %v6241_v40 = vor.u32 %v8028_v31, %v6240_v30  ;;  %v6420_v41 = vld [vmem:[#allocation2 + $0x738] sm:$0xf] }
  0xc2   :  { %v8734_v4 = vpack.c.bf16 %v288_v57, %v288_v57  ;;  %v5521_v53 = vor.u32 %v7848_v47, %v5520_v46  ;;  %v5880_v57 = vld [vmem:[#allocation2 + $0x300] sm:$0xf]  ;;  %v8088_v46 = vld [vmem:[#allocation2 + $0x7c0] sm:$0xf0]  ;;  %v6220_v47 = vld [vmem:[#allocation2 + $0x5a8] sm:$0xf] }
  0xc3   :  { %2095 = vmatpush.bf16.msra.mxu0 %v5621_v38  ;;  %2062 = vmatpush.bf16.msrb.mxu2 %v6137_v48  ;;  %v6434_v38 = vld [vmem:[#allocation2 + $0x76c] sm:$0xf0]  ;;  %v8018_v0 = vld [vmem:[#allocation2 + $0x590] sm:$0xf0]  ;;  %v7916_v1 = vld [vmem:[#allocation2 + $0x264] sm:$0xf] }
  0xc4   :  { %6490 = vmatmul.msk.bf16.vlgmr.msrb.gmra.mxu1 %vm1908_vm2, %v8734_v4  ;;  %2037 = vmatmul.bf16.vlgmr.msrb.gmra.mxu3 %v8727_v58  ;;  %v6437_v48 = vor.u32 %v8075_v37, %v6434_v38  ;;  %v8040_v18 = vld [vmem:[#allocation2 + $0x644] sm:$0xf]  ;;  %v6294_v19 = vld [vmem:[#allocation2 + $0x654] sm:$0xf0] }
  0xc5   :  { %2087 = vmatpush.bf16.msra.mxu3 %v6477_v51  ;;  %2020 = vmatpush.bf16.msra.mxu1 %v5717_v63  ;;  %v280_v15 = vpop.f32.mrf.mxu2  ;;  %v6414_v51 = vld [vmem:[#allocation2 + $0x744] sm:$0xf0]  ;;  %v8008_v30 = vld [vmem:[#allocation2 + $0x540] sm:$0xf0] }
  0xc6   :  { %2063 = vmatmul.bf16.vlgmr.msrb.gmra.mxu2 %v8725_v54  ;;  %v6417_v63 = vor.u32 %v8070_v50, %v6414_v51  ;;  %v6260_v15 = vld [vmem:[#allocation2 + $0x5f8] sm:$0xf]  ;;  %v6334_v50 = vld [vmem:[#allocation2 + $0x6a4] sm:$0xf0] }
  0xc7   :  { %2107 = vmatpush.bf16.msra.mxu2 %v5801_v52  ;;  %2096 = vmatpush.bf16.msra.mxu0 %v5601_v59  ;;  %v5901_v52 = vor.u32 %v7943_v45, %v5900_v42  ;;  %v7938_v59 = vld [vmem:[#allocation2 + $0x310] sm:$0xf0]  ;;  %v6261_v24 = vor.u32 %v8033_v16, %v6260_v15  ;;  %v8073_v42 = vld [vmem:[#allocation2 + $0x748] sm:$0xf0]  ;;  %v7911_v16 = vld [vmem:[#allocation2 + $0x23c] sm:$0xf] }
  0xc8   :  { %v8013_v15 = vld [vmem:[#allocation2 + $0x568] sm:$0xf0] }
  0xc9   :  { %2088 = vmatpush.bf16.msra.mxu3 %v6457_v7  ;;  %2021 = vmatpush.bf16.msra.mxu1 %v5697_v14  ;;  %v5881_v7 = vor.u32 %v7938_v59, %v5880_v57  ;;  %v6397_v14 = vor.u32 %v8065_v5, %v6394_v6  ;;  %v8068_v57 = vld [vmem:[#allocation2 + $0x720] sm:$0xf0]  ;;  %v6460_v59 = vld [vmem:[#allocation2 + $0x788] sm:$0xf]  ;;  %v8045_v5 = vld [vmem:[#allocation2 + $0x66c] sm:$0xf] }
  0xca   :  { %v6314_v6 = vld [vmem:[#allocation2 + $0x67c] sm:$0xf0] }
  0xcb   :  { %2108 = vmatpush.bf16.msra.mxu2 %v5781_v8  ;;  %2097 = vmatpush.bf16.msra.mxu0 %v5581_v10  ;;  %v5501_v8 = vor.u32 %v7843_v61, %v5500_v60  ;;  %v7888_v10 = vld [vmem:[#allocation2 + $0x180] sm:$0xf0]  ;;  %v8083_v60 = vld [vmem:[#allocation2 + $0x798] sm:$0xf0]  ;;  %v6317_v13 = vor.u32 %v8045_v5, %v6314_v6  ;;  %v6060_v5 = vld [vmem:[#allocation2 + $0x468] sm:$0xf] }
  0xcc   :  { %v7983_v6 = vld [vmem:[#allocation2 + $0x478] sm:$0xf0] }
  0xcd   :  { %2120 = vmatpush.bf16.msrb.mxu3 %v5961_v9  ;;  %2022 = vmatpush.bf16.msra.mxu1 %v5677_v27  ;;  %v5680_v9 = vld [vmem:[#allocation2 + $0x170] sm:$0xf]  ;;  %v8078_v27 = vld [vmem:[#allocation2 + $0x770] sm:$0xf0] }
  0xce   :  { %v5681_v17 = vor.u32 %v7888_v10, %v5680_v9  ;;  %v6441_v38 = vor.u32 %v8078_v27, %v6440_v26  ;;  %v6380_v10 = vld [vmem:[#allocation2 + $0x6e8] sm:$0xf]  ;;  %v6297_v27 = vor.u32 %v8040_v18, %v6294_v19  ;;  %v6040_v19 = vld [vmem:[#allocation2 + $0x440] sm:$0xf] }
  0xcf   :  { %2109 = vmatpush.bf16.msra.mxu2 %v5761_v21  ;;  %2098 = vmatpush.bf16.msra.mxu0 %v5561_v23  ;;  %v5660_v21 = vld [vmem:[#allocation2 + $0x148] sm:$0xf]  ;;  %v5840_v23 = vld [vmem:[#allocation2 + $0x2b0] sm:$0xf] }
  0xd0   :  { %v5841_v37 = vor.u32 %v7928_v25, %v5840_v23  ;;  %v8058_v25 = vld [vmem:[#allocation2 + $0x6d0] sm:$0xf0] }
  0xd1   :  { %2121 = vmatpush.bf16.msrb.mxu3 %v5941_v22  ;;  %2023 = vmatpush.bf16.msra.mxu1 %v5657_v44  ;;  %v7883_v22 = vld [vmem:[#allocation2 + $0x158] sm:$0xf0]  ;;  %v6480_v44 = vld [vmem:[#allocation2 + $0x7b0] sm:$0xf] }
  0xd2   :  { %v5661_v32 = vor.u32 %v7883_v22, %v5660_v21  ;;  %v6481_v55 = vor.u32 %v8088_v46, %v6480_v44  ;;  %v6120_v21 = vld [vmem:[#allocation2 + $0x4e0] sm:$0xf]  ;;  %v7998_v22 = vld [vmem:[#allocation2 + $0x4f0] sm:$0xf0]  ;;  %v8003_v44 = vld [vmem:[#allocation2 + $0x518] sm:$0xf0] }
  0xd3   :  { %2110 = vmatpush.bf16.msra.mxu2 %v5741_v34  ;;  %2099 = vmatpush.bf16.msra.mxu0 %v5541_v29  ;;  %v6354_v34 = vld [vmem:[#allocation2 + $0x6cc] sm:$0xf0]  ;;  %v7923_v29 = vld [vmem:[#allocation2 + $0x298] sm:$0xf0]  ;;  %v6121_v31 = vor.u32 %v7998_v22, %v6120_v21 }
  0xd4   :  { %2024 = vmatmul.bf16.vlgmr.msra.gmra.mxu1 %v8710_v43  ;;  %6491 = vmatmul.msk.bf16.vlgmr.msra.gmra.mxu3 %vm1908_vm2, %v8734_v4  ;;  %v6357_v45 = vor.u32 %v8055_v33, %v6354_v34  ;;  %v5762_v33 = vld [vmem:[#allocation2 + $0x224] sm:$0xf0] }
  0xd5   :  { %2122 = vmatpush.bf16.msrb.mxu3 %v5921_v39  ;;  %2068 = vmatpush.bf16.msrb.mxu1 %v6437_v48  ;;  %v5820_v39 = vld [vmem:[#allocation2 + $0x288] sm:$0xf]  ;;  %v8023_v48 = vld [vmem:[#allocation2 + $0x5b8] sm:$0xf0] }
  0xd6   :  { %v5821_v51 = vor.u32 %v7923_v29, %v5820_v39  ;;  %v6221_v56 = vor.u32 %v8023_v48, %v6220_v47  ;;  %v6340_v29 = vld [vmem:[#allocation2 + $0x698] sm:$0xf]  ;;  %v5742_v47 = vld [vmem:[#allocation2 + $0x1fc] sm:$0xf0]  ;;  %v7956_v48 = vld [vmem:[#allocation2 + $0x3a4] sm:$0xf] }
  0xd7   :  { %2111 = vmatpush.bf16.msra.mxu2 %v5721_v49  ;;  %2100 = vmatpush.bf16.msra.mxu0 %v5521_v53  ;;  %v8050_v49 = vld [vmem:[#allocation2 + $0x694] sm:$0xf]  ;;  %v6400_v53 = vld [vmem:[#allocation2 + $0x710] sm:$0xf] }
  0xd8   :  { %v6337_v61 = vor.u32 %v8050_v49, %v6334_v50  ;;  %v5962_v49 = vld [vmem:[#allocation2 + $0x3b4] sm:$0xf0] }
  0xd9   :  { %2123 = vmatpush.bf16.msrb.mxu3 %v5901_v52  ;;  %2069 = vmatpush.bf16.msrb.mxu1 %v6417_v63  ;;  %v6421_v52 = vor.u32 %v8073_v42, %v6420_v41  ;;  %v6200_v63 = vld [vmem:[#allocation2 + $0x580] sm:$0xf]  ;;  %v6140_v42 = vld [vmem:[#allocation2 + $0x508] sm:$0xf] }
  0xda   :  { %v6201_v9 = vor.u32 %v8018_v0, %v6200_v63  ;;  %v5722_v63 = vld [vmem:[#allocation2 + $0x1d4] sm:$0xf0]  ;;  %v7951_v0 = vld [vmem:[#allocation2 + $0x37c] sm:$0xf] }
  0xdb   :  { %2112 = vmatpush.bf16.msra.mxu2 %v5701_v3  ;;  %2101 = vmatpush.bf16.msra.mxu0 %v5501_v8  ;;  %v5802_v3 = vld [vmem:[#allocation2 + $0x274] sm:$0xf0]  ;;  %v6461_v8 = vor.u32 %v8083_v60, %v6460_v59  ;;  %v5965_v59 = vor.u32 %v7956_v48, %v5962_v49  ;;  %v7896_v60 = vld [vmem:[#allocation2 + $0x1c4] sm:$0xf]  ;;  %v6000_v48 = vld [vmem:[#allocation2 + $0x3f0] sm:$0xf] }
  0xdc   :  { %v5805_v12 = vor.u32 %v7916_v1, %v5802_v3  ;;  %v5942_v1 = vld [vmem:[#allocation2 + $0x38c] sm:$0xf0]  ;;  %v7968_v49 = vld [vmem:[#allocation2 + $0x400] sm:$0xf0] }
  0xdd   :  { %2124 = vmatpush.bf16.msrb.mxu3 %v5881_v7  ;;  %2070 = vmatpush.bf16.msrb.mxu1 %v6397_v14  ;;  %v6401_v7 = vor.u32 %v8068_v57, %v6400_v53  ;;  %v6180_v14 = vld [vmem:[#allocation2 + $0x558] sm:$0xf]  ;;  %v6141_v53 = vor.u32 %v8003_v44, %v6140_v42  ;;  %v7936_v44 = vld [vmem:[#allocation2 + $0x304] sm:$0xf] }
  0xde   :  { %2102 = vmatmul.bf16.vlgmr.msra.gmra.mxu0 %v8713_v62  ;;  %v6181_v23 = vor.u32 %v8013_v15, %v6180_v14  ;;  %v6061_v14 = vor.u32 %v7983_v6, %v6060_v5  ;;  %v5702_v15 = vld [vmem:[#allocation2 + $0x1ac] sm:$0xf0]  ;;  %v7876_v5 = vld [vmem:[#allocation2 + $0x124] sm:$0xf]  ;;  %v5642_v6 = vld [vmem:[#allocation2 + $0x134] sm:$0xf0] }
  0xdf   :  { %2146 = vmatpush.bf16.msrb.mxu0 %v6281_v11  ;;  %2113 = vmatpush.bf16.msra.mxu2 %v5681_v17  ;;  %v8063_v11 = vld [vmem:[#allocation2 + $0x6f8] sm:$0xf0]  ;;  %v5782_v17 = vld [vmem:[#allocation2 + $0x24c] sm:$0xf0] }
  0xe0   :  { %v5785_v26 = vor.u32 %v7911_v16, %v5782_v17  ;;  %v7946_v16 = vld [vmem:[#allocation2 + $0x354] sm:$0xf]  ;;  %v5922_v17 = vld [vmem:[#allocation2 + $0x364] sm:$0xf0] }
  0xe1   :  { %2125 = vmatpush.bf16.msrb.mxu3 %v5861_v20  ;;  %2071 = vmatpush.bf16.msrb.mxu1 %v6377_v28  ;;  %v6381_v20 = vor.u32 %v8063_v11, %v6380_v10  ;;  %v6160_v28 = vld [vmem:[#allocation2 + $0x530] sm:$0xf]  ;;  %v5945_v10 = vor.u32 %v7951_v0, %v5942_v1  ;;  %v7996_v11 = vld [vmem:[#allocation2 + $0x4e4] sm:$0xf]  ;;  %v5980_v0 = vld [vmem:[#allocation2 + $0x3c8] sm:$0xf] }
  0xe2   :  { %v6161_v39 = vor.u32 %v8008_v30, %v6160_v28  ;;  %v5682_v28 = vld [vmem:[#allocation2 + $0x184] sm:$0xf0]  ;;  %v7941_v30 = vld [vmem:[#allocation2 + $0x32c] sm:$0xf]  ;;  %v7963_v1 = vld [vmem:[#allocation2 + $0x3d8] sm:$0xf0] }
  0xe3   :  { %2147 = vmatpush.bf16.msrb.mxu0 %v6261_v24  ;;  %2114 = vmatpush.bf16.msra.mxu2 %v5661_v32  ;;  %v6360_v24 = vld [vmem:[#allocation2 + $0x6c0] sm:$0xf]  ;;  %v7906_v32 = vld [vmem:[#allocation2 + $0x214] sm:$0xf] }
  0xe4   :  { %v6361_v34 = vor.u32 %v8058_v25, %v6360_v24  ;;  %v5765_v41 = vor.u32 %v7906_v32, %v5762_v33  ;;  %v7991_v24 = vld [vmem:[#allocation2 + $0x4bc] sm:$0xf]  ;;  %v6102_v25 = vld [vmem:[#allocation2 + $0x4cc] sm:$0xf0]  ;;  %v6020_v32 = vld [vmem:[#allocation2 + $0x418] sm:$0xf] }
  0xe5   :  { %2126 = vmatpush.bf16.msrb.mxu3 %v5841_v37  ;;  %2072 = vmatpush.bf16.msrb.mxu1 %v6357_v45  ;;  %v6100_v37 = vld [vmem:[#allocation2 + $0x4b8] sm:$0xf]  ;;  %v7901_v45 = vld [vmem:[#allocation2 + $0x1ec] sm:$0xf] }
  0xe6   :  { %2115 = vmatmul.bf16.vlgmr.msra.gmra.mxu2 %v8710_v43  ;;  %v5745_v57 = vor.u32 %v7901_v45, %v5742_v47  ;;  %v7973_v33 = vld [vmem:[#allocation2 + $0x428] sm:$0xf0]  ;;  %v5882_v45 = vld [vmem:[#allocation2 + $0x314] sm:$0xf0] }
  0xe7   :  { %2159 = vmatpush.bf16.msrb.mxu2 %v6441_v38  ;;  %2148 = vmatpush.bf16.msrb.mxu0 %v6241_v40  ;;  %v7993_v38 = vld [vmem:[#allocation2 + $0x4c8] sm:$0xf0]  ;;  %v6021_v42 = vor.u32 %v7973_v33, %v6020_v32  ;;  %v6442_v47 = vld [vmem:[#allocation2 + $0x774] sm:$0xf0]  ;;  %v7866_v33 = vld [vmem:[#allocation2 + $0xd4] sm:$0xf] }
  0xe8   :  { %v8053_v40 = vld [vmem:[#allocation2 + $0x6a8] sm:$0xf0]  ;;  %v6101_v46 = vor.u32 %v7993_v38, %v6100_v37  ;;  %v7986_v37 = vld [vmem:[#allocation2 + $0x494] sm:$0xf] }
  0xe9   :  { %2127 = vmatpush.bf16.msrb.mxu3 %v5821_v51  ;;  %2073 = vmatpush.bf16.msrb.mxu1 %v6337_v61  ;;  %v6341_v50 = vor.u32 %v8053_v40, %v6340_v29  ;;  %v6080_v51 = vld [vmem:[#allocation2 + $0x490] sm:$0xf]  ;;  %v6082_v29 = vld [vmem:[#allocation2 + $0x4a4] sm:$0xf0]  ;;  %v7881_v40 = vld [vmem:[#allocation2 + $0x14c] sm:$0xf] }
  0xeb   :  { %2160 = vmatpush.bf16.msrb.mxu2 %v6421_v52  ;;  %2149 = vmatpush.bf16.msrb.mxu0 %v6221_v56  ;;  %v7988_v52 = vld [vmem:[#allocation2 + $0x4a0] sm:$0xf0] }
  0xec   :  { %2128 = vmatmul.bf16.vlgmr.msrb.gmra.mxu3 %v8727_v58  ;;  %v8048_v56 = vld [vmem:[#allocation2 + $0x680] sm:$0xf0]  ;;  %v6081_v61 = vor.u32 %v7988_v52, %v6080_v51  ;;  %v5885_v52 = vor.u32 %v7936_v44, %v5882_v45  ;;  %v8081_v45 = vld [vmem:[#allocation2 + $0x78c] sm:$0xf] }
  0xed   :  { %2178 = vmatpush.bf16.msra.mxu3 %v6481_v55  ;;  %2074 = vmatpush.bf16.msrb.mxu1 %v6317_v13  ;;  %v6320_v55 = vld [vmem:[#allocation2 + $0x670] sm:$0xf]  ;;  %v7891_v13 = vld [vmem:[#allocation2 + $0x19c] sm:$0xf] }
  0xee   :  { %v6321_v3 = vor.u32 %v8048_v56, %v6320_v55  ;;  %v5705_v22 = vor.u32 %v7891_v13, %v5702_v15  ;;  %v6062_v55 = vld [vmem:[#allocation2 + $0x47c] sm:$0xf0]  ;;  %v5842_v13 = vld [vmem:[#allocation2 + $0x2c4] sm:$0xf0]  ;;  %v8066_v15 = vld [vmem:[#allocation2 + $0x714] sm:$0xf] }
  0xef   :  { %2161 = vmatpush.bf16.msrb.mxu2 %v6401_v7  ;;  %2150 = vmatpush.bf16.msrb.mxu0 %v6201_v9  ;;  %v6300_v7 = vld [vmem:[#allocation2 + $0x648] sm:$0xf]  ;;  %v5725_v9 = vor.u32 %v7896_v60, %v5722_v63  ;;  %v5862_v60 = vld [vmem:[#allocation2 + $0x2ec] sm:$0xf0] }
  0xf0   :  { %v6422_v63 = vld [vmem:[#allocation2 + $0x74c] sm:$0xf0] }
  0xf1   :  { %2179 = vmatpush.bf16.msra.mxu3 %v6461_v8  ;;  %2075 = vmatpush.bf16.msrb.mxu1 %v6297_v27  ;;  %v8043_v8 = vld [vmem:[#allocation2 + $0x658] sm:$0xf0] }
  0xf2   :  { %v6301_v18 = vor.u32 %v8043_v8, %v6300_v7  ;;  %v7976_v8 = vld [vmem:[#allocation2 + $0x444] sm:$0xf] }
  0xf3   :  { %2162 = vmatpush.bf16.msrb.mxu2 %v6381_v20  ;;  %2151 = vmatpush.bf16.msrb.mxu0 %v6181_v23  ;;  %v7978_v20 = vld [vmem:[#allocation2 + $0x450] sm:$0xf0]  ;;  %v5925_v23 = vor.u32 %v7946_v16, %v5922_v17  ;;  %v6402_v16 = vld [vmem:[#allocation2 + $0x724] sm:$0xf0] }
  0xf4   :  { %2076 = vmatmul.bf16.vlgmr.msrb.gmra.mxu1 %v8722_v36  ;;  %v6041_v27 = vor.u32 %v7978_v20, %v6040_v19  ;;  %v5622_v19 = vld [vmem:[#allocation2 + $0x10c] sm:$0xf0] }
  0xf5   :  { %2198 = vmatpush.bf16.msrb.mxu3 %v5805_v12  ;;  %2133 = vmatpush.bf16.msra.mxu1 %v6121_v31  ;;  %v6122_v12 = vld [vmem:[#allocation2 + $0x4f4] sm:$0xf0]  ;;  %v5902_v31 = vld [vmem:[#allocation2 + $0x33c] sm:$0xf0] }
  0xf6   :  { %v6125_v21 = vor.u32 %v7996_v11, %v6122_v12  ;;  %v5981_v11 = vor.u32 %v7963_v1, %v5980_v0  ;;  %v7926_v12 = vld [vmem:[#allocation2 + $0x2b4] sm:$0xf]  ;;  %v6342_v0 = vld [vmem:[#allocation2 + $0x6ac] sm:$0xf0] }
  0xf7   :  { %2163 = vmatpush.bf16.msrb.mxu2 %v6361_v34  ;;  %2152 = vmatpush.bf16.msrb.mxu0 %v6161_v39  ;;  %v6105_v34 = vor.u32 %v7991_v24, %v6102_v25  ;;  %v5905_v39 = vor.u32 %v7941_v30, %v5902_v31  ;;  %v5845_v20 = vor.u32 %v7926_v12, %v5842_v13  ;;  %v7921_v24 = vld [vmem:[#allocation2 + $0x28c] sm:$0xf]  ;;  %v5822_v25 = vld [vmem:[#allocation2 + $0x29c] sm:$0xf0]  ;;  %v8086_v30 = vld [vmem:[#allocation2 + $0x7b4] sm:$0xf] }
  0xf8   :  { %v6482_v31 = vld [vmem:[#allocation2 + $0x7c4] sm:$0xf0]  ;;  %v8046_v13 = vld [vmem:[#allocation2 + $0x674] sm:$0xf] }
  0xf9   :  { %2199 = vmatpush.bf16.msrb.mxu3 %v5785_v26  ;;  %2134 = vmatpush.bf16.msra.mxu1 %v6101_v46  ;;  %v7886_v26 = vld [vmem:[#allocation2 + $0x174] sm:$0xf]  ;;  %v8076_v46 = vld [vmem:[#allocation2 + $0x764] sm:$0xf] }
  0xfa   :  { %v5685_v38 = vor.u32 %v7886_v26, %v5682_v28  ;;  %v6445_v56 = vor.u32 %v8076_v46, %v6442_v47  ;;  %v8061_v26 = vld [vmem:[#allocation2 + $0x6ec] sm:$0xf]  ;;  %v6382_v28 = vld [vmem:[#allocation2 + $0x6fc] sm:$0xf0] }
  0xfb   :  { %2164 = vmatpush.bf16.msrb.mxu2 %v6341_v50  ;;  %2153 = vmatpush.bf16.msrb.mxu0 %v6141_v53  ;;  %v6085_v50 = vor.u32 %v7986_v37, %v6082_v29  ;;  %v7981_v53 = vld [vmem:[#allocation2 + $0x46c] sm:$0xf]  ;;  %v5825_v37 = vor.u32 %v7921_v24, %v5822_v25  ;;  %v6385_v29 = vor.u32 %v8061_v26, %v6382_v28  ;;  %v6462_v46 = vld [vmem:[#allocation2 + $0x79c] sm:$0xf0]  ;;  %v6128_v28 = vld [vmem:[#allocation2 + $0x4e8] sm:$0xf] }
  0xfc   :  { %6492 = vmatmul.msk.bf16.vlgmr.msra.gmra.mxu3 %vm1908_vm2, %v8734_v4  ;;  %v7861_v47 = vld [vmem:[#allocation2 + $0xac] sm:$0xf] }
  0xfd   :  { %2200 = vmatpush.bf16.msrb.mxu3 %v5765_v41  ;;  %2135 = vmatpush.bf16.msra.mxu1 %v6081_v61  ;;  %v5662_v41 = vld [vmem:[#allocation2 + $0x15c] sm:$0xf0]  ;;  %v8071_v61 = vld [vmem:[#allocation2 + $0x73c] sm:$0xf]  ;;  %v7869_v24 = vld [vmem:[#allocation2 + $0xe8] sm:$0xf0] }
  0xfe   :  { %2154 = vmatmul.bf16.vlgmr.msrb.gmra.mxu0 %v8725_v54  ;;  %v5665_v51 = vor.u32 %v7881_v40, %v5662_v41  ;;  %v6485_v40 = vor.u32 %v8086_v30, %v6482_v31  ;;  %v8056_v41 = vld [vmem:[#allocation2 + $0x6c4] sm:$0xf]  ;;  %v8041_v26 = vld [vmem:[#allocation2 + $0x64c] sm:$0xf]  ;;  %v7999_v31 = vld [vmem:[#allocation2 + $0x4f8] sm:$0xf0] }
  0xff   :  { %2211 = vmatpush.bf16.msra.mxu0 %v5965_v59  ;;  %2165 = vmatpush.bf16.msrb.mxu2 %v6321_v3  ;;  %v7931_v59 = vld [vmem:[#allocation2 + $0x2dc] sm:$0xf]  ;;  %v6065_v3 = vor.u32 %v7981_v53, %v6062_v55  ;;  %v5982_v53 = vld [vmem:[#allocation2 + $0x3dc] sm:$0xf0] }
 0x100   :  { %v5865_v7 = vor.u32 %v7931_v59, %v5862_v60  ;;  %v7879_v59 = vld [vmem:[#allocation2 + $0x138] sm:$0xf0] }
 0x101   :  { %2201 = vmatpush.bf16.msrb.mxu3 %v5745_v57  ;;  %2136 = vmatpush.bf16.msra.mxu1 %v6061_v14  ;;  %v6001_v57 = vor.u32 %v7968_v49, %v6000_v48  ;;  %v5645_v14 = vor.u32 %v7876_v5, %v5642_v6  ;;  %v5582_v49 = vld [vmem:[#allocation2 + $0xbc] sm:$0xf0]  ;;  %v5562_v5 = vld [vmem:[#allocation2 + $0x94] sm:$0xf0] }
 0x102   :  { %v5585_v60 = vor.u32 %v7861_v47, %v5582_v49  ;;  %v7841_v47 = vld [vmem:[#allocation2 + $0xc] sm:$0xf]  ;;  %v5728_v49 = vld [vmem:[#allocation2 + $0x1c8] sm:$0xf] }
 0x103   :  { %2212 = vmatpush.bf16.msra.mxu0 %v5945_v10  ;;  %2166 = vmatpush.bf16.msrb.mxu2 %v6301_v18  ;;  %v6425_v10 = vor.u32 %v8071_v61, %v6422_v63  ;;  %v7871_v18 = vld [vmem:[#allocation2 + $0xfc] sm:$0xf] }
 0x104   :  { %v8051_v63 = vld [vmem:[#allocation2 + $0x69c] sm:$0xf] }
 0x105   :  { %2202 = vmatpush.bf16.msrb.mxu3 %v5725_v9  ;;  %2137 = vmatpush.bf16.msra.mxu1 %v6041_v27  ;;  %v6042_v9 = vld [vmem:[#allocation2 + $0x454] sm:$0xf0]  ;;  %v5625_v27 = vor.u32 %v7871_v18, %v5622_v19 }
 0x106   :  { %2167 = vmatmul.bf16.vlgmr.msrb.gmra.mxu2 %v8722_v36  ;;  %v6045_v17 = vor.u32 %v7976_v8, %v6042_v9  ;;  %v7914_v8 = vld [vmem:[#allocation2 + $0x250] sm:$0xf0]  ;;  %v6345_v9 = vor.u32 %v8051_v63, %v6342_v0  ;;  %v5768_v19 = vld [vmem:[#allocation2 + $0x218] sm:$0xf] }
 0x107   :  { %2224 = vmatpush.bf16.msra.mxu2 %v6125_v21  ;;  %2213 = vmatpush.bf16.msra.mxu0 %v5925_v23  ;;  %v7971_v21 = vld [vmem:[#allocation2 + $0x41c] sm:$0xf]  ;;  %v6405_v23 = vor.u32 %v8066_v15, %v6402_v16  ;;  %v6088_v0 = vld [vmem:[#allocation2 + $0x498] sm:$0xf] }
 0x108   :  { %v7851_v16 = vld [vmem:[#allocation2 + $0x5c] sm:$0xf] }
 0x109   :  { %2203 = vmatpush.bf16.msrb.mxu3 %v5705_v22  ;;  %2138 = vmatpush.bf16.msra.mxu1 %v6021_v42  ;;  %v6022_v22 = vld [vmem:[#allocation2 + $0x42c] sm:$0xf0]  ;;  %v6362_v42 = vld [vmem:[#allocation2 + $0x6d4] sm:$0xf0] }
 0x10a   :  { %v6025_v32 = vor.u32 %v7971_v21, %v6022_v22  ;;  %v6365_v55 = vor.u32 %v8056_v41, %v6362_v42  ;;  %v7864_v42 = vld [vmem:[#allocation2 + $0xc0] sm:$0xf0] }
 0x10b   :  { %2225 = vmatpush.bf16.msra.mxu2 %v6105_v34  ;;  %2214 = vmatpush.bf16.msra.mxu0 %v5905_v39  ;;  %v5602_v34 = vld [vmem:[#allocation2 + $0xe4] sm:$0xf0] }
 0x10c   :  { %v6002_v39 = vld [vmem:[#allocation2 + $0x404] sm:$0xf0]  ;;  %v5605_v44 = vor.u32 %v7866_v33, %v5602_v34 }
 0x10d   :  { %2204 = vmatpush.bf16.msrb.mxu3 %v5685_v38  ;;  %2139 = vmatpush.bf16.msra.mxu1 %v6001_v57  ;;  %v7966_v38 = vld [vmem:[#allocation2 + $0x3f4] sm:$0xf]  ;;  %v5648_v57 = vld [vmem:[#allocation2 + $0x128] sm:$0xf] }
 0x10e   :  { %v6005_v48 = vor.u32 %v7966_v38, %v6002_v39  ;;  %v5649_v6 = vor.u32 %v7879_v59, %v5648_v57  ;;  %v5522_v33 = vld [vmem:[#allocation2 + $0x44] sm:$0xf0]  ;;  %v7904_v38 = vld [vmem:[#allocation2 + $0x200] sm:$0xf0] }
 0x10f   :  { %2226 = vmatpush.bf16.msra.mxu2 %v6085_v50  ;;  %2215 = vmatpush.bf16.msra.mxu0 %v5885_v52  ;;  %v5808_v50 = vld [vmem:[#allocation2 + $0x268] sm:$0xf]  ;;  %v7961_v52 = vld [vmem:[#allocation2 + $0x3cc] sm:$0xf] }
 0x110   :  { %v5985_v1 = vor.u32 %v7961_v52, %v5982_v53  ;;  %v6282_v52 = vld [vmem:[#allocation2 + $0x634] sm:$0xf0]  ;;  %v5568_v59 = vld [vmem:[#allocation2 + $0x88] sm:$0xf] }
 0x111   :  { %2205 = vmatpush.bf16.msrb.mxu3 %v5665_v51  ;;  %2140 = vmatpush.bf16.msra.mxu1 %v5981_v11  ;;  %v7919_v51 = vld [vmem:[#allocation2 + $0x278] sm:$0xf0]  ;;  %v7874_v11 = vld [vmem:[#allocation2 + $0x110] sm:$0xf0] }
 0x112   :  { %v5809_v61 = vor.u32 %v7919_v51, %v5808_v50  ;;  %v7899_v50 = vld [vmem:[#allocation2 + $0x1d8] sm:$0xf0]  ;;  %v8036_v51 = vld [vmem:[#allocation2 + $0x624] sm:$0xf] }
 0x113   :  { %2227 = vmatpush.bf16.msra.mxu2 %v6065_v3  ;;  %2216 = vmatpush.bf16.msra.mxu0 %v5865_v7  ;;  %v7856_v3 = vld [vmem:[#allocation2 + $0x84] sm:$0xf]  ;;  %v5788_v7 = vld [vmem:[#allocation2 + $0x240] sm:$0xf]  ;;  %v6285_v63 = vor.u32 %v8036_v51, %v6282_v52  ;;  %v8039_v51 = vld [vmem:[#allocation2 + $0x638] sm:$0xf0] }
 0x114   :  { %2206 = vmatmul.bf16.vlgmr.msrb.gmra.mxu3 %v8710_v43  ;;  %2141 = vmatmul.bf16.vlgmr.msra.gmra.mxu1 %v8715_v2  ;;  %v5565_v12 = vor.u32 %v7856_v3, %v5562_v5  ;;  %v5789_v15 = vor.u32 %v7914_v8, %v5788_v7  ;;  %v5708_v3 = vld [vmem:[#allocation2 + $0x1a0] sm:$0xf]  ;;  %v7894_v5 = vld [vmem:[#allocation2 + $0x1b0] sm:$0xf0]  ;;  %v6262_v7 = vld [vmem:[#allocation2 + $0x60c] sm:$0xf0] }
 0x115   :  { %2250 = vmatpush.bf16.msra.mxu3 %v6445_v56  ;;  %2185 = vmatpush.bf16.msrb.mxu1 %v5645_v14  ;;  %v6465_v56 = vor.u32 %v8081_v45, %v6462_v46  ;;  %v6322_v14 = vld [vmem:[#allocation2 + $0x684] sm:$0xf0]  ;;  %v7994_v45 = vld [vmem:[#allocation2 + $0x4d0] sm:$0xf0]  ;;  %v6028_v52 = vld [vmem:[#allocation2 + $0x420] sm:$0xf] }
 0x116   :  { %v6325_v22 = vor.u32 %v8046_v13, %v6322_v14  ;;  %v7854_v13 = vld [vmem:[#allocation2 + $0x70] sm:$0xf0]  ;;  %v5709_v14 = vor.u32 %v7894_v5, %v5708_v3  ;;  %v6268_v5 = vld [vmem:[#allocation2 + $0x600] sm:$0xf] }
 0x117   :  { %2228 = vmatpush.bf16.msra.mxu2 %v6045_v17  ;;  %2217 = vmatpush.bf16.msra.mxu0 %v5845_v20  ;;  %v5542_v17 = vld [vmem:[#allocation2 + $0x6c] sm:$0xf0]  ;;  %v7909_v20 = vld [vmem:[#allocation2 + $0x228] sm:$0xf0] }
 0x118   :  { %v5545_v25 = vor.u32 %v7851_v16, %v5542_v17  ;;  %v5769_v30 = vor.u32 %v7909_v20, %v5768_v19  ;;  %v6068_v16 = vld [vmem:[#allocation2 + $0x470] sm:$0xf]  ;;  %v7984_v17 = vld [vmem:[#allocation2 + $0x480] sm:$0xf0]  ;;  %v7889_v19 = vld [vmem:[#allocation2 + $0x188] sm:$0xf0] }
 0x119   :  { %2251 = vmatpush.bf16.msra.mxu3 %v6425_v10  ;;  %2186 = vmatpush.bf16.msrb.mxu1 %v5625_v27  ;;  %v5628_v10 = vld [vmem:[#allocation2 + $0x100] sm:$0xf]  ;;  %v8026_v20 = vld [vmem:[#allocation2 + $0x5d4] sm:$0xf] }
 0x11a   :  { %v5629_v18 = vor.u32 %v7874_v11, %v5628_v10  ;;  %v6302_v27 = vld [vmem:[#allocation2 + $0x65c] sm:$0xf0] }
 0x11b   :  { %2229 = vmatpush.bf16.msra.mxu2 %v6025_v32  ;;  %2218 = vmatpush.bf16.msra.mxu0 %v5825_v37  ;;  %v8754_v21 = vpop.f32.mrf.mxu0  ;;  %v7846_v32 = vld [vmem:[#allocation2 + $0x34] sm:$0xf]  ;;  %v5748_v37 = vld [vmem:[#allocation2 + $0x1f0] sm:$0xf]  ;;  %v6305_v39 = vor.u32 %v8041_v26, %v6302_v27  ;;  %v5528_v26 = vld [vmem:[#allocation2 + $0x38] sm:$0xf] }
 0x11c   :  { %v5525_v41 = vor.u32 %v7846_v32, %v5522_v33  ;;  %v5749_v46 = vor.u32 %v7904_v38, %v5748_v37  ;;  %v7849_v27 = vld [vmem:[#allocation2 + $0x48] sm:$0xf0]  ;;  %v7979_v32 = vld [vmem:[#allocation2 + $0x458] sm:$0xf0]  ;;  %v5668_v33 = vld [vmem:[#allocation2 + $0x150] sm:$0xf] }
 0x11d   :  { %2252 = vmatpush.bf16.msra.mxu3 %v6405_v23  ;;  %2187 = vmatpush.bf16.msrb.mxu1 %v5605_v44  ;;  %v5608_v23 = vld [vmem:[#allocation2 + $0xd8] sm:$0xf]  ;;  %v6108_v44 = vld [vmem:[#allocation2 + $0x4c0] sm:$0xf]  ;;  %v8021_v37 = vld [vmem:[#allocation2 + $0x5ac] sm:$0xf] }
 0x11e   :  { %2219 = vmatmul.bf16.vlgmr.msra.gmra.mxu0 %v8727_v58  ;;  %v5609_v34 = vor.u32 %v7869_v24, %v5608_v23  ;;  %v6222_v38 = vld [vmem:[#allocation2 + $0x5bc] sm:$0xf0] }
 0x11f   :  { %2269 = vmatpush.bf16.msrb.mxu0 %v6485_v40  ;;  %2230 = vmatpush.bf16.msra.mxu2 %v6005_v48  ;;  %v6129_v40 = vor.u32 %v7999_v31, %v6128_v28  ;;  %v5502_v48 = vld [vmem:[#allocation2 + $0x1c] sm:$0xf0]  ;;  %v6048_v31 = vld [vmem:[#allocation2 + $0x448] sm:$0xf] }
 0x120   :  { %v5505_v57 = vor.u32 %v7841_v47, %v5502_v48 }
 0x121   :  { %2253 = vmatpush.bf16.msra.mxu3 %v6385_v29  ;;  %2188 = vmatpush.bf16.msrb.mxu1 %v5585_v60  ;;  %v5588_v29 = vld [vmem:[#allocation2 + $0xb0] sm:$0xf]  ;;  %v7859_v60 = vld [vmem:[#allocation2 + $0x98] sm:$0xf0] }
 0x123   :  { %2270 = vmatpush.bf16.msrb.mxu0 %v6465_v56  ;;  %2231 = vmatpush.bf16.msra.mxu2 %v5985_v1  ;;  %v1936_v53 = vpop.f32.mrf.mxu0  ;;  %v6109_v56 = vor.u32 %v7994_v45, %v6108_v44  ;;  %v7989_v1 = vld [vmem:[#allocation2 + $0x4a8] sm:$0xf0]  ;;  %v6049_v44 = vor.u32 %v7979_v32, %v6048_v31  ;;  %v5508_v45 = vld [vmem:[#allocation2 + $0x10] sm:$0xf]  ;;  %v6162_v31 = vld [vmem:[#allocation2 + $0x544] sm:$0xf0] }
 0x124   :  { %v6089_v11 = vor.u32 %v7989_v1, %v6088_v0  ;;  %v6388_v32 = vld [vmem:[#allocation2 + $0x6f0] sm:$0xf] }
 0x125   :  { %2254 = vmatpush.bf16.msra.mxu3 %v6365_v55  ;;  %2189 = vmatpush.bf16.msrb.mxu1 %v5565_v12  ;;  %v5589_v55 = vor.u32 %v7864_v42, %v5588_v29  ;;  %v5548_v12 = vld [vmem:[#allocation2 + $0x60] sm:$0xf]  ;;  %v5529_v29 = vor.u32 %v7849_v27, %v5528_v26  ;;  %v5988_v26 = vld [vmem:[#allocation2 + $0x3d0] sm:$0xf] }
 0x126   :  { %2232 = vmatmul.bf16.vlgmr.msra.gmra.mxu2 %v8715_v2  ;;  %v5549_v24 = vor.u32 %v7854_v13, %v5548_v12  ;;  %v8011_v12 = vld [vmem:[#allocation2 + $0x55c] sm:$0xf]  ;;  %v6182_v13 = vld [vmem:[#allocation2 + $0x56c] sm:$0xf0] }
 0x127   :  { %2289 = vmatpush.bf16.msra.mxu0 %v5809_v61  ;;  %2276 = vmatpush.bf16.msrb.mxu2 %v5649_v6  ;;  %v5729_v61 = vor.u32 %v7899_v50, %v5728_v49  ;;  %v8031_v6 = vld [vmem:[#allocation2 + $0x5fc] sm:$0xf]  ;;  %v8760_v8 = vpop.f32.mrf.mxu3  ;;  %v6225_v49 = vor.u32 %v8021_v37, %v6222_v38  ;;  %v6288_v50 = vld [vmem:[#allocation2 + $0x628] sm:$0xf]  ;;  %v8780_v37 = vld [vmem:[%s9308_s4] sm:$0x1f] }
 0x128   :  { %v6289_v0 = vor.u32 %v8039_v51, %v6288_v50  ;;  %v5968_v51 = vld [vmem:[#allocation2 + $0x3a8] sm:$0xf] }
 0x129   :  { %2255 = vmatpush.bf16.msra.mxu3 %v6345_v9  ;;  %2190 = vmatpush.bf16.msrb.mxu1 %v5545_v25  ;;  %v5569_v9 = vor.u32 %v7859_v60, %v5568_v59  ;;  %v8762_v10 = vpop.f32.mrf.mxu2  ;;  %v6069_v25 = vor.u32 %v7984_v17, %v6068_v16  ;;  %v8069_v16 = vld [vmem:[#allocation2 + $0x728] sm:$0xf0] }
 0x12b   :  { %2290 = vmatpush.bf16.msra.mxu0 %v5789_v15  ;;  %2277 = vmatpush.bf16.msrb.mxu2 %v5629_v18  ;;  %v6265_v15 = vor.u32 %v8031_v6, %v6262_v7  ;;  %v5688_v18 = vld [vmem:[#allocation2 + $0x178] sm:$0xf]  ;;  %v8765_v23 = vpop.f32.mrf.mxu0  ;;  %v8034_v6 = vld [vmem:[#allocation2 + $0x610] sm:$0xf0] }
 0x12c   :  { %v5689_v28 = vor.u32 %v7889_v19, %v5688_v18  ;;  %v6008_v7 = vld [vmem:[#allocation2 + $0x3f8] sm:$0xf]  ;;  %v6269_v18 = vor.u32 %v8034_v6, %v6268_v5  ;;  %v5948_v6 = vld [vmem:[#allocation2 + $0x380] sm:$0xf] }
 0x12d   :  { %2256 = vmatpush.bf16.msra.mxu3 %v6325_v22  ;;  %2191 = vmatpush.bf16.msrb.mxu1 %v5525_v41  ;;  %v6242_v22 = vld [vmem:[#allocation2 + $0x5e4] sm:$0xf0]  ;;  %v8079_v41 = vld [vmem:[#allocation2 + $0x778] sm:$0xf0] }
 0x12e   :  { %6493 = vmatmul.msk.bf16.vlgmr.msrb.gmra.mxu0 %vm1908_vm2, %v8734_v4 }
 0x12f   :  { %2291 = vmatpush.bf16.msra.mxu0 %v5769_v30  ;;  %2278 = vmatpush.bf16.msrb.mxu2 %v5609_v34  ;;  %v6245_v30 = vor.u32 %v8026_v20, %v6242_v22  ;;  %v7884_v34 = vld [vmem:[#allocation2 + $0x160] sm:$0xf0]  ;;  %v6185_v22 = vor.u32 %v8011_v12, %v6182_v13  ;;  %v8014_v12 = vld [vmem:[#allocation2 + $0x570] sm:$0xf0]  ;;  %v8095_v13 = vld [vmem:[%s9309_s5 + $0x28] sm:$0xff] }
 0x130   :  { %v5669_v48 = vor.u32 %v7884_v34, %v5668_v33 }
 0x131   :  { %2257 = vmatpush.bf16.msra.mxu3 %v6305_v39  ;;  %2192 = vmatpush.bf16.msrb.mxu1 %v5505_v57  ;;  %v1923_v39 = vpop.f32.mrf.mxu3  ;;  %v1962_v42 = vpop.f32.mrf.mxu2  ;;  %v6202_v57 = vld [vmem:[#allocation2 + $0x594] sm:$0xf0] }
 0x132   :  { %v8767_v47 = vpop.f32.mrf.mxu1  ;;  %v6228_v39 = vld [vmem:[#allocation2 + $0x5b0] sm:$0xf]  ;;  %v8001_v42 = vld [vmem:[#allocation2 + $0x50c] sm:$0xf] }
 0x133   :  { %2292 = vmatpush.bf16.msra.mxu0 %v5749_v46  ;;  %2279 = vmatpush.bf16.msrb.mxu2 %v5589_v55  ;;  %v7844_v46 = vld [vmem:[#allocation2 + $0x20] sm:$0xf0]  ;;  %v7974_v55 = vld [vmem:[#allocation2 + $0x430] sm:$0xf0]  ;;  %v1988_v59 = vpop.f32.mrf.mxu0 }
 0x134   :  { %2258 = vmatmul.bf16.vlgmr.msra.gmra.mxu3 %v8722_v36  ;;  %2193 = vmatmul.bf16.vlgmr.msrb.gmra.mxu1 %v8713_v62  ;;  %v5509_v60 = vor.u32 %v7844_v46, %v5508_v45  ;;  %v6029_v1 = vor.u32 %v7974_v55, %v6028_v52  ;;  %v6368_v46 = vld [vmem:[#allocation2 + $0x6c8] sm:$0xf]  ;;  %v7959_v52 = vld [vmem:[#allocation2 + $0x3b8] sm:$0xf0] }
 0x135   :  { %2315 = vmatpush.bf16.msrb.mxu3 %v6129_v40  ;;  %2237 = vmatpush.bf16.msra.mxu1 %v6285_v63  ;;  %v6448_v40 = vld [vmem:[#allocation2 + $0x768] sm:$0xf]  ;;  %v8074_v63 = vld [vmem:[#allocation2 + $0x750] sm:$0xf0]  ;;  %v8019_v59 = vld [vmem:[#allocation2 + $0x598] sm:$0xf0] }
 0x136   :  { %v6449_v53 = vor.u32 %v8079_v41, %v6448_v40  ;;  %v8097_v40 = vld [vmem:[%s9309_s5 + $0x38] sm:$0xff] }
 0x137   :  { %2293 = vmatpush.bf16.msra.mxu0 %v5729_v61  ;;  %2280 = vmatpush.bf16.msrb.mxu2 %v5569_v9  ;;  %v6428_v61 = vld [vmem:[#allocation2 + $0x740] sm:$0xf] }
 0x138   :  { %v6429_v9 = vor.u32 %v8074_v63, %v6428_v61  ;;  %v5969_v63 = vor.u32 %v7959_v52, %v5968_v51 }
 0x139   :  { %2316 = vmatpush.bf16.msrb.mxu3 %v6109_v56  ;;  %2238 = vmatpush.bf16.msra.mxu1 %v6265_v15  ;;  %v8016_v56 = vld [vmem:[#allocation2 + $0x584] sm:$0xf]  ;;  %v6408_v15 = vld [vmem:[#allocation2 + $0x718] sm:$0xf]  ;;  %v8772_v17 = vpop.f32.mrf.mxu2 }
 0x13a   :  { %v6205_v3 = vor.u32 %v8016_v56, %v6202_v57  ;;  %v1949_v19 = vpop.f32.mrf.mxu1  ;;  %v6409_v27 = vor.u32 %v8069_v16, %v6408_v15  ;;  %v6208_v57 = vld [vmem:[#allocation2 + $0x588] sm:$0xf] }
 0x13b   :  { %2294 = vmatpush.bf16.msra.mxu0 %v5709_v14  ;;  %2281 = vmatpush.bf16.msrb.mxu2 %v5549_v24  ;;  %v8769_v14 = vpop.f32.mrf.mxu3  ;;  %v6248_v24 = vld [vmem:[#allocation2 + $0x5d8] sm:$0xf]  ;;  %v8775_v33 = vpop.f32.mrf.mxu0  ;;  %v6209_v5 = vor.u32 %v8019_v59, %v6208_v57  ;;  %v7934_v57 = vld [vmem:[#allocation2 + $0x2f0] sm:$0xf0] }
 0x13d   :  { %2317 = vmatpush.bf16.msrb.mxu3 %v6089_v11  ;;  %2239 = vmatpush.bf16.msra.mxu1 %v6245_v30  ;;  %v7969_v11 = vld [vmem:[#allocation2 + $0x408] sm:$0xf0]  ;;  %v8006_v30 = vld [vmem:[#allocation2 + $0x534] sm:$0xf] }
 0x13e   :  { %v6009_v20 = vor.u32 %v7969_v11, %v6008_v7  ;;  %v7954_v7 = vld [vmem:[#allocation2 + $0x390] sm:$0xf0]  ;;  %v6188_v11 = vld [vmem:[#allocation2 + $0x560] sm:$0xf] }
 0x13f   :  { %2295 = vmatpush.bf16.msra.mxu0 %v5689_v28  ;;  %2282 = vmatpush.bf16.msrb.mxu2 %v5529_v29  ;;  %v7964_v28 = vld [vmem:[#allocation2 + $0x3e0] sm:$0xf0]  ;;  %v5949_v16 = vor.u32 %v7954_v7, %v5948_v6  ;;  %v5828_v6 = vld [vmem:[#allocation2 + $0x290] sm:$0xf] }
 0x140   :  { %v5989_v38 = vor.u32 %v7964_v28, %v5988_v26  ;;  %v8024_v29 = vld [vmem:[#allocation2 + $0x5c0] sm:$0xf0]  ;;  %v6168_v26 = vld [vmem:[#allocation2 + $0x538] sm:$0xf] }
 0x141   :  { %2318 = vmatpush.bf16.msrb.mxu3 %v6069_v25  ;;  %2240 = vmatpush.bf16.msra.mxu1 %v6225_v49  ;;  %v8029_v25 = vld [vmem:[#allocation2 + $0x5e8] sm:$0xf0]  ;;  %v2014_v49 = vpop.f32.mrf.mxu2  ;;  %v6229_v50 = vor.u32 %v8024_v29, %v6228_v39  ;;  %v7944_v39 = vld [vmem:[#allocation2 + $0x340] sm:$0xf0]  ;;  %v6148_v29 = vld [vmem:[#allocation2 + $0x510] sm:$0xf] }
 0x142   :  { %v6249_v34 = vor.u32 %v8029_v25, %v6248_v24  ;;  %v8786_v55 = vpop.f32.mrf.mxu1  ;;  %v7939_v49 = vld [vmem:[#allocation2 + $0x318] sm:$0xf0]  ;;  %v7924_v7 = vld [vmem:[#allocation2 + $0x2a0] sm:$0xf0] }
 0x143   :  { %2296 = vmatpush.bf16.msra.mxu0 %v5669_v48  ;;  %2283 = vmatpush.bf16.msrb.mxu2 %v5509_v60  ;;  %v1975_v45 = vpop.f32.mrf.mxu3  ;;  %v8059_v48 = vld [vmem:[#allocation2 + $0x6d8] sm:$0xf0]  ;;  %v8096_v60 = vld [vmem:[%s9309_s5 + $0x30] sm:$0xff] }
 0x144   :  { %v6369_v61 = vor.u32 %v8059_v48, %v6368_v46  ;;  %v5888_v48 = vld [vmem:[#allocation2 + $0x308] sm:$0xf] }
 0x145   :  { %2319 = vmatpush.bf16.msrb.mxu3 %v6049_v44  ;;  %2241 = vmatpush.bf16.msra.mxu1 %v6205_v3  ;;  %v6142_v44 = vld [vmem:[#allocation2 + $0x51c] sm:$0xf0]  ;;  %v2053_v3 = vpop.f32.mrf.mxu0 }
 0x146   :  { %2297 = vmatmul.bf16.vlgmr.msra.gmra.mxu0 %v8710_v43  ;;  %2284 = vmatmul.bf16.vlgmr.msrb.gmra.mxu2 %v8713_v62  ;;  %v8064_v43 = vld [vmem:[#allocation2 + $0x700] sm:$0xf0]  ;;  %v6165_v62 = vor.u32 %v8006_v30, %v6162_v31  ;;  %v6145_v56 = vor.u32 %v8001_v42, %v6142_v44  ;;  %v7929_v3 = vld [vmem:[#allocation2 + $0x2c8] sm:$0xf0] }
 0x147   :  { %2341 = vmatpush.bf16.msrb.mxu0 %v6449_v53  ;;  %2328 = vmatpush.bf16.msra.mxu2 %v6289_v0  ;;  %v6389_v41 = vor.u32 %v8064_v43, %v6388_v32  ;;  %v598_v53 = vperm.slane %v8780_v37, 0  ;;  %v6348_v0 = vld [vmem:[#allocation2 + $0x6a0] sm:$0xf] }
 0x148   :  { %v8094_v30 = vld [vmem:[%s9309_s5 + $0x20] sm:$0xff] }
 0x149   :  { %2320 = vmatpush.bf16.msrb.mxu3 %v6029_v1  ;;  %2242 = vmatpush.bf16.msra.mxu1 %v6185_v22  ;;  %v8054_v1 = vld [vmem:[#allocation2 + $0x6b0] sm:$0xf0]  ;;  %v7949_v22 = vld [vmem:[#allocation2 + $0x368] sm:$0xf0]  ;;  %v8800_v28 = vpop.f32.mrf.mxu2 }
 0x14a   :  { %v6349_v15 = vor.u32 %v8054_v1, %v6348_v0  ;;  %v2001_v25 = vpop.f32.mrf.mxu1  ;;  %v5848_v1 = vld [vmem:[#allocation2 + $0x2b8] sm:$0xf] }
 0x14b   :  { %2342 = vmatpush.bf16.msrb.mxu0 %v6429_v9  ;;  %2329 = vmatpush.bf16.msra.mxu2 %v6269_v18  ;;  %v1922_v9 = vadd.f32 %v8760_v8, %v598_v53  ;;  %v8049_v18 = vld [vmem:[#allocation2 + $0x688] sm:$0xf0]  ;;  %v8796_v19 = vpop.f32.mrf.mxu3  ;;  %v6189_v8 = vor.u32 %v8014_v12, %v6188_v11  ;;  %v8092_v53 = vld [vmem:[%s9309_s5 + $0x10] sm:$0xff] }
 0x14c   :  { %v8089_v11 = vld [vmem:[#allocation2 + $0x7c8] sm:$0xf0]  ;;  %v8112_v12 = vld [vmem:[%s9309_s5 + $0xb0] sm:$0xff] }
 0x14d   :  { %2321 = vmatpush.bf16.msrb.mxu3 %v6009_v20  ;;  %2243 = vmatpush.bf16.msra.mxu1 %v6165_v62  ;;  %v5928_v20 = vld [vmem:[#allocation2 + $0x358] sm:$0xf]  ;;  %v1935_v24 = vadd.f32 %v8754_v21, %v1922_v9  ;;  %v5908_v62 = vld [vmem:[#allocation2 + $0x330] sm:$0xf] }
 0x14e   :  { %v5929_v43 = vor.u32 %v7949_v22, %v5928_v20  ;;  %v6488_v9 = vld [vmem:[#allocation2 + $0x7b8] sm:$0xf]  ;;  %v8084_v20 = vld [vmem:[#allocation2 + $0x7a0] sm:$0xf0]  ;;  %v8111_v22 = vld [vmem:[%s9309_s5 + $0xa8] sm:$0xff] }
 0x14f   :  { %2343 = vmatpush.bf16.msrb.mxu0 %v6409_v27  ;;  %2330 = vmatpush.bf16.msra.mxu2 %v6249_v34  ;;  %v8009_v27 = vld [vmem:[#allocation2 + $0x548] sm:$0xf0]  ;;  %v1948_v32 = vadd.f32 %v8767_v47, %v1935_v24  ;;  %v6308_v34 = vld [vmem:[#allocation2 + $0x650] sm:$0xf]  ;;  %v5909_v47 = vor.u32 %v7944_v39, %v5908_v62 }
 0x150   :  { %v6169_v21 = vor.u32 %v8009_v27, %v6168_v26  ;;  %v8105_v26 = vld [vmem:[%s9309_s5 + $0x78] sm:$0xff]  ;;  %v8110_v27 = vld [vmem:[%s9309_s5 + $0xa0] sm:$0xff]  ;;  %v8108_v62 = vld [vmem:[%s9309_s5 + $0x90] sm:$0xff] }
 0x151   :  { %2322 = vmatpush.bf16.msrb.mxu3 %v5989_v38  ;;  %2244 = vmatpush.bf16.msra.mxu1 %v6145_v56  ;;  %v8044_v38 = vld [vmem:[#allocation2 + $0x660] sm:$0xf0]  ;;  %v1961_v44 = vadd.f32 %v8762_v10, %v1948_v32  ;;  %v2066_v51 = vpop.f32.mrf.mxu2  ;;  %v5889_v56 = vor.u32 %v7939_v49, %v5888_v48  ;;  %v5868_v10 = vld [vmem:[#allocation2 + $0x2e0] sm:$0xf]  ;;  %v8109_v32 = vld [vmem:[%s9309_s5 + $0x98] sm:$0xff] }
 0x152   :  { %v6309_v42 = vor.u32 %v8044_v38, %v6308_v34  ;;  %v2025_v52 = vpop.f32.mrf.mxu1  ;;  %v8099_v51 = vld [vmem:[%s9309_s5 + $0x48] sm:$0xff] }
 0x153   :  { %2344 = vmatpush.bf16.msrb.mxu0 %v6389_v41  ;;  %2331 = vmatpush.bf16.msra.mxu2 %v6229_v50  ;;  %v8093_v41 = vld [vmem:[%s9309_s5 + $0x18] sm:$0xff]  ;;  %v2040_v45 = vpop.f32.mrf.mxu3  ;;  %v1974_v50 = vadd.f32 %v8769_v14, %v1961_v44  ;;  %v8091_v14 = vld [vmem:[%s9309_s5 + $0x8] sm:$0xff]  ;;  %v8106_v44 = vld [vmem:[%s9309_s5 + $0x80] sm:$0xff] }
 0x154   :  { %2323 = vmatmul.bf16.vlgmr.msrb.gmra.mxu3 %v8715_v2  ;;  %v6328_v2 = vld [vmem:[#allocation2 + $0x678] sm:$0xf]  ;;  %2245 = vmatmul.bf16.vlgmr.msra.gmra.mxu1 %v8725_v54 }
 0x155   :  { %2688 = vmatpush.bf16.msra.mxu3 %v8097_v40  ;;  %2302 = vmatpush.bf16.msrb.mxu1 %v5969_v63  ;;  %v6329_v31 = vor.u32 %v8049_v18, %v6328_v2  ;;  %v8004_v40 = vld [vmem:[#allocation2 + $0x520] sm:$0xf0]  ;;  %v1987_v59 = vadd.f32 %v8765_v23, %v1974_v50  ;;  %v6489_v18 = vor.u32 %v8089_v11, %v6488_v9 }
 0x156   :  { %v6149_v46 = vor.u32 %v8004_v40, %v6148_v29  ;;  %v8107_v40 = vld [vmem:[%s9309_s5 + $0x88] sm:$0xff] }
 0x157   :  { %2345 = vmatpush.bf16.msrb.mxu0 %v6369_v61  ;;  %2332 = vmatpush.bf16.msra.mxu2 %v6209_v5  ;;  %v5869_v61 = vor.u32 %v7934_v57, %v5868_v10  ;;  %v600_v10 = vperm.slane %v8780_v37, 2 }
 0x159   :  { %2689 = vmatpush.bf16.msra.mxu3 %v8096_v60  ;;  %2303 = vmatpush.bf16.msrb.mxu1 %v5949_v16  ;;  %v2000_v60 = vadd.f32 %v8786_v55, %v1987_v59  ;;  %v8090_v55 = vld [vmem:[%s9309_s5] sm:$0xff] }
 0x15a   :  { %v2027_v23 = vpop.f32.mrf.mxu1 }
 0x15b   :  { %2346 = vmatpush.bf16.msrb.mxu0 %v6349_v15  ;;  %2333 = vmatpush.bf16.msra.mxu2 %v6189_v8  ;;  %v8821_v63 = vpop.f32.mrf.mxu3  ;;  %v8823_v0 = vpop.f32.mrf.mxu0  ;;  %v2367_v5 = vmax.f32 %v2000_v60, 0.0  ;;  %v5829_v15 = vor.u32 %v7924_v7, %v5828_v6  ;;  %v6468_v8 = vld [vmem:[#allocation2 + $0x790] sm:$0xf] }
 0x15c   :  { %v6469_v24 = vor.u32 %v8084_v20, %v6468_v8  ;;  %v8119_v20 = vld [vmem:[%s9309_s5 + $0xe8] sm:$0xff] }
 0x15d   :  { %2690 = vmatpush.bf16.msra.mxu3 %v8095_v13  ;;  %2304 = vmatpush.bf16.msrb.mxu1 %v5929_v43  ;;  %v2372_v13 = vpack.c.bf16 %v2367_v5, %v2367_v5 }
 0x15f   :  { %2347 = vmatpush.bf16.msrb.mxu0 %v6329_v31  ;;  %2334 = vmatpush.bf16.msra.mxu2 %v6169_v21  ;;  %v8104_v31 = vld [vmem:[%s9309_s5 + $0x70] sm:$0xff] }
 0x161   :  { %2691 = vmatpush.bf16.msra.mxu3 %v8094_v30  ;;  %2305 = vmatpush.bf16.msrb.mxu1 %v5909_v47  ;;  %v599_v30 = vperm.slane %v8780_v37, 1 }
 0x163   :  { %2348 = vmatpush.bf16.msrb.mxu0 %v6309_v42  ;;  %2335 = vmatpush.bf16.msra.mxu2 %v6149_v46  ;;  %v2092_v16 = vpop.f32.mrf.mxu3  ;;  %v2105_v2 = vpop.f32.mrf.mxu0  ;;  %v2013_v43 = vadd.f32 %v8772_v17, %v599_v30  ;;  %v8102_v17 = vld [vmem:[%s9309_s5 + $0x60] sm:$0xff]  ;;  %v8129_v30 = vld [vmem:[%s9311_s7 + $0x14] sm:$0xf] }
 0x165   :  { %2692 = vmatpush.bf16.msra.mxu3 %v8093_v41  ;;  %2306 = vmatpush.bf16.msrb.mxu1 %v5889_v56  ;;  %v2026_v38 = vadd.f32 %v2025_v52, %v2013_v43  ;;  %v8098_v56 = vld [vmem:[%s9309_s5 + $0x40] sm:$0xff] }
 0x166   :  { %2349 = vmatmul.bf16.vlgmr.msrb.gmra.mxu0 %v8722_v36  ;;  %2336 = vmatmul.bf16.vlgmr.msra.gmra.mxu2 %v8725_v54  ;;  %v8113_v36 = vld [vmem:[%s9309_s5 + $0xb8] sm:$0xff]  ;;  %v5849_v54 = vor.u32 %v7929_v3, %v5848_v1  ;;  %v2104_v3 = vadd.f32 %v8823_v0, %v600_v10  ;;  %v2451_v10 = vld [vmem:[%s9309_s5 + $0x128] sm:$0xf] }
 0x167   :  { %2714 = vmatpush.bf16.msrb.mxu2 %v8113_v36  ;;  %v2039_v29 = vadd.f32 %v8796_v19, %v2026_v38  ;;  %v8101_v19 = vld [vmem:[%s9309_s5 + $0x58] sm:$0xff] }
 0x169   :  { %2693 = vmatpush.bf16.msra.mxu3 %v8092_v53  ;;  %2307 = vmatpush.bf16.msrb.mxu1 %v5869_v61  ;;  %v2116_v25 = vpop.f32.mrf.mxu2  ;;  %v2052_v42 = vadd.f32 %v8775_v33, %v2039_v29  ;;  %v8100_v33 = vld [vmem:[%s9309_s5 + $0x50] sm:$0xff]  ;;  %v8127_v61 = vld [vmem:[%s9311_s7 + $0x4] sm:$0xf] }
 0x16a   :  { %v2117_v23 = vadd.f32 %v2116_v25, %v2104_v3 }
 0x16b   :  { %2715 = vmatpush.bf16.msrb.mxu2 %v8112_v12  ;;  %v2065_v46 = vadd.f32 %v8800_v28, %v2052_v42  ;;  %v8121_v12 = vld [vmem:[%s9309_s5 + $0xf8] sm:$0xff] }
 0x16c   :  { %2727 = vmatpush.bf16.msra.mxu0 %v8121_v12 }
 0x16d   :  { %2694 = vmatpush.bf16.msra.mxu3 %v8091_v14  ;;  %2308 = vmatpush.bf16.msrb.mxu1 %v5849_v54 }
 0x16f   :  { %2716 = vmatpush.bf16.msrb.mxu2 %v8111_v22  ;;  %v2129_v34 = vpop.f32.mrf.mxu3 }
 0x171   :  { %2695 = vmatpush.bf16.msra.mxu3 %v8090_v55  ;;  %2309 = vmatpush.bf16.msrb.mxu1 %v5829_v15  ;;  %v2118_v21 = vpop.f32.mrf.mxu2  ;;  %v2077_v39 = vpop.f32.mrf.mxu1  ;;  %v2130_v55 = vadd.f32 %v2129_v34, %v2117_v23  ;;  %v8117_v34 = vld [vmem:[%s9309_s5 + $0xd8] sm:$0xff] }
 0x172   :  { %v2078_v48 = vadd.f32 %v2077_v39, %v2065_v46 }
 0x173   :  { %2717 = vmatpush.bf16.msrb.mxu2 %v8110_v27 }
 0x174   :  { %2696 = vmatmul.bf16.vlgmr.msra.gmra.mxu3 %v2372_v13  ;;  %2310 = vmatmul.bf16.vlgmr.msrb.gmra.mxu1 %v8727_v58  ;;  %v8103_v58 = vld [vmem:[%s9309_s5 + $0x68] sm:$0xff]  ;;  %v2091_v28 = vadd.f32 %v8821_v63, %v2078_v48  ;;  %v6648_v63 = vld [vmem:[%s9311_s7 + $0x1c] sm:$0xf0] }
 0x175   :  { %2360 = vmatpush.bf16.msra.mxu1 %v6489_v18  ;;  %v6651_v1 = vor.u32 %v8127_v61, %v6648_v63  ;;  %v8120_v18 = vld [vmem:[%s9309_s5 + $0xf0] sm:$0xff] }
 0x176   :  { %v2368_v57 = vmax.f32 %v2091_v28, 0.0  ;;  %2728 = vmatpush.bf16.msra.mxu0 %v8120_v18 }
 0x177   :  { %2718 = vmatpush.bf16.msrb.mxu2 %v8109_v32  ;;  %v2131_v41 = vpop.f32.mrf.mxu3 }
 0x178   :  { %v2373_v36 = vpack.c.bf16 %v2368_v57, %v2368_v57  ;;  %v8114_v41 = vld [vmem:[%s9309_s5 + $0xc0] sm:$0xff]  ;;  %v2605_v57 = vunpack.c.l.b16 %v2451_v10  ;;  %v8191_v10 = vld [vmem:[#allocation5 + $0x1c8] sm:$0xf0] }
 0x179   :  { %2361 = vmatpush.bf16.msra.mxu1 %v6469_v24  ;;  %v2079_v45 = vpop.f32.mrf.mxu1  ;;  %v8912_v24 = vld [vmem:[%s9311_s7 + $0x48] sm:$0xff] }
 0x17a   :  { %2729 = vmatpush.bf16.msra.mxu0 %v8119_v20  ;;  %v2816_v25 = vunpack.c.h.b16 %v8912_v24  ;;  %v8945_v45 = vld [vmem:[%s9311_s7 + $0x40] sm:$0xff]  ;;  %v2815_v18 = vunpack.c.l.b16 %v8912_v24  ;;  %v8123_v20 = vld [vmem:[%s9309_s5 + $0x108] sm:$0xff] }
 0x17b   :  { %2719 = vmatpush.bf16.msrb.mxu2 %v8108_v62  ;;  %v2155_v47 = vpop.f32.mrf.mxu0  ;;  %v2814_v46 = vunpack.c.h.b16 %v8945_v45  ;;  %v8132_v24 = vld [vmem:[%s9311_s7 + $0x28] sm:$0xf0] }
 0x17c   :  { %v2830_v27 = vpack.c.b16 %v2816_v25, %v2816_v25 }
 0x17d   :  { %2701 = vmatpush.bf16.msrb.mxu1 %v8105_v26  ;;  %v8118_v26 = vld [vmem:[%s9309_s5 + $0xe0] sm:$0xff]  ;;  %v2828_v48 = vpack.c.b16 %v2814_v46, %v2814_v46 }
 0x17e   :  { %2730 = vmatpush.bf16.msra.mxu0 %v8118_v26  ;;  %v2855_v43 = vsel %vm169_vm0, %v2830_v27, 0  ;;  %v8122_v26 = vld [vmem:[%s9309_s5 + $0x100] sm:$0xff]  ;;  %v6662_v27 = vld [vmem:[%s9311_s7 + $0x10] sm:$0xf] }
 0x17f   :  { %2720 = vmatpush.bf16.msrb.mxu2 %v8107_v40  ;;  %v2181_v49 = vpop.f32.mrf.mxu3 }
 0x181   :  { %2702 = vmatpush.bf16.msrb.mxu1 %v8104_v31  ;;  %v6664_v31 = vld [vmem:[%s9311_s7 + $0x2c] sm:$0xf0] }
 0x182   :  { %v6667_v38 = vor.u32 %v8129_v30, %v6664_v31  ;;  %2731 = vmatpush.bf16.msra.mxu0 %v8117_v34  ;;  %v6663_v30 = vor.u32 %v8132_v24, %v6662_v27  ;;  %v6981_v31 = vld [vmem:[#allocation5 + $0x258] sm:$0xf] }
 0x183   :  { %2721 = vmatpush.bf16.msrb.mxu2 %v8106_v44  ;;  %v2157_v50 = vpop.f32.mrf.mxu0 }
 0x184   :  { %6494 = vmatmul.msk.bf16.vlgmr.msra.gmra.mxu1 %vm1908_vm2, %v8734_v4  ;;  %v8884_v4 = vld [vmem:[%s9311_s7 + $0x38] sm:$0xff]  ;;  %v8128_v50 = vld [vmem:[%s9311_s7 + $0xc] sm:$0xf] }
 0x185   :  { %2703 = vmatpush.bf16.msrb.mxu1 %v8103_v58  ;;  %v2812_v52 = vunpack.c.h.b16 %v8884_v4  ;;  %v8116_v58 = vld [vmem:[%s9309_s5 + $0xd0] sm:$0xff]  ;;  %v2811_v61 = vunpack.c.l.b16 %v8884_v4  ;;  %v6646_v4 = vld [vmem:[%s9311_s7] sm:$0xf] }
 0x186   :  { %2732 = vmatpush.bf16.msra.mxu0 %v8116_v58  ;;  %v8206_v58 = vld [vmem:[#allocation5 + $0x240] sm:$0xf0] }
 0x187   :  { %v2826_v53 = vpack.c.b16 %v2812_v52, %v2812_v52  ;;  %v2183_v14 = vpop.f32.mrf.mxu3 }
 0x188   :  { %v2643_v14 = vpack.c.b16 %v2605_v57, %v2605_v57 }
 0x189   :  { %2704 = vmatpush.bf16.msrb.mxu1 %v8102_v17  ;;  %v2168_v59 = vpop.f32.mrf.mxu2  ;;  %v2843_v60 = vsel %vm169_vm0, %v2826_v53, 0  ;;  %v8115_v17 = vld [vmem:[%s9309_s5 + $0xc8] sm:$0xff] }
 0x18a   :  { %2879 = vmatpush.bf16.msra.mxu2 %v2843_v60  ;;  %2733 = vmatpush.bf16.msra.mxu0 %v8115_v17  ;;  %v2686_v60 = vsel %vm169_vm0, %v2643_v14, 0  ;;  %v6881_v14 = vld [vmem:[#allocation5 + $0x190] sm:$0xf] }
 0x18b   :  { %2742 = vmatpush.bf16.msrb.mxu3 %v2686_v60  ;;  %v8186_v60 = vld [vmem:[#allocation5 + $0x1a0] sm:$0xf0] }
 0x18d   :  { %2705 = vmatpush.bf16.msrb.mxu1 %v8101_v19 }
 0x18e   :  { %2880 = vmatpush.bf16.msra.mxu2 %v6651_v1  ;;  %2734 = vmatpush.bf16.msra.mxu0 %v8114_v41 }
 0x191   :  { %2706 = vmatpush.bf16.msrb.mxu1 %v8100_v33  ;;  %v2170_v5 = vpop.f32.mrf.mxu2  ;;  %v2142_v54 = vpop.f32.mrf.mxu1 }
 0x192   :  { %v2143_v6 = vadd.f32 %v2142_v54, %v2130_v55  ;;  %v8126_v55 = vld [vmem:[%s9309_s5 + $0x120] sm:$0xff] }
 0x193   :  { %2743 = vmatpush.bf16.msrb.mxu3 %v8126_v55 }
 0x194   :  { %v2156_v9 = vadd.f32 %v2155_v47, %v2143_v6  ;;  %v601_v47 = vperm.slane %v8780_v37, 3 }
 0x195   :  { %2707 = vmatpush.bf16.msrb.mxu1 %v8099_v51  ;;  %v6656_v51 = vld [vmem:[%s9311_s7 + $0x24] sm:$0xf0] }
 0x196   :  { %v2169_v11 = vadd.f32 %v2168_v59, %v2156_v9  ;;  %v6659_v28 = vor.u32 %v8128_v50, %v6656_v51  ;;  %v6654_v51 = vld [vmem:[%s9311_s7 + $0x8] sm:$0xf] }
 0x197   :  { %v2207_v7 = vpop.f32.mrf.mxu3 }
 0x198   :  { %v2182_v13 = vadd.f32 %v2181_v49, %v2169_v11  ;;  %v2849_v49 = vsel %vm169_vm0, %v2828_v48, 0  ;;  %v8125_v11 = vld [vmem:[%s9309_s5 + $0x118] sm:$0xff] }
 0x199   :  { %2708 = vmatpush.bf16.msrb.mxu1 %v8098_v56  ;;  %v2144_v16 = vpop.f32.mrf.mxu1  ;;  %2905 = vmatpush.bf16.msrb.mxu0 %v2849_v49 }
 0x19a   :  { %v2369_v0 = vmax.f32 %v2182_v13, 0.0  ;;  %2744 = vmatpush.bf16.msrb.mxu3 %v8125_v11 }
 0x19b   :  { %v2220_v15 = vpop.f32.mrf.mxu0 }
 0x19c   :  { %2709 = vmatmul.bf16.vlgmr.msrb.gmra.mxu1 %v2373_v36  ;;  %v2374_v8 = vpack.c.bf16 %v2369_v0, %v2369_v0  ;;  %v2825_v36 = vpack.c.b16 %v2811_v61, %v2811_v61 }
 0x19d   :  { %2906 = vmatpush.bf16.msrb.mxu0 %v6659_v28  ;;  %v8131_v28 = vld [vmem:[%s9311_s7 + $0x20] sm:$0xf0] }
 0x19e   :  { %2722 = vmatmul.bf16.vlgmr.msrb.gmra.mxu2 %v2374_v8  ;;  %v2840_v54 = vsel %vm169_vm0, %v2825_v36, 0  ;;  %v2768_v36 = vld [vmem:[%s9311_s7 + $0x50] sm:$0xf] }
 0x19f   :  { %v2209_v2 = vpop.f32.mrf.mxu3  ;;  %2931 = vmatpush.bf16.msrb.mxu2 %v2855_v43  ;;  %2866 = vmatpush.bf16.msra.mxu1 %v2840_v54  ;;  %v6841_v54 = vld [vmem:[#allocation5 + $0x140] sm:$0xf] }
 0x1a3   :  { %v2222_v22 = vpop.f32.mrf.mxu0  ;;  %2932 = vmatpush.bf16.msrb.mxu2 %v6667_v38 }
 0x1a4   :  { %v2829_v22 = vpack.c.b16 %v2815_v18, %v2815_v18  ;;  %v8133_v18 = vld [vmem:[%s9311_s7 + $0x30] sm:$0xf0] }
 0x1a6   :  { %v2852_v25 = vsel %vm169_vm0, %v2829_v22, 0  ;;  %v7601_v22 = vld [vmem:[#allocation5 + $0x730] sm:$0xf] }
 0x1a9   :  { %v2233_v32 = vpop.f32.mrf.mxu2 }
 0x1ab   :  { %v2272_v21 = vpop.f32.mrf.mxu0 }
 0x1ae   :  { %6673 = vmatmul.msk.bf16.vlgmr.msra.gmra.mxu2 %vm165_vm1, %v8671_v35 }
 0x1b1   :  { %v2235_v62 = vpop.f32.mrf.mxu2  ;;  %v2194_v39 = vpop.f32.mrf.mxu1 }
 0x1b2   :  { %v2195_v33 = vadd.f32 %v2194_v39, %v601_v47  ;;  %v6941_v62 = vld [vmem:[#allocation5 + $0x208] sm:$0xf]  ;;  %v2813_v39 = vunpack.c.l.b16 %v8945_v45 }
 0x1b3   :  { %v2274_v40 = vpop.f32.mrf.mxu0 }
 0x1b4   :  { %v2208_v52 = vadd.f32 %v2207_v7, %v2195_v33  ;;  %v8130_v7 = vld [vmem:[%s9311_s7 + $0x18] sm:$0xf0]  ;;  %v8201_v40 = vld [vmem:[#allocation5 + $0x218] sm:$0xf0]  ;;  %v2827_v41 = vpack.c.b16 %v2813_v39, %v2813_v39  ;;  %v8196_v33 = vld [vmem:[#allocation5 + $0x1f0] sm:$0xf0] }
 0x1b5   :  { %v6647_v12 = vor.u32 %v8130_v7, %v6646_v4  ;;  %v2817_v4 = vunpack.c.l.b16 %v2768_v36  ;;  %v7621_v7 = vld [vmem:[#allocation5 + $0x758] sm:$0xf]  ;;  %v7521_v39 = vld [vmem:[#allocation5 + $0x690] sm:$0xf]  ;;  %v8271_v36 = vld [vmem:[#allocation5 + $0x448] sm:$0xf0] }
 0x1b6   :  { %v2221_v59 = vadd.f32 %v2220_v15, %v2208_v52  ;;  %v8124_v15 = vld [vmem:[%s9309_s5 + $0x110] sm:$0xff] }
 0x1b7   :  { %v2259_v29 = vpop.f32.mrf.mxu3  ;;  %2867 = vmatpush.bf16.msra.mxu1 %v6647_v12  ;;  %2745 = vmatpush.bf16.msrb.mxu3 %v8124_v15 }
 0x1b8   :  { %v2234_v63 = vadd.f32 %v2233_v32, %v2221_v59  ;;  %v8211_v32 = vld [vmem:[#allocation5 + $0x268] sm:$0xf0] }
 0x1b9   :  { %v2196_v42 = vpop.f32.mrf.mxu1  ;;  %v6982_v43 = vor.u32 %v8211_v32, %v6981_v31  ;;  %v8361_v31 = vld [vmem:[#allocation5 + $0x718] sm:$0xf0]  ;;  %v7561_v32 = vld [vmem:[#allocation5 + $0x6e0] sm:$0xf] }
 0x1ba   :  { %6672 = vmatmul.msk.bf16.vlgmr.msra.gmra.mxu1 %vm165_vm1, %v8671_v35  ;;  %v6942_v42 = vor.u32 %v8201_v40, %v6941_v62  ;;  %v8351_v62 = vld [vmem:[#allocation5 + $0x6c8] sm:$0xf0]  ;;  %v8346_v40 = vld [vmem:[#allocation5 + $0x6a0] sm:$0xf0] }
 0x1bb   :  { %2746 = vmatpush.bf16.msrb.mxu3 %v8123_v20  ;;  %2918 = vmatpush.bf16.msrb.mxu1 %v2852_v25  ;;  %v8366_v25 = vld [vmem:[#allocation5 + $0x740] sm:$0xf0] }
 0x1be   :  { %6677 = vmatmul.msk.bf16.vlgmr.msrb.gmra.mxu2 %vm165_vm1, %v8671_v35 }
 0x1bf   :  { %v2261_v44 = vpop.f32.mrf.mxu3  ;;  %2747 = vmatpush.bf16.msrb.mxu3 %v8122_v26  ;;  %2919 = vmatpush.bf16.msrb.mxu1 %v6663_v30  ;;  %v7602_v26 = vor.u32 %v8366_v25, %v7601_v22  ;;  %v7581_v30 = vld [vmem:[#allocation5 + $0x708] sm:$0xf]  ;;  %v7161_v22 = vld [vmem:[#allocation5 + $0x3c0] sm:$0xf]  ;;  %v8256_v25 = vld [vmem:[#allocation5 + $0x3d0] sm:$0xf0] }
 0x1c0   :  { %v2846_v44 = vsel %vm169_vm0, %v2827_v41, 0  ;;  %v7301_v41 = vld [vmem:[#allocation5 + $0x4d8] sm:$0xf] }
 0x1c3   :  { %v8940_v19 = vpop.f32.mrf.mxu0  ;;  %4593 = vmatpush.bf16.msra.mxu1 %v6982_v43  ;;  %2892 = vmatpush.bf16.msra.mxu3 %v2846_v44  ;;  %v7582_v43 = vor.u32 %v8361_v31, %v7581_v30  ;;  %v8151_v30 = vld [vmem:[#allocation5 + $0x88] sm:$0xf0]  ;;  %v8169_v31 = vld [vmem:[#allocation5 + $0x11c] sm:$0xf] }
 0x1c9   :  { %v8957_v53 = vpop.f32.mrf.mxu2 }
 0x1ca   :  { %6676 = vmatmul.msk.bf16.vlgmr.msrb.gmra.mxu1 %vm165_vm1, %v8671_v35 }
 0x1cb   :  { %v2300_v56 = vpop.f32.mrf.mxu0 }
 0x1cc   :  { %v6901_v56 = vld [vmem:[#allocation5 + $0x1b8] sm:$0xf] }
 0x1cd   :  { %v6902_v57 = vor.u32 %v8191_v10, %v6901_v56  ;;  %v7261_v10 = vld [vmem:[#allocation5 + $0x488] sm:$0xf] }
 0x1d1   :  { %v2287_v1 = vpop.f32.mrf.mxu2  ;;  %v2246_v3 = vpop.f32.mrf.mxu1 }
 0x1d2   :  { %v2247_v23 = vadd.f32 %v2246_v3, %v2234_v63  ;;  %v6882_v63 = vor.u32 %v8186_v60, %v6881_v14  ;;  %v6861_v1 = vld [vmem:[#allocation5 + $0x168] sm:$0xf]  ;;  %v8181_v3 = vld [vmem:[#allocation5 + $0x178] sm:$0xf0]  ;;  %v8276_v14 = vld [vmem:[#allocation5 + $0x470] sm:$0xf0] }
 0x1d3   :  { %v6862_v55 = vor.u32 %v8181_v3, %v6861_v1  ;;  %v7221_v3 = vld [vmem:[#allocation5 + $0x438] sm:$0xf] }
 0x1d4   :  { %v2260_v6 = vadd.f32 %v2259_v29, %v2247_v23  ;;  %v602_v29 = vperm.slane %v8780_v37, 4  ;;  %v6921_v37 = vld [vmem:[#allocation5 + $0x1e0] sm:$0xf] }
 0x1d5   :  { %v6922_v50 = vor.u32 %v8196_v33, %v6921_v37  ;;  %v7501_v37 = vld [vmem:[#allocation5 + $0x668] sm:$0xf]  ;;  %v8341_v33 = vld [vmem:[#allocation5 + $0x678] sm:$0xf0] }
 0x1d6   :  { %v2273_v9 = vadd.f32 %v2272_v21, %v2260_v6  ;;  %v6961_v21 = vld [vmem:[#allocation5 + $0x230] sm:$0xf]  ;;  %v2286_v47 = vadd.f32 %v8957_v53, %v602_v29  ;;  %v6655_v53 = vor.u32 %v8131_v28, %v6654_v51  ;;  %v8176_v6 = vld [vmem:[#allocation5 + $0x150] sm:$0xf0] }
 0x1d7   :  { %v8967_v5 = vpop.f32.mrf.mxu3  ;;  %v6962_v17 = vor.u32 %v8206_v58, %v6961_v21  ;;  %v6842_v11 = vor.u32 %v8176_v6, %v6841_v54  ;;  %v8427_v21 = vld [vmem:[%s9310_s6] ss:$0 sm:$0xff]  ;;  %v7541_v58 = vld [vmem:[#allocation5 + $0x6b8] sm:$0xf]  ;;  %v8166_v54 = vld [vmem:[#allocation5 + $0x100] sm:$0xf0] }
 0x1d8   :  { %v2370_v13 = vmax.f32 %v2273_v9, 0.0  ;;  %v2299_v48 = vadd.f32 %v8940_v19, %v2286_v47  ;;  %2893 = vmatpush.bf16.msra.mxu3 %v6655_v53  ;;  %v7281_v51 = vld [vmem:[#allocation5 + $0x4b0] sm:$0xf]  ;;  %v8336_v53 = vld [vmem:[#allocation5 + $0x650] sm:$0xf0]  ;;  %s5426_s6 = sshll.u32 %s8539_s9, 4  ;;  %s5427_s6 = int_to_ptr.vmem [resolvable:$true] %s5426_s6 }
 0x1d9   :  { %v2248_v16 = vpop.f32.mrf.mxu1  ;;  %4594 = vmatpush.bf16.msra.mxu1 %v6962_v17  ;;  %v7542_v17 = vor.u32 %v8351_v62, %v7541_v58  ;;  %v8146_v58 = vld [vmem:[#allocation5 + $0x60] sm:$0xf0]  ;;  %v8164_v62 = vld [vmem:[#allocation5 + $0xf4] sm:$0xf] }
 0x1da   :  { %v2375_v0 = vpack.c.bf16 %v2370_v13, %v2370_v13  ;;  %v2831_v16 = vpack.c.b16 %v2817_v4, %v2817_v4 }
 0x1dc   :  { %2735 = vmatmul.bf16.vlgmr.msra.gmra.mxu0 %v2375_v0 }
 0x1dd   :  { %4595 = vmatpush.bf16.msra.mxu1 %v6942_v42  ;;  %v8291_v42 = vld [vmem:[#allocation5 + $0x4e8] sm:$0xf0] }
 0x1df   :  { %v2326_v2 = vpop.f32.mrf.mxu3 }
 0x1e0   :  { %v6670_v2 = vld [vmem:[%s9311_s7 + $0x18] sm:$0xf] }
 0x1e1   :  { %4596 = vmatpush.bf16.msra.mxu1 %v6922_v50  ;;  %v6671_v24 = vor.u32 %v8133_v18, %v6670_v2  ;;  %v7502_v50 = vor.u32 %v8341_v33, %v7501_v37  ;;  %v8156_v18 = vld [vmem:[#allocation5 + $0xb0] sm:$0xf0] }
 0x1e2   :  { %v8284_v33 = vld [vmem:[#allocation5 + $0x4b4] sm:$0xf] }
 0x1e3   :  { %v8985_v8 = vpop.f32.mrf.mxu0 }
 0x1e5   :  { %4597 = vmatpush.bf16.msra.mxu1 %v6902_v57  ;;  %v8281_v57 = vld [vmem:[#allocation5 + $0x498] sm:$0xf0] }
 0x1e9   :  { %v2337_v34 = vpop.f32.mrf.mxu2  ;;  %4598 = vmatpush.bf16.msra.mxu1 %v6882_v63  ;;  %v8171_v63 = vld [vmem:[#allocation5 + $0x128] sm:$0xf0] }
 0x1eb   :  { %v2352_v38 = vpop.f32.mrf.mxu0 }
 0x1ec   :  { %6675 = vmatmul.msk.bf16.vlgmr.msrb.gmra.mxu0 %vm165_vm1, %v8671_v35 }
 0x1ed   :  { %4599 = vmatpush.bf16.msra.mxu1 %v6862_v55  ;;  %v6801_v55 = vld [vmem:[#allocation5 + $0xf0] sm:$0xf] }
 0x1ee   :  { %v6802_v4 = vor.u32 %v8166_v54, %v6801_v55  ;;  %v6743_v55 = vld [vmem:[#allocation5 + $0x8c] sm:$0xf0]  ;;  %v8274_v54 = vld [vmem:[#allocation5 + $0x464] sm:$0xf] }
 0x1f1   :  { %v2339_v46 = vpop.f32.mrf.mxu2  ;;  %v2311_v45 = vpop.f32.mrf.mxu1  ;;  %4600 = vmatpush.bf16.msra.mxu1 %v6842_v11 }
 0x1f2   :  { %v2312_v52 = vadd.f32 %v2311_v45, %v2299_v48  ;;  %v7522_v46 = vor.u32 %v8346_v40, %v7521_v39  ;;  %v7302_v45 = vor.u32 %v8291_v42, %v7301_v41  ;;  %v8289_v41 = vld [vmem:[#allocation5 + $0x4dc] sm:$0xf]  ;;  %v7303_v42 = vld [vmem:[#allocation5 + $0x4ec] sm:$0xf0] }
 0x1f3   :  { %v7306_v37 = vor.u32 %v8289_v41, %v7303_v42  ;;  %v7381_v42 = vld [vmem:[#allocation5 + $0x578] sm:$0xf] }
 0x1f4   :  { %v2325_v19 = vadd.f32 %v8967_v5, %v2312_v52  ;;  %v8371_v5 = vld [vmem:[#allocation5 + $0x768] sm:$0xf0]  ;;  %v7481_v52 = vld [vmem:[#allocation5 + $0x640] sm:$0xf] }
 0x1f5   :  { %v7622_v13 = vor.u32 %v8371_v5, %v7621_v7  ;;  %v7482_v56 = vor.u32 %v8336_v53, %v7481_v52  ;;  %v7201_v7 = vld [vmem:[#allocation5 + $0x410] sm:$0xf]  ;;  %v8266_v5 = vld [vmem:[#allocation5 + $0x420] sm:$0xf0]  ;;  %v6681_v53 = vld [vmem:[#allocation5] sm:$0xf] }
 0x1f6   :  { %v2338_v23 = vadd.f32 %v2337_v34, %v2325_v19  ;;  %v8356_v34 = vld [vmem:[#allocation5 + $0x6f0] sm:$0xf0]  ;;  %v7262_v19 = vor.u32 %v8281_v57, %v7261_v10  ;;  %v7202_v11 = vor.u32 %v8266_v5, %v7201_v7  ;;  %v8154_v57 = vld [vmem:[#allocation5 + $0xa4] sm:$0xf]  ;;  %v7243_v7 = vld [vmem:[#allocation5 + $0x474] sm:$0xf0] }
 0x1f7   :  { %v9009_v49 = vpop.f32.mrf.mxu3  ;;  %4645 = vmatpush.bf16.msrb.mxu1 %v7622_v13  ;;  %v7562_v38 = vor.u32 %v8356_v34, %v7561_v32  ;;  %v8161_v13 = vld [vmem:[#allocation5 + $0xd8] sm:$0xf0]  ;;  %v7441_v5 = vld [vmem:[#allocation5 + $0x5f0] sm:$0xf] }
 0x1f8   :  { %v2351_v9 = vadd.f32 %v8985_v8, %v2338_v23  ;;  %v2858_v8 = vsel %vm169_vm0, %v2831_v16, 0  ;;  %v2698_v29 = vadd.f32 %v8427_v21, %v9009_v49  ;;  %v8286_v49 = vld [vmem:[#allocation5 + $0x4c0] sm:$0xf0]  ;;  %v7222_v23 = vor.u32 %v8271_v36, %v7221_v3  ;;  %v7181_v16 = vld [vmem:[#allocation5 + $0x3e8] sm:$0xf] }
 0x1f9   :  { %v2313_v59 = vpop.f32.mrf.mxu1  ;;  %v7282_v28 = vor.u32 %v8286_v49, %v7281_v51  ;;  %v6721_v21 = vld [vmem:[#allocation5 + $0x50] sm:$0xf]  ;;  %v6783_v51 = vld [vmem:[#allocation5 + $0xdc] sm:$0xf0] }
 0x1fa   :  { %v7241_v59 = vld [vmem:[#allocation5 + $0x460] sm:$0xf] }
 0x1fb   :  { %4646 = vmatpush.bf16.msrb.mxu1 %v7602_v26  ;;  %v7242_v60 = vor.u32 %v8276_v14, %v7241_v59  ;;  %v7162_v26 = vor.u32 %v8256_v25, %v7161_v22  ;;  %v7263_v3 = vld [vmem:[#allocation5 + $0x49c] sm:$0xf0]  ;;  %v7223_v22 = vld [vmem:[#allocation5 + $0x44c] sm:$0xf0] }
 0x1ff   :  { %v2699_v61 = vpop.f32.mrf.mxu3  ;;  %4647 = vmatpush.bf16.msrb.mxu1 %v7582_v43  ;;  %v6823_v43 = vld [vmem:[#allocation5 + $0x12c] sm:$0xf0] }
 0x200   :  { %v6821_v61 = vld [vmem:[#allocation5 + $0x118] sm:$0xf] }
 0x201   :  { %v2363_v12 = vpop.f32.mrf.mxu1  ;;  %v6822_v1 = vor.u32 %v8171_v63, %v6821_v61  ;;  %v7461_v61 = vld [vmem:[#allocation5 + $0x618] sm:$0xf]  ;;  %v8331_v63 = vld [vmem:[#allocation5 + $0x628] sm:$0xf0] }
 0x202   :  { %v2364_v15 = vadd.f32 %v2363_v12, %v2351_v9  ;;  %v6781_v12 = vld [vmem:[#allocation5 + $0xc8] sm:$0xf]  ;;  %v7462_v36 = vor.u32 %v8331_v63, %v7461_v61 }
 0x203   :  { %4648 = vmatpush.bf16.msrb.mxu1 %v7562_v38  ;;  %4580 = vmatpush.bf16.msra.mxu0 %v6822_v1  ;;  %v6826_v38 = vor.u32 %v8169_v31, %v6823_v43  ;;  %v8279_v1 = vld [vmem:[#allocation5 + $0x48c] sm:$0xf]  ;;  %v6703_v31 = vld [vmem:[#allocation5 + $0x3c] sm:$0xf0] }
 0x204   :  { %v2371_v0 = vmax.f32 %v2364_v15, 0.0  ;;  %v6782_v15 = vor.u32 %v8161_v13, %v6781_v12 }
 0x206   :  { %v2376_v20 = vpack.c.bf16 %v2371_v0, %v2371_v0  ;;  %v8261_v0 = vld [vmem:[#allocation5 + $0x3f8] sm:$0xf0] }
 0x207   :  { %4649 = vmatpush.bf16.msrb.mxu1 %v7542_v17  ;;  %4581 = vmatpush.bf16.msra.mxu0 %v6802_v4  ;;  %v7182_v2 = vor.u32 %v8261_v0, %v7181_v16  ;;  %v6803_v17 = vld [vmem:[#allocation5 + $0x104] sm:$0xf0]  ;;  %v7266_v4 = vor.u32 %v8279_v1, %v7263_v3  ;;  %v8167_v3 = vld [vmem:[#allocation5 + $0x108] sm:$0xf0] }
 0x208   :  { %6643 = vmatmul.msk.bf16.vlgmr.msrb.gmra.mxu3 %vm2681_vm3, %v2376_v20  ;;  %v6723_v16 = vld [vmem:[#allocation5 + $0x64] sm:$0xf0] }
 0x209   :  { %v2365_v27 = vpop.f32.mrf.mxu1  ;;  %2944 = vmatpush.bf16.msrb.mxu3 %v2858_v8 }
 0x20a   :  { %v9043_v27 = vld [vmem:[%s9312_s8] sm:$0x7f] }
 0x20b   :  { %4650 = vmatpush.bf16.msrb.mxu1 %v7522_v46  ;;  %4582 = vmatpush.bf16.msra.mxu0 %v6782_v15  ;;  %v2772_v34 = vperm.slane %v9043_v27, 1  ;;  %v6701_v46 = vld [vmem:[#allocation5 + $0x28] sm:$0xf]  ;;  %v2776_v12 = vperm.slane %v9043_v27, 5  ;;  %v8144_v15 = vld [vmem:[#allocation5 + $0x54] sm:$0xf] }
 0x20c   :  { %v6726_v0 = vor.u32 %v8144_v15, %v6723_v16 }
 0x20d   :  { %2945 = vmatpush.bf16.msrb.mxu3 %v6671_v24  ;;  %v6741_v24 = vld [vmem:[#allocation5 + $0x78] sm:$0xf] }
 0x20e   :  { %v6742_v32 = vor.u32 %v8151_v30, %v6741_v24  ;;  %v8139_v30 = vld [vmem:[#allocation5 + $0x2c] sm:$0xf] }
 0x20f   :  { %4651 = vmatpush.bf16.msrb.mxu1 %v7502_v50  ;;  %v8159_v50 = vld [vmem:[#allocation5 + $0xcc] sm:$0xf]  ;;  %v6706_v43 = vor.u32 %v8139_v30, %v6703_v31  ;;  %v7123_v31 = vld [vmem:[#allocation5 + $0x384] sm:$0xf0] }
 0x210   :  { %v6786_v52 = vor.u32 %v8159_v50, %v6783_v51  ;;  %v8306_v50 = vld [vmem:[#allocation5 + $0x560] sm:$0xf0] }
 0x211   :  { %v8254_v51 = vld [vmem:[#allocation5 + $0x3c4] sm:$0xf] }
 0x213   :  { %4652 = vmatpush.bf16.msrb.mxu1 %v7482_v56  ;;  %v8136_v56 = vld [vmem:[#allocation5 + $0x10] sm:$0xf0] }
 0x214   :  { %v6682_v10 = vor.u32 %v8136_v56, %v6681_v53  ;;  %v6829_v53 = vld [vmem:[#allocation5 + $0x120] sm:$0xf]  ;;  %v8172_v56 = vld [vmem:[#allocation5 + $0x130] sm:$0xf0] }
 0x218   :  { %6674 = vmatmul.msk.bf16.vlgmr.msra.gmra.mxu3 %vm165_vm1, %v8671_v35 }
 0x219   :  { %v2710_v44 = vpop.f32.mrf.mxu1  ;;  %4619 = vmatpush.bf16.msra.mxu3 %v7302_v45  ;;  %v8141_v45 = vld [vmem:[#allocation5 + $0x38] sm:$0xf0] }
 0x21a   :  { %v2711_v47 = vadd.f32 %v2710_v44, %v2698_v29  ;;  %v6722_v29 = vor.u32 %v8146_v58, %v6721_v21  ;;  %v6806_v44 = vor.u32 %v8164_v62, %v6803_v17  ;;  %v7203_v21 = vld [vmem:[#allocation5 + $0x424] sm:$0xf0]  ;;  %v8316_v62 = vld [vmem:[#allocation5 + $0x5b0] sm:$0xf0]  ;;  %v6683_v17 = vld [vmem:[#allocation5 + $0x14] sm:$0xf0] }
 0x21d   :  { %4620 = vmatpush.bf16.msra.mxu3 %v7282_v28  ;;  %v7283_v28 = vld [vmem:[#allocation5 + $0x4c4] sm:$0xf0] }
 0x21e   :  { %v7286_v14 = vor.u32 %v8284_v33, %v7283_v28  ;;  %v7163_v28 = vld [vmem:[#allocation5 + $0x3d4] sm:$0xf0] }
 0x221   :  { %v2712_v48 = vpop.f32.mrf.mxu1  ;;  %4621 = vmatpush.bf16.msra.mxu3 %v7262_v19  ;;  %v2723_v6 = vpop.f32.mrf.mxu2  ;;  %v6763_v19 = vld [vmem:[#allocation5 + $0xb4] sm:$0xf0] }
 0x222   :  { %v9038_v9 = vadd.f32 %v2723_v6, %v2711_v47  ;;  %v6702_v48 = vor.u32 %v8141_v45, %v6701_v46  ;;  %v6766_v59 = vor.u32 %v8154_v57, %v6763_v19  ;;  %v8259_v46 = vld [vmem:[#allocation5 + $0x3ec] sm:$0xf]  ;;  %v7183_v45 = vld [vmem:[#allocation5 + $0x3fc] sm:$0xf0]  ;;  %v7166_v57 = vor.u32 %v8254_v51, %v7163_v28  ;;  %v7341_v19 = vld [vmem:[#allocation5 + $0x528] sm:$0xf] }
 0x223   :  { %v7186_v33 = vor.u32 %v8259_v46, %v7183_v45  ;;  %v7081_v46 = vld [vmem:[#allocation5 + $0x320] sm:$0xf]  ;;  %v8236_v45 = vld [vmem:[#allocation5 + $0x330] sm:$0xf0]  ;;  %v7083_v51 = vld [vmem:[#allocation5 + $0x334] sm:$0xf0] }
 0x225   :  { %4622 = vmatpush.bf16.msra.mxu3 %v7242_v60 }
 0x228   :  { %6678 = vmatmul.msk.bf16.vlgmr.msrb.gmra.mxu3 %vm165_vm1, %v8671_v35  ;;  %v6761_v35 = vld [vmem:[#allocation5 + $0xa0] sm:$0xf] }
 0x229   :  { %4623 = vmatpush.bf16.msra.mxu3 %v7222_v23  ;;  %v2725_v20 = vpop.f32.mrf.mxu2  ;;  %v6762_v8 = vor.u32 %v8156_v18, %v6761_v35  ;;  %v8149_v23 = vld [vmem:[#allocation5 + $0x7c] sm:$0xf]  ;;  %v7421_v18 = vld [vmem:[#allocation5 + $0x5c8] sm:$0xf] }
 0x22a   :  { %v6746_v6 = vor.u32 %v8149_v23, %v6743_v55  ;;  %v8321_v20 = vld [vmem:[#allocation5 + $0x5d8] sm:$0xf0]  ;;  %v7321_v23 = vld [vmem:[#allocation5 + $0x500] sm:$0xf]  ;;  %v8296_v55 = vld [vmem:[#allocation5 + $0x510] sm:$0xf0] }
 0x22b   :  { %4583 = vmatpush.bf16.msra.mxu0 %v6762_v8  ;;  %v8269_v8 = vld [vmem:[#allocation5 + $0x43c] sm:$0xf] }
 0x22d   :  { %4624 = vmatpush.bf16.msra.mxu3 %v7202_v11  ;;  %v8326_v11 = vld [vmem:[#allocation5 + $0x600] sm:$0xf0] }
 0x22e   :  { %v7442_v13 = vor.u32 %v8326_v11, %v7441_v5  ;;  %v8251_v5 = vld [vmem:[#allocation5 + $0x3a8] sm:$0xf0]  ;;  %v8249_v11 = vld [vmem:[#allocation5 + $0x39c] sm:$0xf] }
 0x22f   :  { %4584 = vmatpush.bf16.msra.mxu0 %v6742_v32  ;;  %v7226_v32 = vor.u32 %v8269_v8, %v7223_v22  ;;  %v8246_v8 = vld [vmem:[#allocation5 + $0x380] sm:$0xf0]  ;;  %v8244_v22 = vld [vmem:[#allocation5 + $0x374] sm:$0xf] }
 0x231   :  { %4625 = vmatpush.bf16.msra.mxu3 %v7182_v2  ;;  %v2882_v39 = vpop.f32.mrf.mxu2  ;;  %v7246_v2 = vor.u32 %v8274_v54, %v7243_v7  ;;  %v7141_v7 = vld [vmem:[#allocation5 + $0x398] sm:$0xf] }
 0x232   :  { %v2883_v40 = vadd.f32 %v2882_v39, %v2772_v34  ;;  %v7401_v34 = vld [vmem:[#allocation5 + $0x5a0] sm:$0xf]  ;;  %v7142_v16 = vor.u32 %v8251_v5, %v7141_v7  ;;  %v7063_v7 = vld [vmem:[#allocation5 + $0x30c] sm:$0xf0]  ;;  %v6689_v5 = vld [vmem:[#allocation5 + $0x8] sm:$0xf] }
 0x233   :  { %4585 = vmatpush.bf16.msra.mxu0 %v6722_v29  ;;  %v7402_v39 = vor.u32 %v8316_v62, %v7401_v34  ;;  %v8134_v29 = vld [vmem:[#allocation5 + $0x4] sm:$0xf]  ;;  %v7101_v34 = vld [vmem:[#allocation5 + $0x348] sm:$0xf]  ;;  %v6749_v62 = vld [vmem:[#allocation5 + $0x80] sm:$0xf] }
 0x234   :  { %v2952_v47 = vmax.f32 %v2883_v40, 0.0  ;;  %v6686_v41 = vor.u32 %v8134_v29, %v6683_v17  ;;  %4606 = vmatpush.bf16.msra.mxu2 %v7142_v16  ;;  %v7103_v17 = vld [vmem:[#allocation5 + $0x35c] sm:$0xf0]  ;;  %v7041_v16 = vld [vmem:[#allocation5 + $0x2d0] sm:$0xf] }
 0x235   :  { %4626 = vmatpush.bf16.msra.mxu3 %v7162_v26  ;;  %v7422_v26 = vor.u32 %v8321_v20, %v7421_v18  ;;  %v7121_v20 = vld [vmem:[#allocation5 + $0x370] sm:$0xf] }
 0x236   :  { %v9046_v49 = vpack.c.bf16 %v2952_v47, %v2952_v47  ;;  %v7122_v30 = vor.u32 %v8246_v8, %v7121_v20  ;;  %v8319_v20 = vld [vmem:[#allocation5 + $0x5cc] sm:$0xf]  ;;  %v7043_v8 = vld [vmem:[#allocation5 + $0x2e4] sm:$0xf0] }
 0x237   :  { %4586 = vmatpush.bf16.msra.mxu0 %v6702_v48  ;;  %v7361_v48 = vld [vmem:[#allocation5 + $0x550] sm:$0xf]  ;;  %v2869_v61 = vpop.f32.mrf.mxu1 }
 0x238   :  { %4601 = vmatmul.bf16.vlgmr.msra.gmra.mxu1 %v9046_v49  ;;  %4607 = vmatpush.bf16.msra.mxu2 %v7122_v30 }
 0x239   :  { %4671 = vmatpush.bf16.msrb.mxu3 %v6826_v38  ;;  %4710 = vmatpush.bf16.msra.mxu1 %v7306_v37  ;;  %v2884_v60 = vpop.f32.mrf.mxu2  ;;  %v8264_v38 = vld [vmem:[#allocation5 + $0x414] sm:$0xf] }
 0x23a   :  { %v7206_v40 = vor.u32 %v8264_v38, %v7203_v21  ;;  %v6809_v60 = vld [vmem:[#allocation5 + $0xf8] sm:$0xf]  ;;  %v8241_v38 = vld [vmem:[#allocation5 + $0x358] sm:$0xf0]  ;;  %v8239_v21 = vld [vmem:[#allocation5 + $0x34c] sm:$0xf] }
 0x23b   :  { %4587 = vmatpush.bf16.msra.mxu0 %v6682_v10  ;;  %v2771_v10 = vperm.slane %v9043_v27, 0  ;;  %v7102_v29 = vor.u32 %v8241_v38, %v7101_v34  ;;  %v7021_v34 = vld [vmem:[#allocation5 + $0x2a8] sm:$0xf]  ;;  %v8221_v38 = vld [vmem:[#allocation5 + $0x2b8] sm:$0xf0] }
 0x23d   :  { %4672 = vmatpush.bf16.msrb.mxu3 %v6806_v44  ;;  %4711 = vmatpush.bf16.msra.mxu1 %v7286_v14  ;;  %v8311_v44 = vld [vmem:[#allocation5 + $0x588] sm:$0xf0]  ;;  %v6830_v14 = vor.u32 %v8172_v56, %v6829_v53  ;;  %v7463_v53 = vld [vmem:[#allocation5 + $0x62c] sm:$0xf0] }
 0x23e   :  { %v7382_v37 = vor.u32 %v8311_v44, %v7381_v42  ;;  %v6729_v42 = vld [vmem:[#allocation5 + $0x58] sm:$0xf]  ;;  %4608 = vmatpush.bf16.msra.mxu2 %v7102_v29  ;;  %v8314_v29 = vld [vmem:[#allocation5 + $0x5a4] sm:$0xf] }
 0x23f   :  { %4632 = vmatpush.bf16.msrb.mxu0 %v7462_v36  ;;  %v2870_v36 = vadd.f32 %v2869_v61, %v2771_v10  ;;  %v2871_v18 = vpop.f32.mrf.mxu1  ;;  %v7061_v61 = vld [vmem:[#allocation5 + $0x2f8] sm:$0xf] }
 0x240   :  { %v8137_v18 = vld [vmem:[#allocation5 + $0x18] sm:$0xf0] }
 0x241   :  { %4673 = vmatpush.bf16.msrb.mxu3 %v6786_v52  ;;  %4712 = vmatpush.bf16.msra.mxu1 %v7266_v4  ;;  %v2934_v35 = vpop.f32.mrf.mxu2  ;;  %v7362_v52 = vor.u32 %v8306_v50, %v7361_v48  ;;  %v2951_v54 = vmax.f32 %v2870_v36, 0.0  ;;  %v6810_v4 = vor.u32 %v8167_v3, %v6809_v60  ;;  %v7082_v48 = vor.u32 %v8236_v45, %v7081_v46  ;;  %v8234_v50 = vld [vmem:[#allocation5 + $0x324] sm:$0xf]  ;;  %v8231_v36 = vld [vmem:[#allocation5 + $0x308] sm:$0xf0] }
 0x242   :  { %v2935_v25 = vadd.f32 %v2934_v35, %v2776_v12  ;;  %v6789_v12 = vld [vmem:[#allocation5 + $0xd0] sm:$0xf]  ;;  %v7086_v10 = vor.u32 %v8234_v50, %v7083_v51  ;;  %v8142_v60 = vld [vmem:[#allocation5 + $0x40] sm:$0xf0]  ;;  %v7001_v46 = vld [vmem:[#allocation5 + $0x280] sm:$0xf] }
 0x243   :  { %4633 = vmatpush.bf16.msrb.mxu0 %v7442_v13  ;;  %v8162_v13 = vld [vmem:[#allocation5 + $0xe0] sm:$0xf0]  ;;  %v9056_v15 = vpack.c.bf16 %v2951_v54, %v2951_v54  ;;  %4609 = vmatpush.bf16.msra.mxu2 %v7082_v48  ;;  %v8324_v54 = vld [vmem:[#allocation5 + $0x5f4] sm:$0xf]  ;;  %v8309_v50 = vld [vmem:[#allocation5 + $0x57c] sm:$0xf] }
 0x244   :  { %v2956_v24 = vmax.f32 %v2935_v25, 0.0  ;;  %v6790_v35 = vor.u32 %v8162_v13, %v6789_v12  ;;  %v8216_v45 = vld [vmem:[#allocation5 + $0x290] sm:$0xf0]  ;;  %v7383_v51 = vld [vmem:[#allocation5 + $0x58c] sm:$0xf0] }
 0x245   :  { %4674 = vmatpush.bf16.msrb.mxu3 %v6766_v59  ;;  %4713 = vmatpush.bf16.msra.mxu1 %v7246_v2  ;;  %v8301_v59 = vld [vmem:[#allocation5 + $0x538] sm:$0xf0] }
 0x246   :  { %v9050_v58 = vpack.c.bf16 %v2956_v24, %v2956_v24  ;;  %v7342_v63 = vor.u32 %v8301_v59, %v7341_v19  ;;  %4588 = vmatmul.bf16.vlgmr.msra.gmra.mxu0 %v9056_v15  ;;  %v8157_v24 = vld [vmem:[#allocation5 + $0xb8] sm:$0xf0] }
 0x247   :  { %4634 = vmatpush.bf16.msrb.mxu0 %v7422_v26  ;;  %v6769_v26 = vld [vmem:[#allocation5 + $0xa8] sm:$0xf]  ;;  %v2921_v56 = vpop.f32.mrf.mxu1 }
 0x248   :  { %4653 = vmatmul.bf16.vlgmr.msrb.gmra.mxu1 %v9050_v58 }
 0x249   :  { %4675 = vmatpush.bf16.msrb.mxu3 %v6746_v6  ;;  %4714 = vmatpush.bf16.msra.mxu1 %v7226_v32  ;;  %v2936_v47 = vpop.f32.mrf.mxu2  ;;  %v7322_v6 = vor.u32 %v8296_v55, %v7321_v23  ;;  %v7126_v32 = vor.u32 %v8244_v22, %v7123_v31  ;;  %v8229_v23 = vld [vmem:[#allocation5 + $0x2fc] sm:$0xf] }
 0x24a   :  { %v8147_v47 = vld [vmem:[#allocation5 + $0x68] sm:$0xf0]  ;;  %v7066_v12 = vor.u32 %v8229_v23, %v7063_v7  ;;  %v8317_v7 = vld [vmem:[#allocation5 + $0x5b8] sm:$0xf0] }
 0x24b   :  { %4635 = vmatpush.bf16.msrb.mxu0 %v7402_v39  ;;  %v8152_v39 = vld [vmem:[#allocation5 + $0x90] sm:$0xf0] }
 0x24c   :  { %v6750_v44 = vor.u32 %v8152_v39, %v6749_v62 }
 0x24d   :  { %4676 = vmatpush.bf16.msrb.mxu3 %v6726_v0  ;;  %4715 = vmatpush.bf16.msra.mxu1 %v7206_v40  ;;  %v7143_v0 = vld [vmem:[#allocation5 + $0x3ac] sm:$0xf0]  ;;  %v2774_v40 = vperm.slane %v9043_v27, 3 }
 0x24e   :  { %v7146_v2 = vor.u32 %v8249_v11, %v7143_v0  ;;  %v8226_v0 = vld [vmem:[#allocation5 + $0x2e0] sm:$0xf0] }
 0x24f   :  { %4636 = vmatpush.bf16.msrb.mxu0 %v7382_v37  ;;  %v7042_v30 = vor.u32 %v8226_v0, %v7041_v16 }
 0x251   :  { %4677 = vmatpush.bf16.msrb.mxu3 %v6706_v43  ;;  %4716 = vmatpush.bf16.msra.mxu1 %v7186_v33  ;;  %v6770_v43 = vor.u32 %v8157_v24, %v6769_v26  ;;  %v2775_v33 = vperm.slane %v9043_v27, 4  ;;  %v7469_v26 = vld [vmem:[#allocation5 + $0x620] sm:$0xf]  ;;  %v8332_v24 = vld [vmem:[#allocation5 + $0x630] sm:$0xf0] }
 0x252   :  { %v7470_v39 = vor.u32 %v8332_v24, %v7469_v26  ;;  %v8294_v26 = vld [vmem:[#allocation5 + $0x504] sm:$0xf]  ;;  %v7323_v24 = vld [vmem:[#allocation5 + $0x514] sm:$0xf0] }
 0x253   :  { %4637 = vmatpush.bf16.msrb.mxu0 %v7362_v52  ;;  %v8329_v52 = vld [vmem:[#allocation5 + $0x61c] sm:$0xf]  ;;  %v2922_v19 = vadd.f32 %v2921_v56, %v2775_v33  ;;  %v7002_v56 = vor.u32 %v8216_v45, %v7001_v46  ;;  %v7329_v46 = vld [vmem:[#allocation5 + $0x508] sm:$0xf] }
 0x254   :  { %v8297_v45 = vld [vmem:[#allocation5 + $0x518] sm:$0xf0] }
 0x255   :  { %4678 = vmatpush.bf16.msrb.mxu3 %v6686_v41  ;;  %4717 = vmatpush.bf16.msra.mxu1 %v7166_v57  ;;  %v7106_v41 = vor.u32 %v8239_v21, %v7103_v17  ;;  %v6709_v57 = vld [vmem:[#allocation5 + $0x30] sm:$0xf]  ;;  %v2955_v3 = vmax.f32 %v2922_v19, 0.0  ;;  %v8219_v21 = vld [vmem:[#allocation5 + $0x2ac] sm:$0xf] }
 0x256   :  { %v6710_v13 = vor.u32 %v8142_v60, %v6709_v57  ;;  %v7023_v17 = vld [vmem:[#allocation5 + $0x2bc] sm:$0xf0]  ;;  %v7661_v57 = vld [vmem:[#allocation5 + $0x7a8] sm:$0xf]  ;;  %v8381_v19 = vld [vmem:[#allocation5 + $0x7b8] sm:$0xf0] }
 0x257   :  { %4638 = vmatpush.bf16.msrb.mxu0 %v7342_v63  ;;  %v7466_v63 = vor.u32 %v8329_v52, %v7463_v53  ;;  %v9063_v11 = vpack.c.bf16 %v2955_v3, %v2955_v3  ;;  %v7429_v52 = vld [vmem:[#allocation5 + $0x5d0] sm:$0xf]  ;;  %v8322_v53 = vld [vmem:[#allocation5 + $0x5e0] sm:$0xf0]  ;;  %v8304_v60 = vld [vmem:[#allocation5 + $0x554] sm:$0xf] }
 0x258   :  { %v7430_v23 = vor.u32 %v8322_v53, %v7429_v52  ;;  %v6929_v53 = vld [vmem:[#allocation5 + $0x1e8] sm:$0xf] }
 0x259   :  { %v9054_v1 = vpop.f32.mrf.mxu0  ;;  %4762 = vmatpush.bf16.msrb.mxu1 %v6830_v14  ;;  %v6730_v14 = vor.u32 %v8147_v47, %v6729_v42  ;;  %v8327_v42 = vld [vmem:[#allocation5 + $0x608] sm:$0xf0]  ;;  %v7026_v47 = vor.u32 %v8219_v21, %v7023_v17  ;;  %v7326_v21 = vor.u32 %v8294_v26, %v7323_v24  ;;  %v7349_v17 = vld [vmem:[#allocation5 + $0x530] sm:$0xf] }
 0x25b   :  { %4639 = vmatpush.bf16.msrb.mxu0 %v7322_v6  ;;  %v7443_v6 = vld [vmem:[#allocation5 + $0x604] sm:$0xf0] }
 0x25d   :  { %4763 = vmatpush.bf16.msrb.mxu1 %v6810_v4  ;;  %v7062_v4 = vor.u32 %v8231_v36, %v7061_v61  ;;  %v7363_v61 = vld [vmem:[#allocation5 + $0x564] sm:$0xf0]  ;;  %v7386_v36 = vor.u32 %v8309_v50, %v7383_v51  ;;  %v7330_v50 = vor.u32 %v8297_v45, %v7329_v46  ;;  %v8177_v45 = vld [vmem:[#allocation5 + $0x158] sm:$0xf0] }
 0x25e   :  { %4640 = vmatmul.bf16.vlgmr.msrb.gmra.mxu0 %v9063_v11  ;;  %v7366_v0 = vor.u32 %v8304_v60, %v7363_v61  ;;  %v6909_v61 = vld [vmem:[#allocation5 + $0x1c0] sm:$0xf]  ;;  %v6849_v46 = vld [vmem:[#allocation5 + $0x148] sm:$0xf] }
 0x25f   :  { %4697 = vmatpush.bf16.msra.mxu0 %v7146_v2  ;;  %v8224_v2 = vld [vmem:[#allocation5 + $0x2d4] sm:$0xf]  ;;  %4610 = vmatpush.bf16.msra.mxu2 %v7062_v4 }
 0x260   :  { %v7046_v31 = vor.u32 %v8224_v2, %v7043_v8  ;;  %v8376_v4 = vld [vmem:[#allocation5 + $0x790] sm:$0xf0] }
 0x261   :  { %v2738_v25 = vpop.f32.mrf.mxu0  ;;  %4764 = vmatpush.bf16.msrb.mxu1 %v6790_v35  ;;  %v7446_v35 = vor.u32 %v8324_v54, %v7443_v6  ;;  %v7409_v54 = vld [vmem:[#allocation5 + $0x5a8] sm:$0xf]  ;;  %v7641_v6 = vld [vmem:[#allocation5 + $0x780] sm:$0xf]  ;;  %v8312_v8 = vld [vmem:[#allocation5 + $0x590] sm:$0xf0] }
 0x262   :  { %v7423_v25 = vld [vmem:[#allocation5 + $0x5dc] sm:$0xf0]  ;;  %v7410_v2 = vor.u32 %v8317_v7, %v7409_v54  ;;  %v8209_v54 = vld [vmem:[#allocation5 + $0x25c] sm:$0xf] }
 0x263   :  { %4698 = vmatpush.bf16.msra.mxu0 %v7126_v32  ;;  %v2923_v32 = vpop.f32.mrf.mxu1  ;;  %v7426_v62 = vor.u32 %v8319_v20, %v7423_v25  ;;  %4611 = vmatpush.bf16.msra.mxu2 %v7042_v30  ;;  %v7389_v20 = vld [vmem:[#allocation5 + $0x580] sm:$0xf]  ;;  %v7369_v30 = vld [vmem:[#allocation5 + $0x558] sm:$0xf] }
 0x264   :  { %v7390_v25 = vor.u32 %v8312_v8, %v7389_v20  ;;  %v6989_v32 = vld [vmem:[#allocation5 + $0x260] sm:$0xf] }
 0x265   :  { %4765 = vmatpush.bf16.msrb.mxu1 %v6770_v43  ;;  %v6690_v43 = vor.u32 %v8137_v18, %v6689_v5  ;;  %v8374_v5 = vld [vmem:[#allocation5 + $0x784] sm:$0xf]  ;;  %v7343_v18 = vld [vmem:[#allocation5 + $0x53c] sm:$0xf0] }
 0x267   :  { %4699 = vmatpush.bf16.msra.mxu0 %v7106_v41  ;;  %v7449_v41 = vld [vmem:[#allocation5 + $0x5f8] sm:$0xf] }
 0x268   :  { %v7450_v48 = vor.u32 %v8327_v42, %v7449_v41  ;;  %v6969_v41 = vld [vmem:[#allocation5 + $0x238] sm:$0xf]  ;;  %v8207_v42 = vld [vmem:[#allocation5 + $0x248] sm:$0xf0] }
 0x269   :  { %v2908_v37 = vpop.f32.mrf.mxu0  ;;  %4766 = vmatpush.bf16.msrb.mxu1 %v6750_v44  ;;  %v7022_v44 = vor.u32 %v8221_v38, %v7021_v34  ;;  %v2737_v34 = vadd.f32 %v9054_v1, %v9038_v9  ;;  %v6949_v9 = vld [vmem:[#allocation5 + $0x210] sm:$0xf]  ;;  %v8202_v1 = vld [vmem:[#allocation5 + $0x220] sm:$0xf0] }
 0x26a   :  { %v2909_v28 = vadd.f32 %v2908_v37, %v2774_v40  ;;  %v7403_v40 = vld [vmem:[#allocation5 + $0x5b4] sm:$0xf0]  ;;  %v8214_v37 = vld [vmem:[#allocation5 + $0x284] sm:$0xf] }
 0x26b   :  { %4700 = vmatpush.bf16.msra.mxu0 %v7086_v10  ;;  %v7406_v33 = vor.u32 %v8314_v29, %v7403_v40  ;;  %4612 = vmatpush.bf16.msra.mxu2 %v7022_v44  ;;  %v8302_v40 = vld [vmem:[#allocation5 + $0x540] sm:$0xf0] }
 0x26c   :  { %v2954_v59 = vmax.f32 %v2909_v28, 0.0  ;;  %v7003_v28 = vld [vmem:[#allocation5 + $0x294] sm:$0xf0]  ;;  %v7350_v44 = vor.u32 %v8302_v40, %v7349_v17  ;;  %v8199_v17 = vld [vmem:[#allocation5 + $0x20c] sm:$0xf] }
 0x26d   :  { %4767 = vmatpush.bf16.msrb.mxu1 %v6730_v14  ;;  %v7006_v10 = vor.u32 %v8214_v37, %v7003_v28  ;;  %v7663_v14 = vld [vmem:[#allocation5 + $0x7bc] sm:$0xf0]  ;;  %v8250_v37 = vld [vmem:[#allocation5 + $0x3a4] sm:$0xf]  ;;  %v6950_v28 = vor.u32 %v8202_v1, %v6949_v9  ;;  %v8225_v9 = vld [vmem:[#allocation5 + $0x2dc] sm:$0xf] }
 0x26e   :  { %v9061_v55 = vpack.c.bf16 %v2954_v59, %v2954_v59  ;;  %v8379_v59 = vld [vmem:[#allocation5 + $0x7ac] sm:$0xf]  ;;  %v6943_v40 = vld [vmem:[#allocation5 + $0x21c] sm:$0xf0]  ;;  %v7051_v1 = vld [vmem:[#allocation5 + $0x2ec] sm:$0xf0] }
 0x26f   :  { %4701 = vmatpush.bf16.msra.mxu0 %v7066_v12  ;;  %v7666_v3 = vor.u32 %v8379_v59, %v7663_v14  ;;  %4613 = vmatpush.bf16.msra.mxu2 %v7002_v56  ;;  %v7643_v12 = vld [vmem:[#allocation5 + $0x794] sm:$0xf0]  ;;  %v8197_v56 = vld [vmem:[#allocation5 + $0x1f8] sm:$0xf0]  ;;  %v2773_v59 = vperm.slane %v9043_v27, 2 }
 0x270   :  { %4627 = vmatmul.bf16.vlgmr.msra.gmra.mxu3 %v9061_v55  ;;  %4718 = vmatmul.bf16.vlgmr.msra.gmra.mxu1 %v9061_v55  ;;  %v7646_v16 = vor.u32 %v8374_v5, %v7643_v12  ;;  %v6930_v14 = vor.u32 %v8197_v56, %v6929_v53  ;;  %v7149_v12 = vld [vmem:[#allocation5 + $0x3a0] sm:$0xf]  ;;  %v7054_v53 = vor.u32 %v8225_v9, %v7051_v1  ;;  %v6923_v56 = vld [vmem:[#allocation5 + $0x1f4] sm:$0xf0] }
 0x271   :  { %4723 = vmatpush.bf16.msra.mxu3 %v7466_v63  ;;  %v2910_v22 = vpop.f32.mrf.mxu0  ;;  %4768 = vmatpush.bf16.msrb.mxu1 %v6710_v13  ;;  %v7662_v63 = vor.u32 %v8381_v19, %v7661_v57  ;;  %v7642_v13 = vor.u32 %v8376_v4, %v7641_v6  ;;  %v7131_v57 = vld [vmem:[#allocation5 + $0x38c] sm:$0xf0] }
 0x272   :  { %v6983_v6 = vld [vmem:[#allocation5 + $0x26c] sm:$0xf0] }
 0x273   :  { %4702 = vmatpush.bf16.msra.mxu0 %v7046_v31  ;;  %4664 = vmatpush.bf16.msrb.mxu2 %v7662_v63  ;;  %v8307_v31 = vld [vmem:[#allocation5 + $0x568] sm:$0xf0]  ;;  %v8192_v63 = vld [vmem:[#allocation5 + $0x1d0] sm:$0xf0]  ;;  %v6986_v20 = vor.u32 %v8209_v54, %v6983_v6 }
 0x274   :  { %v6910_v7 = vor.u32 %v8192_v63, %v6909_v61  ;;  %v8367_v61 = vld [vmem:[#allocation5 + $0x748] sm:$0xf0] }
 0x275   :  { %4724 = vmatpush.bf16.msra.mxu3 %v7446_v35  ;;  %4769 = vmatpush.bf16.msrb.mxu1 %v6690_v43  ;;  %v8299_v35 = vld [vmem:[#allocation5 + $0x52c] sm:$0xf]  ;;  %v8212_v43 = vld [vmem:[#allocation5 + $0x270] sm:$0xf0] }
 0x276   :  { %v7346_v22 = vor.u32 %v8299_v35, %v7343_v18  ;;  %v6990_v29 = vor.u32 %v8212_v43, %v6989_v32  ;;  %v7091_v35 = vld [vmem:[#allocation5 + $0x33c] sm:$0xf0]  ;;  %v8247_v32 = vld [vmem:[#allocation5 + $0x388] sm:$0xf0]  ;;  %v6869_v43 = vld [vmem:[#allocation5 + $0x170] sm:$0xf] }
 0x277   :  { %4703 = vmatpush.bf16.msra.mxu0 %v7026_v47  ;;  %4665 = vmatpush.bf16.msrb.mxu2 %v7642_v13  ;;  %v6970_v47 = vor.u32 %v8207_v42, %v6969_v41  ;;  %v8252_v13 = vld [vmem:[#allocation5 + $0x3b0] sm:$0xf0] }
 0x278   :  { %v7150_v8 = vor.u32 %v8252_v13, %v7149_v12  ;;  %v7011_v13 = vld [vmem:[#allocation5 + $0x29c] sm:$0xf0] }
 0x279   :  { %4725 = vmatpush.bf16.msra.mxu3 %v7426_v62  ;;  %4814 = vmatpush.bf16.msra.mxu1 %v7470_v39  ;;  %v7370_v62 = vor.u32 %v8307_v31, %v7369_v30  ;;  %v7129_v31 = vld [vmem:[#allocation5 + $0x378] sm:$0xf] }
 0x27b   :  { %4704 = vmatpush.bf16.msra.mxu0 %v7006_v10  ;;  %v8245_v10 = vld [vmem:[#allocation5 + $0x37c] sm:$0xf] }
 0x27c   :  { %v7134_v60 = vor.u32 %v8245_v10, %v7131_v57  ;;  %v7089_v10 = vld [vmem:[#allocation5 + $0x328] sm:$0xf]  ;;  %v8237_v57 = vld [vmem:[#allocation5 + $0x338] sm:$0xf0] }
 0x27d   :  { %4726 = vmatpush.bf16.msra.mxu3 %v7406_v33  ;;  %4815 = vmatpush.bf16.msra.mxu1 %v7450_v48  ;;  %v7151_v33 = vld [vmem:[#allocation5 + $0x3b4] sm:$0xf0] }
 0x27e   :  { %v7154_v52 = vor.u32 %v8250_v37, %v7151_v33  ;;  %v7629_v37 = vld [vmem:[#allocation5 + $0x760] sm:$0xf]  ;;  %v8372_v33 = vld [vmem:[#allocation5 + $0x770] sm:$0xf0] }
 0x27f   :  { %4755 = vmatpush.bf16.msrb.mxu0 %v7666_v3  ;;  %v8240_v3 = vld [vmem:[#allocation5 + $0x354] sm:$0xf] }
 0x280   :  { %4679 = vmatmul.bf16.vlgmr.msrb.gmra.mxu3 %v9056_v15  ;;  %4770 = vmatmul.bf16.vlgmr.msrb.gmra.mxu1 %v9056_v15 }
 0x281   :  { %4727 = vmatpush.bf16.msra.mxu3 %v7386_v36  ;;  %4816 = vmatpush.bf16.msra.mxu1 %v7430_v23  ;;  %v7111_v36 = vld [vmem:[#allocation5 + $0x364] sm:$0xf0] }
 0x282   :  { %v7114_v5 = vor.u32 %v8240_v3, %v7111_v36  ;;  %v7090_v36 = vor.u32 %v8237_v57, %v7089_v10  ;;  %v7009_v10 = vld [vmem:[#allocation5 + $0x288] sm:$0xf]  ;;  %v8217_v57 = vld [vmem:[#allocation5 + $0x298] sm:$0xf0] }
 0x283   :  { %4756 = vmatpush.bf16.msrb.mxu0 %v7646_v16  ;;  %v6889_v16 = vld [vmem:[#allocation5 + $0x198] sm:$0xf] }
 0x285   :  { %4728 = vmatpush.bf16.msra.mxu3 %v7366_v0  ;;  %4817 = vmatpush.bf16.msra.mxu1 %v7410_v2  ;;  %v8187_v0 = vld [vmem:[#allocation5 + $0x1a8] sm:$0xf0] }
 0x286   :  { %v8235_v2 = vld [vmem:[#allocation5 + $0x32c] sm:$0xf]  ;;  %v6890_v24 = vor.u32 %v8187_v0, %v6889_v16  ;;  %v7589_v16 = vld [vmem:[#allocation5 + $0x710] sm:$0xf]  ;;  %v8362_v0 = vld [vmem:[#allocation5 + $0x720] sm:$0xf0] }
 0x287   :  { %v7094_v30 = vor.u32 %v8235_v2, %v7091_v35  ;;  %v8380_v35 = vld [vmem:[#allocation5 + $0x7b4] sm:$0xf] }
 0x289   :  { %4729 = vmatpush.bf16.msra.mxu3 %v7346_v22  ;;  %4818 = vmatpush.bf16.msra.mxu1 %v7390_v25  ;;  %v8204_v22 = vld [vmem:[#allocation5 + $0x234] sm:$0xf]  ;;  %v6963_v25 = vld [vmem:[#allocation5 + $0x244] sm:$0xf0] }
 0x28b   :  { %v2749_v38 = vpop.f32.mrf.mxu3 }
 0x28c   :  { %v2750_v39 = vadd.f32 %v2749_v38, %v2737_v34  ;;  %v8182_v34 = vld [vmem:[#allocation5 + $0x180] sm:$0xf0] }
 0x28d   :  { %4730 = vmatpush.bf16.msra.mxu3 %v7326_v21  ;;  %4819 = vmatpush.bf16.msra.mxu1 %v7370_v62  ;;  %v8230_v38 = vld [vmem:[#allocation5 + $0x304] sm:$0xf]  ;;  %v7071_v21 = vld [vmem:[#allocation5 + $0x314] sm:$0xf0]  ;;  %v6870_v41 = vor.u32 %v8182_v34, %v6869_v43  ;;  %v7590_v43 = vor.u32 %v8362_v0, %v7589_v16  ;;  %v7649_v16 = vld [vmem:[#allocation5 + $0x788] sm:$0xf] }
 0x28e   :  { %8429 = vtanh.f32 %v2750_v39  ;;  %v6966_v39 = vor.u32 %v8204_v22, %v6963_v25  ;;  %v7074_v42 = vor.u32 %v8230_v38, %v7071_v21  ;;  %v8184_v22 = vld [vmem:[#allocation5 + $0x194] sm:$0xf]  ;;  %v7569_v38 = vld [vmem:[#allocation5 + $0x6e8] sm:$0xf]  ;;  %v8357_v21 = vld [vmem:[#allocation5 + $0x6f8] sm:$0xf0] }
 0x28f   :  { %v7570_v9 = vor.u32 %v8357_v21, %v7569_v38  ;;  %v8377_v0 = vld [vmem:[#allocation5 + $0x798] sm:$0xf0]  ;;  %v7583_v38 = vld [vmem:[#allocation5 + $0x71c] sm:$0xf0] }
 0x290   :  { %4731 = vmatmul.bf16.vlgmr.msra.gmra.mxu3 %v9063_v11  ;;  %v8205_v21 = vld [vmem:[#allocation5 + $0x23c] sm:$0xf] }
 0x291   :  { %4775 = vmatpush.bf16.msrb.mxu3 %v6990_v29  ;;  %4820 = vmatpush.bf16.msra.mxu1 %v7350_v44  ;;  %v7130_v29 = vor.u32 %v8247_v32, %v7129_v31  ;;  %v7109_v44 = vld [vmem:[#allocation5 + $0x350] sm:$0xf]  ;;  %v7049_v31 = vld [vmem:[#allocation5 + $0x2d8] sm:$0xf]  ;;  %v8227_v32 = vld [vmem:[#allocation5 + $0x2e8] sm:$0xf0] }
 0x293   :  { %v2751_v48 = vpop.f32.mrf.mxu3 }
 0x294   :  { %v8430_v51 = vpop.eup %8429  ;;  %v6946_v48 = vor.u32 %v8199_v17, %v6943_v40  ;;  %v7050_v17 = vor.u32 %v8227_v32, %v7049_v31  ;;  %v8198_v31 = vld [vmem:[#allocation5 + $0x200] sm:$0xf0] }
 0x295   :  { %4776 = vmatpush.bf16.msrb.mxu3 %v6970_v47  ;;  %v2754_v19 = vmul.f32 2.0, %v8430_v51  ;;  %4821 = vmatpush.bf16.msra.mxu1 %v7330_v50  ;;  %v8242_v47 = vld [vmem:[#allocation5 + $0x360] sm:$0xf0]  ;;  %v2777_v51 = vperm.slane %v9043_v27, 6  ;;  %v6903_v27 = vld [vmem:[#allocation5 + $0x1cc] sm:$0xf0] }
 0x296   :  { %v7110_v50 = vor.u32 %v8242_v47, %v7109_v44  ;;  %v8213_v44 = vld [vmem:[#allocation5 + $0x278] sm:$0xf0]  ;;  %v6863_v47 = vld [vmem:[#allocation5 + $0x17c] sm:$0xf0] }
 0x297   :  { %2756 = vst.msk [vmem:[#allocation7] sm:$0xff] %vm2755_vm4, %v2754_v19  ;;  %v7630_v19 = vor.u32 %v8372_v33, %v7629_v37  ;;  %v7549_v33 = vld [vmem:[#allocation5 + $0x6c0] sm:$0xf] }
 0x298   :  { %4822 = vmatmul.bf16.vlgmr.msra.gmra.mxu1 %v9063_v11 }
 0x299   :  { %4777 = vmatpush.bf16.msrb.mxu3 %v6950_v28  ;;  %4879 = vmatpush.bf16.msrb.mxu1 %v7154_v52  ;;  %v8194_v28 = vld [vmem:[#allocation5 + $0x1e4] sm:$0xf]  ;;  %v6850_v52 = vor.u32 %v8177_v45, %v6849_v46  ;;  %v7029_v46 = vld [vmem:[#allocation5 + $0x2b0] sm:$0xf] }
 0x29a   :  { %v6926_v3 = vor.u32 %v8194_v28, %v6923_v56  ;;  %v8222_v45 = vld [vmem:[#allocation5 + $0x2c0] sm:$0xf0]  ;;  %v8208_v56 = vld [vmem:[#allocation5 + $0x250] sm:$0xf0] }
 0x29b   :  { %v2895_v23 = vpop.f32.mrf.mxu3  ;;  %v7030_v28 = vor.u32 %v8222_v45, %v7029_v46 }
 0x29c   :  { %v2896_v4 = vadd.f32 %v2895_v23, %v2773_v59  ;;  %v8220_v59 = vld [vmem:[#allocation5 + $0x2b4] sm:$0xf]  ;;  %v8189_v23 = vld [vmem:[#allocation5 + $0x1bc] sm:$0xf] }
 0x29d   :  { %4778 = vmatpush.bf16.msrb.mxu3 %v6930_v14  ;;  %4880 = vmatpush.bf16.msrb.mxu1 %v7134_v60  ;;  %v7031_v14 = vld [vmem:[#allocation5 + $0x2c4] sm:$0xf0]  ;;  %v7609_v60 = vld [vmem:[#allocation5 + $0x738] sm:$0xf] }
 0x29e   :  { %v2953_v18 = vmax.f32 %v2896_v4, 0.0  ;;  %v7034_v6 = vor.u32 %v8220_v59, %v7031_v14  ;;  %v7069_v4 = vld [vmem:[#allocation5 + $0x300] sm:$0xf]  ;;  %v7610_v12 = vor.u32 %v8367_v61, %v7609_v60  ;;  %v7623_v14 = vld [vmem:[#allocation5 + $0x76c] sm:$0xf0] }
 0x29f   :  { %v7669_v60 = vld [vmem:[#allocation5 + $0x7b0] sm:$0xf]  ;;  %v8382_v61 = vld [vmem:[#allocation5 + $0x7c0] sm:$0xf0] }
 0x2a0   :  { %v9076_v26 = vpack.c.bf16 %v2953_v18, %v2953_v18  ;;  %v7671_v18 = vld [vmem:[#allocation5 + $0x7c4] sm:$0xf0] }
 0x2a1   :  { %4779 = vmatpush.bf16.msrb.mxu3 %v6910_v7  ;;  %4881 = vmatpush.bf16.msrb.mxu1 %v7114_v5  ;;  %v8232_v7 = vld [vmem:[#allocation5 + $0x310] sm:$0xf0]  ;;  %v8215_v5 = vld [vmem:[#allocation5 + $0x28c] sm:$0xf]  ;;  %v7674_v34 = vor.u32 %v8380_v35, %v7671_v18  ;;  %v6991_v35 = vld [vmem:[#allocation5 + $0x274] sm:$0xf0] }
 0x2a2   :  { %4614 = vmatmul.bf16.vlgmr.msra.gmra.mxu2 %v9076_v26  ;;  %4705 = vmatmul.bf16.vlgmr.msra.gmra.mxu0 %v9076_v26  ;;  %v7509_v18 = vld [vmem:[#allocation5 + $0x670] sm:$0xf] }
 0x2a3   :  { %4684 = vmatpush.bf16.msra.mxu2 %v6986_v20  ;;  %4788 = vmatpush.bf16.msra.mxu0 %v7150_v8  ;;  %v2897_v62 = vpop.f32.mrf.mxu3  ;;  %v6906_v20 = vor.u32 %v8189_v23, %v6903_v27  ;;  %v7070_v8 = vor.u32 %v8232_v7, %v7069_v4  ;;  %v7010_v27 = vor.u32 %v8217_v57, %v7009_v10  ;;  %v8203_v7 = vld [vmem:[#allocation5 + $0x228] sm:$0xf0]  ;;  %v8188_v10 = vld [vmem:[#allocation5 + $0x1b0] sm:$0xf0] }
 0x2a4   :  { %v8375_v62 = vld [vmem:[#allocation5 + $0x78c] sm:$0xf]  ;;  %v7670_v4 = vor.u32 %v8382_v61, %v7669_v60  ;;  %v6931_v61 = vld [vmem:[#allocation5 + $0x1fc] sm:$0xf0] }
 0x2a5   :  { %4780 = vmatpush.bf16.msrb.mxu3 %v6890_v24  ;;  %4882 = vmatpush.bf16.msrb.mxu1 %v7094_v30  ;;  %v7014_v24 = vor.u32 %v8215_v5, %v7011_v13  ;;  %v6883_v30 = vld [vmem:[#allocation5 + $0x1a4] sm:$0xf0]  ;;  %v8364_v5 = vld [vmem:[#allocation5 + $0x734] sm:$0xf]  ;;  %v8195_v60 = vld [vmem:[#allocation5 + $0x1ec] sm:$0xf] }
 0x2a7   :  { %4685 = vmatpush.bf16.msra.mxu2 %v6966_v39  ;;  %4789 = vmatpush.bf16.msra.mxu0 %v7130_v29  ;;  %v7651_v39 = vld [vmem:[#allocation5 + $0x79c] sm:$0xf0]  ;;  %v6886_v29 = vor.u32 %v8184_v22, %v6883_v30  ;;  %v6937_v30 = vld [vmem:[#allocation5 + $0x1f0] sm:$0xf] }
 0x2a8   :  { %v7654_v1 = vor.u32 %v8375_v62, %v7651_v39  ;;  %v6971_v62 = vld [vmem:[#allocation5 + $0x24c] sm:$0xf0]  ;;  %v7489_v39 = vld [vmem:[#allocation5 + $0x648] sm:$0xf] }
 0x2a9   :  { %4781 = vmatpush.bf16.msrb.mxu3 %v6870_v41  ;;  %4883 = vmatpush.bf16.msrb.mxu1 %v7074_v42  ;;  %v8179_v41 = vld [vmem:[#allocation5 + $0x16c] sm:$0xf]  ;;  %v6997_v42 = vld [vmem:[#allocation5 + $0x268] sm:$0xf]  ;;  %v6974_v45 = vor.u32 %v8205_v21, %v6971_v62  ;;  %v8270_v62 = vld [vmem:[#allocation5 + $0x444] sm:$0xf] }
 0x2aa   :  { %v6998_v37 = vor.u32 %v8213_v44, %v6997_v42  ;;  %v6917_v44 = vld [vmem:[#allocation5 + $0x1c8] sm:$0xf] }
 0x2ab   :  { %4686 = vmatpush.bf16.msra.mxu2 %v6946_v48  ;;  %4790 = vmatpush.bf16.msra.mxu0 %v7110_v50  ;;  %v2947_v63 = vpop.f32.mrf.mxu3  ;;  %v8352_v48 = vld [vmem:[#allocation5 + $0x6d0] sm:$0xf0]  ;;  %v8174_v50 = vld [vmem:[#allocation5 + $0x144] sm:$0xf] }
 0x2ac   :  { %v2948_v54 = vadd.f32 %v2947_v63, %v2777_v51  ;;  %v6866_v51 = vor.u32 %v8179_v41, %v6863_v47  ;;  %v7550_v59 = vor.u32 %v8352_v48, %v7549_v33  ;;  %v7311_v41 = vld [vmem:[#allocation5 + $0x4f4] sm:$0xf0]  ;;  %v8193_v47 = vld [vmem:[#allocation5 + $0x1d8] sm:$0xf0]  ;;  %v8200_v48 = vld [vmem:[#allocation5 + $0x214] sm:$0xf] }
 0x2ad   :  { %4782 = vmatpush.bf16.msrb.mxu3 %v6850_v52  ;;  %4884 = vmatpush.bf16.msrb.mxu1 %v7054_v53  ;;  %v6843_v52 = vld [vmem:[#allocation5 + $0x154] sm:$0xf0]  ;;  %v6977_v53 = vld [vmem:[#allocation5 + $0x240] sm:$0xf] }
 0x2ae   :  { %v2957_v2 = vmax.f32 %v2948_v54, 0.0  ;;  %v6978_v63 = vor.u32 %v8208_v56, %v6977_v53  ;;  %v6846_v23 = vor.u32 %v8174_v50, %v6843_v52  ;;  %v6957_v54 = vld [vmem:[#allocation5 + $0x218] sm:$0xf]  ;;  %v6951_v50 = vld [vmem:[#allocation5 + $0x224] sm:$0xf0] }
 0x2af   :  { %4687 = vmatpush.bf16.msra.mxu2 %v6926_v3  ;;  %4791 = vmatpush.bf16.msra.mxu0 %v7090_v36  ;;  %v7529_v3 = vld [vmem:[#allocation5 + $0x698] sm:$0xf]  ;;  %v8347_v36 = vld [vmem:[#allocation5 + $0x6a8] sm:$0xf0]  ;;  %v7291_v52 = vld [vmem:[#allocation5 + $0x4cc] sm:$0xf0]  ;;  %v6954_v57 = vor.u32 %v8200_v48, %v6951_v50 }
 0x2b0   :  { %v9081_v25 = vpack.c.bf16 %v2957_v2, %v2957_v2  ;;  %4783 = vmatmul.bf16.vlgmr.msrb.gmra.mxu3 %v9046_v49  ;;  %v7530_v13 = vor.u32 %v8347_v36, %v7529_v3  ;;  %v8210_v2 = vld [vmem:[#allocation5 + $0x264] sm:$0xf]  ;;  %v6897_v56 = vld [vmem:[#allocation5 + $0x1a0] sm:$0xf]  ;;  %v8280_v3 = vld [vmem:[#allocation5 + $0x494] sm:$0xf] }
 0x2b1   :  { %4827 = vmatpush.bf16.msra.mxu3 %v7630_v19  ;;  %4885 = vmatpush.bf16.msrb.mxu1 %v7034_v6  ;;  %v8369_v19 = vld [vmem:[#allocation5 + $0x75c] sm:$0xf]  ;;  %v6994_v32 = vor.u32 %v8210_v2, %v6991_v35  ;;  %v7271_v36 = vld [vmem:[#allocation5 + $0x4a4] sm:$0xf0]  ;;  %v8275_v2 = vld [vmem:[#allocation5 + $0x46c] sm:$0xf] }
 0x2b2   :  { %7679 = vmatmul.msk.bf16.vlgmr.msrb.gmra.mxu2 %vm1908_vm2, %v9081_v25  ;;  %7680 = vmatmul.msk.bf16.vlgmr.msrb.gmra.mxu0 %vm1908_vm2, %v9081_v25  ;;  %v7626_v6 = vor.u32 %v8369_v19, %v7623_v14  ;;  %v8349_v19 = vld [vmem:[#allocation5 + $0x6bc] sm:$0xf]  ;;  %v7251_v35 = vld [vmem:[#allocation5 + $0x47c] sm:$0xf0]  ;;  %v6871_v48 = vld [vmem:[#allocation5 + $0x184] sm:$0xf0] }
 0x2b3   :  { %4688 = vmatpush.bf16.msra.mxu2 %v6906_v20  ;;  %4792 = vmatpush.bf16.msra.mxu0 %v7070_v8  ;;  %v2949_v40 = vpop.f32.mrf.mxu3  ;;  %v8342_v20 = vld [vmem:[#allocation5 + $0x680] sm:$0xf0]  ;;  %v6958_v8 = vor.u32 %v8203_v7, %v6957_v54  ;;  %v8183_v54 = vld [vmem:[#allocation5 + $0x188] sm:$0xf0]  ;;  %v8344_v7 = vld [vmem:[#allocation5 + $0x694] sm:$0xf] }
 0x2b4   :  { %v8290_v40 = vld [vmem:[#allocation5 + $0x4e4] sm:$0xf]  ;;  %v8265_v50 = vld [vmem:[#allocation5 + $0x41c] sm:$0xf] }
 0x2b5   :  { %4828 = vmatpush.bf16.msra.mxu3 %v7610_v12  ;;  %4886 = vmatpush.bf16.msrb.mxu1 %v7014_v24  ;;  %v7603_v12 = vld [vmem:[#allocation5 + $0x744] sm:$0xf0]  ;;  %v7650_v24 = vor.u32 %v8377_v0, %v7649_v16  ;;  %v9091_v46 = vpop.f32.mrf.mxu1  ;;  %v7314_v33 = vor.u32 %v8290_v40, %v7311_v41  ;;  %v6911_v16 = vld [vmem:[#allocation5 + $0x1d4] sm:$0xf0]  ;;  %v8334_v40 = vld [vmem:[#allocation5 + $0x644] sm:$0xf] }
 0x2b6   :  { %v7606_v22 = vor.u32 %v8364_v5, %v7603_v12  ;;  %v7523_v5 = vld [vmem:[#allocation5 + $0x6a4] sm:$0xf0]  ;;  %v7274_v12 = vor.u32 %v8280_v3, %v7271_v36  ;;  %v7483_v41 = vld [vmem:[#allocation5 + $0x654] sm:$0xf0]  ;;  %v8260_v36 = vld [vmem:[#allocation5 + $0x3f4] sm:$0xf] }
 0x2b7   :  { %4689 = vmatpush.bf16.msra.mxu2 %v6886_v29  ;;  %4793 = vmatpush.bf16.msra.mxu0 %v7050_v17  ;;  %v8337_v29 = vld [vmem:[#allocation5 + $0x658] sm:$0xf0]  ;;  %v6938_v17 = vor.u32 %v8198_v31, %v6937_v30  ;;  %v7503_v30 = vld [vmem:[#allocation5 + $0x67c] sm:$0xf0]  ;;  %v7637_v31 = vld [vmem:[#allocation5 + $0x768] sm:$0xf] }
 0x2b8   :  { %4887 = vmatmul.bf16.vlgmr.msrb.gmra.mxu1 %v9076_v26  ;;  %v7631_v3 = vld [vmem:[#allocation5 + $0x774] sm:$0xf0] }
 0x2b9   :  { %4829 = vmatpush.bf16.msra.mxu3 %v7590_v43  ;;  %4937 = vmatpush.bf16.msra.mxu1 %v7674_v34  ;;  %v7510_v43 = vor.u32 %v8342_v20, %v7509_v18  ;;  %v8359_v34 = vld [vmem:[#allocation5 + $0x70c] sm:$0xf]  ;;  %v7526_v18 = vor.u32 %v8344_v7, %v7523_v5  ;;  %v6857_v20 = vld [vmem:[#allocation5 + $0x150] sm:$0xf]  ;;  %v8358_v5 = vld [vmem:[#allocation5 + $0x700] sm:$0xf0] }
 0x2ba   :  { %v7586_v42 = vor.u32 %v8359_v34, %v7583_v38  ;;  %v8185_v34 = vld [vmem:[#allocation5 + $0x19c] sm:$0xf]  ;;  %v6891_v38 = vld [vmem:[#allocation5 + $0x1ac] sm:$0xf0] }
 0x2bb   :  { %4690 = vmatpush.bf16.msra.mxu2 %v6866_v51  ;;  %4794 = vmatpush.bf16.msra.mxu0 %v7030_v28  ;;  %v6918_v51 = vor.u32 %v8193_v47, %v6917_v44  ;;  %v8285_v28 = vld [vmem:[#allocation5 + $0x4bc] sm:$0xf]  ;;  %v6894_v44 = vor.u32 %v8185_v34, %v6891_v38  ;;  %v7617_v47 = vld [vmem:[#allocation5 + $0x740] sm:$0xf]  ;;  %v7577_v7 = vld [vmem:[#allocation5 + $0x6f0] sm:$0xf] }
 0x2bc   :  { %v7294_v14 = vor.u32 %v8285_v28, %v7291_v52  ;;  %v7486_v28 = vor.u32 %v8334_v40, %v7483_v41  ;;  %v6817_v41 = vld [vmem:[#allocation5 + $0x100] sm:$0xf] }
 0x2bd   :  { %4830 = vmatpush.bf16.msra.mxu3 %v7570_v9  ;;  %4938 = vmatpush.bf16.msra.mxu1 %v7654_v1  ;;  %v7490_v9 = vor.u32 %v8337_v29, %v7489_v39  ;;  %v8354_v1 = vld [vmem:[#allocation5 + $0x6e4] sm:$0xf]  ;;  %v7231_v39 = vld [vmem:[#allocation5 + $0x454] sm:$0xf0] }
 0x2bf   :  { %4691 = vmatpush.bf16.msra.mxu2 %v6846_v23  ;;  %4795 = vmatpush.bf16.msra.mxu0 %v7010_v27  ;;  %v6877_v27 = vld [vmem:[#allocation5 + $0x178] sm:$0xf] }
 0x2c0   :  { %v6878_v0 = vor.u32 %v8183_v54, %v6877_v27 }
 0x2c1   :  { %4957 = vmatpush.bf16.msrb.mxu1 %v6998_v37  ;;  %4831 = vmatpush.bf16.msra.mxu3 %v7550_v59  ;;  %v7563_v37 = vld [vmem:[#allocation5 + $0x6f4] sm:$0xf0]  ;;  %v7543_v59 = vld [vmem:[#allocation5 + $0x6cc] sm:$0xf0] }
 0x2c2   :  { %4692 = vmatmul.bf16.vlgmr.msra.gmra.mxu2 %v9046_v49  ;;  %4796 = vmatmul.bf16.vlgmr.msra.gmra.mxu0 %v9076_v26  ;;  %v7566_v53 = vor.u32 %v8354_v1, %v7563_v37  ;;  %v7546_v23 = vor.u32 %v8349_v19, %v7543_v59  ;;  %v7234_v1 = vor.u32 %v8270_v62, %v7231_v39  ;;  %v8292_v37 = vld [vmem:[#allocation5 + $0x4f0] sm:$0xf0]  ;;  %v7289_v19 = vld [vmem:[#allocation5 + $0x4b8] sm:$0xf]  ;;  %v8287_v59 = vld [vmem:[#allocation5 + $0x4c8] sm:$0xf0] }
 0x2c3   :  { %4736 = vmatpush.bf16.msrb.mxu2 %v7626_v6  ;;  %4846 = vmatpush.bf16.msrb.mxu0 %v7670_v4  ;;  %v4604_v6 = vpop.f32.mrf.mxu1  ;;  %v6934_v4 = vor.u32 %v8195_v60, %v6931_v61  ;;  %v8175_v60 = vld [vmem:[#allocation5 + $0x14c] sm:$0xf]  ;;  %v6851_v61 = vld [vmem:[#allocation5 + $0x15c] sm:$0xf0]  ;;  %v8277_v62 = vld [vmem:[#allocation5 + $0x478] sm:$0xf0] }
 0x2c4   :  { %v7290_v6 = vor.u32 %v8287_v59, %v7289_v19  ;;  %v7209_v59 = vld [vmem:[#allocation5 + $0x418] sm:$0xf] }
 0x2c5   :  { %4958 = vmatpush.bf16.msrb.mxu1 %v6978_v63  ;;  %4832 = vmatpush.bf16.msra.mxu3 %v7530_v13  ;;  %v6898_v63 = vor.u32 %v8188_v10, %v6897_v56  ;;  %v8190_v13 = vld [vmem:[#allocation5 + $0x1c4] sm:$0xf] }
 0x2c7   :  { %4737 = vmatpush.bf16.msrb.mxu2 %v7606_v22  ;;  %4847 = vmatpush.bf16.msrb.mxu0 %v7650_v24  ;;  %v8339_v22 = vld [vmem:[#allocation5 + $0x66c] sm:$0xf]  ;;  %v6914_v24 = vor.u32 %v8190_v13, %v6911_v16  ;;  %v7269_v16 = vld [vmem:[#allocation5 + $0x490] sm:$0xf] }
 0x2c8   :  { %7682 = vmatmul.msk.bf16.vlgmr.msra.gmra.mxu1 %vm1908_vm2, %v9081_v25  ;;  %v7506_v29 = vor.u32 %v8339_v22, %v7503_v30  ;;  %v7578_v22 = vor.u32 %v8358_v5, %v7577_v7  ;;  %v8173_v30 = vld [vmem:[#allocation5 + $0x138] sm:$0xf0]  ;;  %v7189_v7 = vld [vmem:[#allocation5 + $0x3f0] sm:$0xf]  ;;  %v8262_v5 = vld [vmem:[#allocation5 + $0x400] sm:$0xf0] }
 0x2c9   :  { %4959 = vmatpush.bf16.msrb.mxu1 %v6958_v8  ;;  %4833 = vmatpush.bf16.msra.mxu3 %v7510_v43  ;;  %v8178_v8 = vld [vmem:[#allocation5 + $0x160] sm:$0xf0]  ;;  %v7254_v43 = vor.u32 %v8275_v2, %v7251_v35  ;;  %v8365_v2 = vld [vmem:[#allocation5 + $0x73c] sm:$0xf]  ;;  %v7611_v35 = vld [vmem:[#allocation5 + $0x74c] sm:$0xf0] }
 0x2ca   :  { %v6858_v21 = vor.u32 %v8178_v8, %v6857_v20  ;;  %v7171_v20 = vld [vmem:[#allocation5 + $0x3dc] sm:$0xf0]  ;;  %v9102_v8 = vpop.f32.mrf.mxu0  ;;  %v7614_v34 = vor.u32 %v8365_v2, %v7611_v35  ;;  %v6757_v2 = vld [vmem:[#allocation5 + $0x88] sm:$0xf]  ;;  %v8153_v35 = vld [vmem:[#allocation5 + $0x98] sm:$0xf0] }
 0x2cb   :  { %4866 = vmatpush.bf16.msra.mxu0 %v6994_v32  ;;  %4738 = vmatpush.bf16.msrb.mxu2 %v7586_v42  ;;  %v8373_v32 = vld [vmem:[#allocation5 + $0x778] sm:$0xf0]  ;;  %v9098_v42 = vpop.f32.mrf.mxu1 }
 0x2cd   :  { %4960 = vmatpush.bf16.msrb.mxu1 %v6938_v17  ;;  %4834 = vmatpush.bf16.msra.mxu3 %v7490_v9  ;;  %v7638_v17 = vor.u32 %v8373_v32, %v7637_v31  ;;  %v7309_v9 = vld [vmem:[#allocation5 + $0x4e0] sm:$0xf]  ;;  %v7557_v32 = vld [vmem:[#allocation5 + $0x6c8] sm:$0xf] }
 0x2ce   :  { %v7310_v56 = vor.u32 %v8292_v37, %v7309_v9  ;;  %v8348_v9 = vld [vmem:[#allocation5 + $0x6b0] sm:$0xf0]  ;;  %v7229_v37 = vld [vmem:[#allocation5 + $0x440] sm:$0xf] }
 0x2cf   :  { %4867 = vmatpush.bf16.msra.mxu0 %v6974_v45  ;;  %4739 = vmatpush.bf16.msrb.mxu2 %v7566_v53  ;;  %v8368_v45 = vld [vmem:[#allocation5 + $0x750] sm:$0xf0]  ;;  %v7597_v53 = vld [vmem:[#allocation5 + $0x718] sm:$0xf] }
 0x2d0   :  { %4835 = vmatmul.bf16.vlgmr.msra.gmra.mxu3 %v9050_v58  ;;  %v7618_v52 = vor.u32 %v8368_v45, %v7617_v47  ;;  %v7537_v45 = vld [vmem:[#allocation5 + $0x6a0] sm:$0xf] }
 0x2d1   :  { %4892 = vmatpush.bf16.msrb.mxu3 %v7314_v33  ;;  %4961 = vmatpush.bf16.msrb.mxu1 %v6918_v51  ;;  %v8180_v33 = vld [vmem:[#allocation5 + $0x174] sm:$0xf]  ;;  %v7211_v51 = vld [vmem:[#allocation5 + $0x42c] sm:$0xf0] }
 0x2d2   :  { %7681 = vmatmul.msk.bf16.vlgmr.msrb.gmra.mxu0 %vm1908_vm2, %v9081_v25  ;;  %v6874_v10 = vor.u32 %v8180_v33, %v6871_v48  ;;  %v8272_v33 = vld [vmem:[#allocation5 + $0x450] sm:$0xf0] }
 0x2d3   :  { %4868 = vmatpush.bf16.msra.mxu0 %v6954_v57  ;;  %4740 = vmatpush.bf16.msrb.mxu2 %v7546_v23  ;;  %v8363_v57 = vld [vmem:[#allocation5 + $0x728] sm:$0xf0]  ;;  %v7191_v23 = vld [vmem:[#allocation5 + $0x404] sm:$0xf0]  ;;  %v4656_v54 = vpop.f32.mrf.mxu1 }
 0x2d4   :  { %v7598_v27 = vor.u32 %v8363_v57, %v7597_v53  ;;  %v7194_v13 = vor.u32 %v8260_v36, %v7191_v23  ;;  %v8163_v53 = vld [vmem:[#allocation5 + $0xe8] sm:$0xf0]  ;;  %v6777_v36 = vld [vmem:[#allocation5 + $0xb0] sm:$0xf]  ;;  %v8158_v23 = vld [vmem:[#allocation5 + $0xc0] sm:$0xf0] }
 0x2d5   :  { %4893 = vmatpush.bf16.msrb.mxu3 %v7294_v14  ;;  %4962 = vmatpush.bf16.msrb.mxu1 %v6898_v63  ;;  %v7214_v14 = vor.u32 %v8265_v50, %v7211_v51  ;;  %v8370_v63 = vld [vmem:[#allocation5 + $0x764] sm:$0xf]  ;;  %v8355_v50 = vld [vmem:[#allocation5 + $0x6ec] sm:$0xf]  ;;  %v7571_v51 = vld [vmem:[#allocation5 + $0x6fc] sm:$0xf0] }
 0x2d6   :  { %v8343_v57 = vld [vmem:[#allocation5 + $0x688] sm:$0xf0]  ;;  %v7574_v19 = vor.u32 %v8355_v50, %v7571_v51  ;;  %v7497_v54 = vld [vmem:[#allocation5 + $0x650] sm:$0xf]  ;;  %v6717_v50 = vld [vmem:[#allocation5 + $0x38] sm:$0xf] }
 0x2d7   :  { %4869 = vmatpush.bf16.msra.mxu0 %v6934_v4  ;;  %4741 = vmatpush.bf16.msrb.mxu2 %v7526_v18  ;;  %v6854_v4 = vor.u32 %v8175_v60, %v6851_v61  ;;  %v8255_v18 = vld [vmem:[#allocation5 + $0x3cc] sm:$0xf]  ;;  %v8350_v61 = vld [vmem:[#allocation5 + $0x6c4] sm:$0xf] }
 0x2d8   :  { %v7174_v38 = vor.u32 %v8255_v18, %v7171_v20  ;;  %v7190_v20 = vor.u32 %v8262_v5, %v7189_v7  ;;  %v8143_v51 = vld [vmem:[#allocation5 + $0x48] sm:$0xf0]  ;;  %v6771_v5 = vld [vmem:[#allocation5 + $0xbc] sm:$0xf0] }
 0x2d9   :  { %4894 = vmatpush.bf16.msrb.mxu3 %v7274_v12  ;;  %4963 = vmatpush.bf16.msrb.mxu1 %v6878_v0  ;;  %v7634_v12 = vor.u32 %v8370_v63, %v7631_v3  ;;  %v8282_v0 = vld [vmem:[#allocation5 + $0x4a0] sm:$0xf0]  ;;  %v7551_v63 = vld [vmem:[#allocation5 + $0x6d4] sm:$0xf0]  ;;  %v8155_v7 = vld [vmem:[#allocation5 + $0xac] sm:$0xf] }
 0x2da   :  { %v7270_v31 = vor.u32 %v8282_v0, %v7269_v16  ;;  %v7531_v16 = vld [vmem:[#allocation5 + $0x6ac] sm:$0xf0] }
 0x2db   :  { %4870 = vmatpush.bf16.msra.mxu0 %v6914_v24  ;;  %4742 = vmatpush.bf16.msrb.mxu2 %v7506_v29  ;;  %v6837_v24 = vld [vmem:[#allocation5 + $0x128] sm:$0xf]  ;;  %v8360_v29 = vld [vmem:[#allocation5 + $0x714] sm:$0xf] }
 0x2dc   :  { %v6838_v39 = vor.u32 %v8173_v30, %v6837_v24  ;;  %v7169_v24 = vld [vmem:[#allocation5 + $0x3c8] sm:$0xf]  ;;  %v8257_v30 = vld [vmem:[#allocation5 + $0x3d8] sm:$0xf0] }
 0x2dd   :  { %4895 = vmatpush.bf16.msrb.mxu3 %v7254_v43  ;;  %4964 = vmatpush.bf16.msrb.mxu1 %v6858_v21  ;;  %v8353_v43 = vld [vmem:[#allocation5 + $0x6d8] sm:$0xf0]  ;;  %v7249_v21 = vld [vmem:[#allocation5 + $0x468] sm:$0xf] }
 0x2de   :  { %v7558_v40 = vor.u32 %v8353_v43, %v7557_v32  ;;  %v7250_v47 = vor.u32 %v8277_v62, %v7249_v21  ;;  %v6758_v43 = vor.u32 %v8153_v35, %v6757_v2  ;;  %v7511_v21 = vld [vmem:[#allocation5 + $0x684] sm:$0xf0]  ;;  %v6737_v62 = vld [vmem:[#allocation5 + $0x60] sm:$0xf]  ;;  %v8328_v2 = vld [vmem:[#allocation5 + $0x610] sm:$0xf0] }
 0x2df   :  { %4871 = vmatpush.bf16.msra.mxu0 %v6894_v44  ;;  %4743 = vmatpush.bf16.msrb.mxu2 %v7486_v28  ;;  %v8168_v44 = vld [vmem:[#allocation5 + $0x110] sm:$0xf0]  ;;  %v4591_v28 = vpop.f32.mrf.mxu0 }
 0x2e0   :  { %4965 = vmatmul.bf16.vlgmr.msrb.gmra.mxu1 %v9046_v49  ;;  %v6818_v48 = vor.u32 %v8168_v44, %v6817_v41  ;;  %v8165_v44 = vld [vmem:[#allocation5 + $0xfc] sm:$0xf] }
 0x2e1   :  { %5009 = vmatpush.bf16.msra.mxu1 %v7638_v17  ;;  %4896 = vmatpush.bf16.msrb.mxu3 %v7234_v1  ;;  %v7591_v17 = vld [vmem:[#allocation5 + $0x724] sm:$0xf0] }
 0x2e2   :  { %4744 = vmatmul.bf16.vlgmr.msrb.gmra.mxu2 %v9050_v58  ;;  %v7594_v1 = vor.u32 %v8360_v29, %v7591_v17  ;;  %v7170_v29 = vor.u32 %v8257_v30, %v7169_v24  ;;  %v6751_v24 = vld [vmem:[#allocation5 + $0x94] sm:$0xf0] }
 0x2e3   :  { %4801 = vmatpush.bf16.msra.mxu2 %v7310_v56  ;;  %4872 = vmatpush.bf16.msra.mxu0 %v6874_v10  ;;  %v7230_v56 = vor.u32 %v8272_v33, %v7229_v37  ;;  %v7517_v10 = vld [vmem:[#allocation5 + $0x678] sm:$0xf]  ;;  %v7317_v37 = vld [vmem:[#allocation5 + $0x4e8] sm:$0xf]  ;;  %v8293_v33 = vld [vmem:[#allocation5 + $0x4f8] sm:$0xf0] }
 0x2e4   :  { %v7518_v3 = vor.u32 %v8343_v57, %v7517_v10  ;;  %v7318_v10 = vor.u32 %v8293_v33, %v7317_v37  ;;  %v8140_v33 = vld [vmem:[#allocation5 + $0x34] sm:$0xf] }
 0x2e5   :  { %5010 = vmatpush.bf16.msra.mxu1 %v7618_v52  ;;  %4897 = vmatpush.bf16.msrb.mxu3 %v7214_v14  ;;  %v6797_v52 = vld [vmem:[#allocation5 + $0xd8] sm:$0xf]  ;;  %v8267_v14 = vld [vmem:[#allocation5 + $0x428] sm:$0xf0] }
 0x2e6   :  { %v6798_v60 = vor.u32 %v8163_v53, %v6797_v52  ;;  %v8160_v53 = vld [vmem:[#allocation5 + $0xd4] sm:$0xf] }
 0x2e7   :  { %4802 = vmatpush.bf16.msra.mxu2 %v7290_v6  ;;  %4873 = vmatpush.bf16.msra.mxu0 %v6854_v4  ;;  %v8338_v6 = vld [vmem:[#allocation5 + $0x660] sm:$0xf0]  ;;  %v7554_v4 = vor.u32 %v8350_v61, %v7551_v63  ;;  %v9108_v32 = vpop.f32.mrf.mxu0  ;;  %v6697_v61 = vld [vmem:[#allocation5 + $0x10] sm:$0xf] }
 0x2e8   :  { %v7498_v0 = vor.u32 %v8338_v6, %v7497_v54  ;;  %v8138_v63 = vld [vmem:[#allocation5 + $0x20] sm:$0xf0] }
 0x2e9   :  { %5011 = vmatpush.bf16.msra.mxu1 %v7598_v27  ;;  %4898 = vmatpush.bf16.msrb.mxu3 %v7194_v13  ;;  %v7210_v27 = vor.u32 %v8267_v14, %v7209_v59  ;;  %v8345_v13 = vld [vmem:[#allocation5 + $0x69c] sm:$0xf]  ;;  %v6791_v59 = vld [vmem:[#allocation5 + $0xe4] sm:$0xf0]  ;;  %v7297_v14 = vld [vmem:[#allocation5 + $0x4c0] sm:$0xf] }
 0x2ea   :  { %4874 = vmatmul.bf16.vlgmr.msra.gmra.mxu0 %v9046_v49  ;;  %v7538_v49 = vor.u32 %v8348_v9, %v7537_v45  ;;  %v8335_v45 = vld [vmem:[#allocation5 + $0x64c] sm:$0xf] }
 0x2eb   :  { %4918 = vmatpush.bf16.msrb.mxu0 %v7634_v12  ;;  %4803 = vmatpush.bf16.msra.mxu2 %v7270_v31  ;;  %v6778_v12 = vor.u32 %v8158_v23, %v6777_v36  ;;  %v8170_v31 = vld [vmem:[#allocation5 + $0x124] sm:$0xf]  ;;  %v8333_v36 = vld [vmem:[#allocation5 + $0x638] sm:$0xf0] }
 0x2ed   :  { %5012 = vmatpush.bf16.msra.mxu1 %v7578_v22  ;;  %4899 = vmatpush.bf16.msrb.mxu3 %v7174_v38  ;;  %v9106_v18 = vpop.f32.mrf.mxu1  ;;  %v7534_v22 = vor.u32 %v8345_v13, %v7531_v16  ;;  %v8340_v38 = vld [vmem:[#allocation5 + $0x674] sm:$0xf]  ;;  %v7277_v13 = vld [vmem:[#allocation5 + $0x498] sm:$0xf]  ;;  %v8283_v16 = vld [vmem:[#allocation5 + $0x4a8] sm:$0xf0] }
 0x2ee   :  { %v7514_v41 = vor.u32 %v8340_v38, %v7511_v21  ;;  %v7437_v38 = vld [vmem:[#allocation5 + $0x5d8] sm:$0xf] }
 0x2ef   :  { %4919 = vmatpush.bf16.msrb.mxu0 %v7614_v34  ;;  %4804 = vmatpush.bf16.msra.mxu2 %v7250_v47  ;;  %v6831_v34 = vld [vmem:[#allocation5 + $0x134] sm:$0xf0]  ;;  %v6811_v47 = vld [vmem:[#allocation5 + $0x10c] sm:$0xf0] }
 0x2f0   :  { %4900 = vmatmul.bf16.vlgmr.msrb.gmra.mxu3 %v9061_v55 }
 0x2f1   :  { %4944 = vmatpush.bf16.msra.mxu3 %v6838_v39  ;;  %5013 = vmatpush.bf16.msra.mxu1 %v7558_v40  ;;  %v8148_v39 = vld [vmem:[#allocation5 + $0x70] sm:$0xf0]  ;;  %v6834_v40 = vor.u32 %v8170_v31, %v6831_v34  ;;  %v8278_v34 = vld [vmem:[#allocation5 + $0x480] sm:$0xf0] }
 0x2f2   :  { %v6738_v9 = vor.u32 %v8148_v39, %v6737_v62 }
 0x2f3   :  { %4920 = vmatpush.bf16.msrb.mxu0 %v7594_v1  ;;  %4805 = vmatpush.bf16.msra.mxu2 %v7230_v56  ;;  %v9110_v17 = vpop.f32.mrf.mxu3  ;;  %v7491_v1 = vld [vmem:[#allocation5 + $0x65c] sm:$0xf0]  ;;  %v4643_v56 = vpop.f32.mrf.mxu0 }
 0x2f4   :  { %v7494_v52 = vor.u32 %v8335_v45, %v7491_v1  ;;  %v8318_v45 = vld [vmem:[#allocation5 + $0x5c0] sm:$0xf0] }
 0x2f5   :  { %4945 = vmatpush.bf16.msra.mxu3 %v6818_v48  ;;  %5014 = vmatpush.bf16.msra.mxu1 %v7538_v49  ;;  %v9116_v48 = vld [vmem:[%s9314_s10] sm:$0x1f]  ;;  %v4721_v28 = vpop.f32.mrf.mxu1  ;;  %v6814_v49 = vor.u32 %v8165_v44, %v6811_v47  ;;  %v8273_v44 = vld [vmem:[#allocation5 + $0x458] sm:$0xf0] }
 0x2f6   :  { %v3267_v57 = vperm.slane %v9116_v48, 0  ;;  %v7417_v47 = vld [vmem:[#allocation5 + $0x5b0] sm:$0xf]  ;;  %v7217_v28 = vld [vmem:[#allocation5 + $0x420] sm:$0xf] }
 0x2f7   :  { %4921 = vmatpush.bf16.msrb.mxu0 %v7574_v19  ;;  %4806 = vmatpush.bf16.msra.mxu2 %v7210_v27  ;;  %v6718_v19 = vor.u32 %v8143_v51, %v6717_v50  ;;  %v6794_v27 = vor.u32 %v8160_v53, %v6791_v59  ;;  %v6711_v50 = vld [vmem:[#allocation5 + $0x44] sm:$0xf0]  ;;  %v7418_v51 = vor.u32 %v8318_v45, %v7417_v47  ;;  %v8313_v53 = vld [vmem:[#allocation5 + $0x598] sm:$0xf0]  ;;  %v6691_v59 = vld [vmem:[#allocation5 + $0x1c] sm:$0xf0] }
 0x2f8   :  { %v4590_v54 = vadd.f32 %v9102_v8, %v3267_v57  ;;  %v8150_v8 = vld [vmem:[#allocation5 + $0x84] sm:$0xf]  ;;  %v8389_v45 = vld [vmem:[%s9315_s11 + $0x28] sm:$0xff] }
 0x2f9   :  { %4946 = vmatpush.bf16.msra.mxu3 %v6798_v60  ;;  %5015 = vmatpush.bf16.msra.mxu1 %v7518_v3  ;;  %v8288_v60 = vld [vmem:[#allocation5 + $0x4d0] sm:$0xf0]  ;;  %v7477_v3 = vld [vmem:[#allocation5 + $0x628] sm:$0xf]  ;;  %v6754_v62 = vor.u32 %v8150_v8, %v6751_v24 }
 0x2fa   :  { %v7298_v6 = vor.u32 %v8288_v60, %v7297_v14  ;;  %v9125_v30 = vadd.f32 %v9091_v46, %v4590_v54  ;;  %v7237_v46 = vld [vmem:[#allocation5 + $0x448] sm:$0xf]  ;;  %v8330_v14 = vld [vmem:[#allocation5 + $0x624] sm:$0xf] }
 0x2fb   :  { %4922 = vmatpush.bf16.msrb.mxu0 %v7554_v4  ;;  %4807 = vmatpush.bf16.msra.mxu2 %v7190_v20  ;;  %v4630_v23 = vpop.f32.mrf.mxu3  ;;  %v6698_v4 = vor.u32 %v8138_v63, %v6697_v61  ;;  %v6774_v20 = vor.u32 %v8155_v7, %v6771_v5  ;;  %v7238_v37 = vor.u32 %v8273_v44, %v7237_v46  ;;  %v7471_v61 = vld [vmem:[#allocation5 + $0x634] sm:$0xf0]  ;;  %v7451_v5 = vld [vmem:[#allocation5 + $0x60c] sm:$0xf0] }
 0x2fc   :  { %v7197_v63 = vld [vmem:[#allocation5 + $0x3f8] sm:$0xf]  ;;  %v8308_v23 = vld [vmem:[#allocation5 + $0x570] sm:$0xf0]  ;;  %v7474_v54 = vor.u32 %v8330_v14, %v7471_v61  ;;  %v8386_v14 = vld [vmem:[%s9315_s11 + $0x10] sm:$0xff] }
 0x2fd   :  { %4947 = vmatpush.bf16.msra.mxu3 %v6778_v12  ;;  %5016 = vmatpush.bf16.msra.mxu1 %v7498_v0  ;;  %v7478_v12 = vor.u32 %v8333_v36, %v7477_v3  ;;  %v7457_v0 = vld [vmem:[#allocation5 + $0x600] sm:$0xf]  ;;  %v9122_v35 = vpop.f32.mrf.mxu1  ;;  %v8263_v3 = vld [vmem:[#allocation5 + $0x408] sm:$0xf0] }
 0x2fe   :  { %v7458_v31 = vor.u32 %v8328_v2, %v7457_v0  ;;  %v7377_v36 = vld [vmem:[#allocation5 + $0x560] sm:$0xf]  ;;  %v8303_v0 = vld [vmem:[#allocation5 + $0x548] sm:$0xf0] }
 0x2ff   :  { %4923 = vmatpush.bf16.msrb.mxu0 %v7534_v22  ;;  %4808 = vmatpush.bf16.msra.mxu2 %v7170_v29  ;;  %v7278_v22 = vor.u32 %v8283_v16, %v7277_v13  ;;  %v8145_v29 = vld [vmem:[#allocation5 + $0x5c] sm:$0xf]  ;;  %v7378_v7 = vor.u32 %v8308_v23, %v7377_v36  ;;  %v8258_v13 = vld [vmem:[#allocation5 + $0x3e0] sm:$0xf0]  ;;  %v7357_v16 = vld [vmem:[#allocation5 + $0x538] sm:$0xf] }
 0x300   :  { %5017 = vmatmul.bf16.vlgmr.msra.gmra.mxu1 %v9050_v58  ;;  %v7358_v24 = vor.u32 %v8303_v0, %v7357_v16 }
 0x301   :  { %4948 = vmatpush.bf16.msra.mxu3 %v6758_v43  ;;  %v7257_v43 = vld [vmem:[#allocation5 + $0x470] sm:$0xf] }
 0x302   :  { %4809 = vmatmul.bf16.vlgmr.msra.gmra.mxu2 %v9061_v55  ;;  %v7258_v39 = vor.u32 %v8278_v34, %v7257_v43  ;;  %v8320_v43 = vld [vmem:[#allocation5 + $0x5d4] sm:$0xf]  ;;  %v7431_v34 = vld [vmem:[#allocation5 + $0x5e4] sm:$0xf0] }
 0x303   :  { %4853 = vmatpush.bf16.msrb.mxu2 %v6834_v40  ;;  %4924 = vmatpush.bf16.msrb.mxu0 %v7514_v41  ;;  %v9127_v21 = vpop.f32.mrf.mxu3  ;;  %v6731_v40 = vld [vmem:[#allocation5 + $0x6c] sm:$0xf0] }
 0x304   :  { %v6734_v1 = vor.u32 %v8145_v29, %v6731_v40  ;;  %v8390_v29 = vld [vmem:[%s9315_s11 + $0x30] sm:$0xff]  ;;  %v8315_v40 = vld [vmem:[#allocation5 + $0x5ac] sm:$0xf] }
 0x305   :  { %4949 = vmatpush.bf16.msra.mxu3 %v6738_v9  ;;  %v4773_v9 = vpop.f32.mrf.mxu1 }
 0x306   :  { %v8310_v9 = vld [vmem:[#allocation5 + $0x584] sm:$0xf] }
 0x307   :  { %4854 = vmatpush.bf16.msrb.mxu2 %v6814_v49  ;;  %4925 = vmatpush.bf16.msrb.mxu0 %v7494_v52  ;;  %v8268_v49 = vld [vmem:[#allocation5 + $0x430] sm:$0xf0]  ;;  %v7397_v52 = vld [vmem:[#allocation5 + $0x588] sm:$0xf] }
 0x308   :  { %v7218_v57 = vor.u32 %v8268_v49, %v7217_v28  ;;  %v7398_v60 = vor.u32 %v8313_v53, %v7397_v52  ;;  %v8387_v53 = vld [vmem:[%s9315_s11 + $0x18] sm:$0xff] }
 0x309   :  { %4950 = vmatpush.bf16.msra.mxu3 %v6718_v19  ;;  %v8135_v19 = vld [vmem:[#allocation5 + $0xc] sm:$0xf] }
 0x30a   :  { %4926 = vmatmul.bf16.vlgmr.msrb.gmra.mxu0 %v9050_v58  ;;  %v8323_v58 = vld [vmem:[#allocation5 + $0x5e8] sm:$0xf0] }
 0x30b   :  { %4983 = vmatpush.bf16.msra.mxu0 %v7318_v10  ;;  %4855 = vmatpush.bf16.msrb.mxu2 %v6794_v27  ;;  %v7438_v41 = vor.u32 %v8323_v58, %v7437_v38  ;;  %v4682_v56 = vpop.f32.mrf.mxu3  ;;  %v6714_v10 = vor.u32 %v8140_v33, %v6711_v50  ;;  %v6694_v27 = vor.u32 %v8135_v19, %v6691_v59  ;;  %v7337_v38 = vld [vmem:[#allocation5 + $0x510] sm:$0xf]  ;;  %v8298_v58 = vld [vmem:[#allocation5 + $0x520] sm:$0xf0]  ;;  %v8305_v33 = vld [vmem:[#allocation5 + $0x55c] sm:$0xf] }
 0x30c   :  { %v7371_v50 = vld [vmem:[#allocation5 + $0x56c] sm:$0xf0]  ;;  %v8300_v56 = vld [vmem:[#allocation5 + $0x534] sm:$0xf]  ;;  %v3269_v19 = vperm.slane %v9116_v48, 2 }
 0x30d   :  { %4951 = vmatpush.bf16.msra.mxu3 %v6698_v4  ;;  %v8325_v4 = vld [vmem:[#allocation5 + $0x5fc] sm:$0xf]  ;;  %v7374_v49 = vor.u32 %v8305_v33, %v7371_v50  ;;  %v7037_v50 = vld [vmem:[#allocation5 + $0x2b8] sm:$0xf] }
 0x30f   :  { %4984 = vmatpush.bf16.msra.mxu0 %v7298_v6  ;;  %4856 = vmatpush.bf16.msrb.mxu2 %v6774_v20  ;;  %v7198_v6 = vor.u32 %v8263_v3, %v7197_v63  ;;  %v7454_v20 = vor.u32 %v8325_v4, %v7451_v5  ;;  %v7157_v63 = vld [vmem:[#allocation5 + $0x3a8] sm:$0xf]  ;;  %v8253_v3 = vld [vmem:[#allocation5 + $0x3b8] sm:$0xf0]  ;;  %v7137_v4 = vld [vmem:[#allocation5 + $0x380] sm:$0xf] }
 0x310   :  { %4952 = vmatmul.bf16.vlgmr.msra.gmra.mxu3 %v9056_v15 }
 0x311   :  { %4996 = vmatpush.bf16.msrb.mxu3 %v7478_v12  ;;  %v7177_v12 = vld [vmem:[#allocation5 + $0x3d0] sm:$0xf] }
 0x313   :  { %4985 = vmatpush.bf16.msra.mxu0 %v7278_v22  ;;  %4857 = vmatpush.bf16.msrb.mxu2 %v6754_v62  ;;  %v9130_v2 = vpop.f32.mrf.mxu3  ;;  %v7178_v22 = vor.u32 %v8258_v13, %v7177_v12  ;;  %v7434_v62 = vor.u32 %v8320_v43, %v7431_v34 }
 0x315   :  { %4997 = vmatpush.bf16.msrb.mxu3 %v7458_v31  ;;  %v9132_v8 = vpop.f32.mrf.mxu1  ;;  %v8391_v31 = vld [vmem:[%s9315_s11 + $0x38] sm:$0xff] }
 0x317   :  { %4986 = vmatpush.bf16.msra.mxu0 %v7258_v39  ;;  %4858 = vmatpush.bf16.msrb.mxu2 %v6734_v1  ;;  %v7338_v39 = vor.u32 %v8298_v58, %v7337_v38  ;;  %v7391_v1 = vld [vmem:[#allocation5 + $0x594] sm:$0xf0]  ;;  %v8238_v38 = vld [vmem:[#allocation5 + $0x340] sm:$0xf0] }
 0x319   :  { %4998 = vmatpush.bf16.msrb.mxu3 %v7438_v41  ;;  %v7411_v41 = vld [vmem:[#allocation5 + $0x5bc] sm:$0xf0] }
 0x31b   :  { %4987 = vmatpush.bf16.msra.mxu0 %v7238_v37  ;;  %4859 = vmatpush.bf16.msrb.mxu2 %v6714_v10  ;;  %v4734_v46 = vpop.f32.mrf.mxu3  ;;  %v7394_v37 = vor.u32 %v8310_v9, %v7391_v1  ;;  %v7351_v10 = vld [vmem:[#allocation5 + $0x544] sm:$0xf0]  ;;  %v8228_v9 = vld [vmem:[#allocation5 + $0x2f0] sm:$0xf0] }
 0x31c   :  { %v8233_v46 = vld [vmem:[#allocation5 + $0x318] sm:$0xf0] }
 0x31d   :  { %4999 = vmatpush.bf16.msrb.mxu3 %v7418_v51  ;;  %v4825_v47 = vpop.f32.mrf.mxu1 }
 0x31f   :  { %4988 = vmatpush.bf16.msra.mxu0 %v7218_v57  ;;  %4860 = vmatpush.bf16.msrb.mxu2 %v6694_v27  ;;  %v9142_v44 = vpop.f32.mrf.mxu0  ;;  %v7354_v57 = vor.u32 %v8300_v56, %v7351_v10  ;;  %v4772_v27 = vadd.f32 %v9122_v35, %v3269_v19  ;;  %v8384_v35 = vld [vmem:[%s9315_s11] sm:$0xff]  ;;  %v8218_v10 = vld [vmem:[#allocation5 + $0x2a0] sm:$0xf0]  ;;  %v8383_v19 = vld [vmem:[#allocation5 + $0x7c8] sm:$0xf0] }
 0x320   :  { %v7017_v56 = vld [vmem:[#allocation5 + $0x290] sm:$0xf] }
 0x321   :  { %5000 = vmatpush.bf16.msrb.mxu3 %v7398_v60  ;;  %v8295_v60 = vld [vmem:[#allocation5 + $0x50c] sm:$0xf] }
 0x322   :  { %4861 = vmatmul.bf16.vlgmr.msrb.gmra.mxu2 %v9056_v15  ;;  %v7414_v15 = vor.u32 %v8315_v40, %v7411_v41  ;;  %v7077_v41 = vld [vmem:[#allocation5 + $0x308] sm:$0xf] }
 0x323   :  { %4905 = vmatpush.bf16.msra.mxu2 %v7474_v54  ;;  %4989 = vmatpush.bf16.msra.mxu0 %v7198_v6  ;;  %v7158_v54 = vor.u32 %v8253_v3, %v7157_v63  ;;  %v8385_v6 = vld [vmem:[%s9315_s11 + $0x8] sm:$0xff]  ;;  %v8378_v3 = vld [vmem:[#allocation5 + $0x7a0] sm:$0xf0] }
 0x325   :  { %5001 = vmatpush.bf16.msrb.mxu3 %v7378_v7  ;;  %v4615_v51 = vpop.f32.mrf.mxu2  ;;  %v8248_v7 = vld [vmem:[#allocation5 + $0x390] sm:$0xf0] }
 0x326   :  { %v4616_v52 = vadd.f32 %v4615_v51, %v9125_v30  ;;  %v7331_v30 = vld [vmem:[#allocation5 + $0x51c] sm:$0xf0]  ;;  %v7138_v16 = vor.u32 %v8248_v7, %v7137_v4  ;;  %v8223_v51 = vld [vmem:[#allocation5 + $0x2c8] sm:$0xf0] }
 0x327   :  { %4906 = vmatpush.bf16.msra.mxu2 %v7454_v20  ;;  %4990 = vmatpush.bf16.msra.mxu0 %v7178_v22  ;;  %v4708_v28 = vpop.f32.mrf.mxu0  ;;  %v7334_v23 = vor.u32 %v8295_v60, %v7331_v30  ;;  %v7117_v20 = vld [vmem:[#allocation5 + $0x358] sm:$0xf]  ;;  %v8243_v22 = vld [vmem:[#allocation5 + $0x368] sm:$0xf0]  ;;  %v8398_v4 = vld [vmem:[%s9315_s11 + $0x70] sm:$0xff] }
 0x328   :  { %v4629_v59 = vadd.f32 %v9110_v17, %v4616_v52  ;;  %v7118_v34 = vor.u32 %v8243_v22, %v7117_v20  ;;  %v8402_v20 = vld [vmem:[%s9315_s11 + $0x90] sm:$0xff] }
 0x329   :  { %5002 = vmatpush.bf16.msrb.mxu3 %v7358_v24 }
 0x32a   :  { %4991 = vmatmul.bf16.vlgmr.msra.gmra.mxu0 %v9061_v55  ;;  %v8388_v55 = vld [vmem:[%s9315_s11 + $0x20] sm:$0xff]  ;;  %v4642_v17 = vadd.f32 %v9108_v32, %v4629_v59 }
 0x32b   :  { %5355 = vmatpush.bf16.msrb.mxu0 %v8391_v31  ;;  %4907 = vmatpush.bf16.msra.mxu2 %v7434_v62 }
 0x32c   :  { %v4655_v13 = vadd.f32 %v9098_v42, %v4642_v17  ;;  %v7097_v42 = vld [vmem:[#allocation5 + $0x330] sm:$0xf]  ;;  %v8405_v17 = vld [vmem:[%s9315_s11 + $0xa8] sm:$0xff] }
 0x32d   :  { %5003 = vmatpush.bf16.msrb.mxu3 %v7338_v39  ;;  %v4617_v61 = vpop.f32.mrf.mxu2  ;;  %v7098_v39 = vor.u32 %v8238_v38, %v7097_v42  ;;  %v8400_v38 = vld [vmem:[%s9315_s11 + $0x80] sm:$0xff] }
 0x32f   :  { %5356 = vmatpush.bf16.msrb.mxu0 %v8390_v29  ;;  %4908 = vmatpush.bf16.msra.mxu2 %v7414_v15  ;;  %v9160_v36 = vpop.f32.mrf.mxu0  ;;  %v3268_v15 = vperm.slane %v9116_v48, 1 }
 0x330   :  { %5004 = vmatmul.bf16.vlgmr.msrb.gmra.mxu3 %v9063_v11 }
 0x331   :  { %v4681_v1 = vadd.f32 %v9127_v21, %v3268_v15  ;;  %v8407_v21 = vld [vmem:[%s9315_s11 + $0xb8] sm:$0xff] }
 0x332   :  { %5381 = vmatpush.bf16.msra.mxu3 %v8407_v21 }
 0x333   :  { %5357 = vmatpush.bf16.msrb.mxu0 %v8389_v45  ;;  %4909 = vmatpush.bf16.msra.mxu2 %v7394_v37  ;;  %v4784_v5 = vpop.f32.mrf.mxu3  ;;  %v7057_v45 = vld [vmem:[#allocation5 + $0x2e0] sm:$0xf] }
 0x334   :  { %v9167_v12 = vadd.f32 %v4784_v5, %v4772_v27  ;;  %v7058_v37 = vor.u32 %v8228_v9, %v7057_v45 }
 0x335   :  { %v9173_v32 = vpop.f32.mrf.mxu1  ;;  %v4667_v0 = vpop.f32.mrf.mxu2 }
 0x336   :  { %v4668_v24 = vadd.f32 %v4667_v0, %v4655_v13 }
 0x337   :  { %5358 = vmatpush.bf16.msrb.mxu0 %v8388_v55  ;;  %4910 = vmatpush.bf16.msra.mxu2 %v7374_v49  ;;  %v4760_v31 = vpop.f32.mrf.mxu0 }
 0x338   :  { %v5035_v43 = vmax.f32 %v4668_v24, 0.0  ;;  %v8395_v31 = vld [vmem:[%s9315_s11 + $0x58] sm:$0xff] }
 0x33a   :  { %v5040_v58 = vpack.c.bf16 %v5035_v43, %v5035_v43  ;;  %v8401_v43 = vld [vmem:[%s9315_s11 + $0x88] sm:$0xff] }
 0x33b   :  { %5359 = vmatpush.bf16.msrb.mxu0 %v8387_v53  ;;  %4911 = vmatpush.bf16.msra.mxu2 %v7354_v57  ;;  %v4786_v62 = vpop.f32.mrf.mxu3  ;;  %v7038_v53 = vor.u32 %v8223_v51, %v7037_v50  ;;  %v7677_v57 = vld [vmem:[#allocation5 + $0x7b8] sm:$0xf]  ;;  %v8415_v50 = vld [vmem:[%s9315_s11 + $0xf8] sm:$0xff] }
 0x33c   :  { %v7678_v63 = vor.u32 %v8383_v19, %v7677_v57  ;;  %5394 = vmatpush.bf16.msrb.mxu1 %v8415_v50 }
 0x33d   :  { %v4890_v29 = vpop.f32.mrf.mxu1  ;;  %v4669_v40 = vpop.f32.mrf.mxu2 }
 0x33e   :  { %v8392_v40 = vld [vmem:[%s9315_s11 + $0x40] sm:$0xff] }
 0x33f   :  { %5360 = vmatpush.bf16.msrb.mxu0 %v8386_v14  ;;  %4912 = vmatpush.bf16.msra.mxu2 %v7334_v23  ;;  %v9177_v47 = vpop.f32.mrf.mxu0  ;;  %v7018_v14 = vor.u32 %v8218_v10, %v7017_v56  ;;  %v8406_v23 = vld [vmem:[%s9315_s11 + $0xb0] sm:$0xff] }
 0x340   :  { %5382 = vmatpush.bf16.msra.mxu3 %v8406_v23  ;;  %v4798_v9 = vadd.f32 %v9177_v47, %v9167_v12 }
 0x342   :  { %4913 = vmatmul.bf16.vlgmr.msra.gmra.mxu2 %v9063_v11  ;;  %v7078_v11 = vor.u32 %v8233_v46, %v7077_v41 }
 0x343   :  { %4970 = vmatpush.bf16.msrb.mxu2 %v7158_v54  ;;  %5361 = vmatpush.bf16.msrb.mxu0 %v8385_v6  ;;  %v8404_v6 = vld [vmem:[%s9315_s11 + $0xa0] sm:$0xff] }
 0x344   :  { %5383 = vmatpush.bf16.msra.mxu3 %v8405_v17 }
 0x345   :  { %v9180_v55 = vpop.f32.mrf.mxu1  ;;  %v4693_v33 = vpop.f32.mrf.mxu2 }
 0x346   :  { %v4694_v28 = vadd.f32 %v4693_v33, %v4681_v1 }
 0x347   :  { %4971 = vmatpush.bf16.msrb.mxu2 %v7138_v16  ;;  %5362 = vmatpush.bf16.msrb.mxu0 %v8384_v35  ;;  %v4799_v49 = vpop.f32.mrf.mxu0  ;;  %v8403_v16 = vld [vmem:[%s9315_s11 + $0x98] sm:$0xff]  ;;  %v8396_v35 = vld [vmem:[%s9315_s11 + $0x60] sm:$0xff] }
 0x348   :  { %v4707_v52 = vadd.f32 %v9142_v44, %v4694_v28  ;;  %v7657_v44 = vld [vmem:[#allocation5 + $0x790] sm:$0xf]  ;;  %5384 = vmatpush.bf16.msra.mxu3 %v8404_v6 }
 0x349   :  { %v7658_v54 = vor.u32 %v8378_v3, %v7657_v44 }
 0x34a   :  { %5363 = vmatmul.bf16.vlgmr.msrb.gmra.mxu0 %v5040_v58  ;;  %v4720_v59 = vadd.f32 %v9106_v18, %v4707_v52  ;;  %v3271_v52 = vperm.slane %v9116_v48, 4 }
 0x34b   :  { %4972 = vmatpush.bf16.msrb.mxu2 %v7118_v34  ;;  %v8394_v34 = vld [vmem:[%s9315_s11 + $0x50] sm:$0xff] }
 0x34c   :  { %v4733_v60 = vadd.f32 %v9130_v2, %v4720_v59  ;;  %v8399_v2 = vld [vmem:[%s9315_s11 + $0x78] sm:$0xff]  ;;  %5385 = vmatpush.bf16.msra.mxu3 %v8403_v16  ;;  %v8412_v59 = vld [vmem:[%s9315_s11 + $0xe0] sm:$0xff] }
 0x34d   :  { %v4942_v30 = vpop.f32.mrf.mxu1  ;;  %v4695_v61 = vpop.f32.mrf.mxu2 }
 0x34e   :  { %v3270_v30 = vperm.slane %v9116_v48, 3 }
 0x34f   :  { %4973 = vmatpush.bf16.msrb.mxu2 %v7098_v39  ;;  %v4849_v18 = vpop.f32.mrf.mxu0 }
 0x350   :  { %5386 = vmatpush.bf16.msra.mxu3 %v8402_v20  ;;  %v8419_v20 = vld [vmem:[%s9315_s11 + $0x118] sm:$0xff] }
 0x353   :  { %4974 = vmatpush.bf16.msrb.mxu2 %v7078_v11  ;;  %v4836_v27 = vpop.f32.mrf.mxu3 }
 0x354   :  { %5387 = vmatpush.bf16.msra.mxu3 %v8401_v43 }
 0x357   :  { %4975 = vmatpush.bf16.msrb.mxu2 %v7058_v37  ;;  %v4851_v13 = vpop.f32.mrf.mxu0 }
 0x358   :  { %5388 = vmatpush.bf16.msra.mxu3 %v8400_v38  ;;  %v8417_v38 = vld [vmem:[%s9315_s11 + $0x108] sm:$0xff] }
 0x35b   :  { %4976 = vmatpush.bf16.msrb.mxu2 %v7038_v53  ;;  %v4838_v5 = vpop.f32.mrf.mxu3  ;;  %v8414_v53 = vld [vmem:[%s9315_s11 + $0xf0] sm:$0xff] }
 0x35c   :  { %5395 = vmatpush.bf16.msrb.mxu1 %v8414_v53 }
 0x35d   :  { %v4966_v7 = vpop.f32.mrf.mxu1 }
 0x35f   :  { %4977 = vmatpush.bf16.msrb.mxu2 %v7018_v14  ;;  %v8411_v14 = vld [vmem:[%s9315_s11 + $0xd8] sm:$0xff] }
 0x362   :  { %4978 = vmatmul.bf16.vlgmr.msrb.gmra.mxu2 %v9076_v26  ;;  %v8397_v26 = vld [vmem:[%s9315_s11 + $0x68] sm:$0xff] }
 0x363   :  { %5028 = vmatpush.bf16.msra.mxu2 %v7678_v63  ;;  %v8409_v63 = vld [vmem:[%s9315_s11 + $0xc8] sm:$0xff] }
 0x365   :  { %v4968_v0 = vpop.f32.mrf.mxu1  ;;  %v4745_v24 = vpop.f32.mrf.mxu2 }
 0x366   :  { %v4746_v42 = vadd.f32 %v4745_v24, %v4733_v60  ;;  %v8410_v60 = vld [vmem:[%s9315_s11 + $0xd0] sm:$0xff] }
 0x367   :  { %5029 = vmatpush.bf16.msra.mxu2 %v7658_v54  ;;  %v9216_v22 = vpop.f32.mrf.mxu0  ;;  %v8418_v24 = vld [vmem:[%s9315_s11 + $0x110] sm:$0xff] }
 0x368   :  { %v4759_v39 = vadd.f32 %v9160_v36, %v4746_v42 }
 0x36a   :  { %v5036_v41 = vmax.f32 %v4759_v39, 0.0 }
 0x36b   :  { %5368 = vmatpush.bf16.msrb.mxu2 %v8399_v2 }
 0x36c   :  { %v5041_v46 = vpack.c.bf16 %v5036_v41, %v5036_v41 }
 0x36d   :  { %v4747_v62 = vpop.f32.mrf.mxu2 }
 0x36f   :  { %5369 = vmatpush.bf16.msrb.mxu2 %v8398_v4  ;;  %v4877_v58 = vpop.f32.mrf.mxu0  ;;  %v5119_v4 = vld [vmem:[%s9315_s11 + $0x128] sm:$0xf] }
 0x372   :  { %7683 = vmatmul.msk.bf16.vlgmr.msra.gmra.mxu2 %vm1908_vm2, %v9081_v25  ;;  %v8393_v25 = vld [vmem:[%s9315_s11 + $0x48] sm:$0xff] }
 0x373   :  { %5370 = vmatpush.bf16.msrb.mxu2 %v8397_v26  ;;  %v4901_v29 = vpop.f32.mrf.mxu3  ;;  %v8420_v26 = vld [vmem:[%s9315_s11 + $0x120] sm:$0xff] }
 0x377   :  { %5371 = vmatpush.bf16.msrb.mxu2 %v8396_v35 }
 0x37b   :  { %5372 = vmatpush.bf16.msrb.mxu2 %v8395_v31  ;;  %v4903_v11 = vpop.f32.mrf.mxu3 }
 0x37d   :  { %v9239_v15 = vpop.f32.mrf.mxu1 }
 0x37f   :  { %5373 = vmatpush.bf16.msrb.mxu2 %v8394_v34 }
 0x383   :  { %5374 = vmatpush.bf16.msrb.mxu2 %v8393_v25 }
 0x385   :  { %v5020_v45 = vpop.f32.mrf.mxu1  ;;  %v4810_v37 = vpop.f32.mrf.mxu2 }
 0x386   :  { %v4811_v36 = vadd.f32 %v4810_v37, %v4798_v9 }
 0x387   :  { %5375 = vmatpush.bf16.msrb.mxu2 %v8392_v40  ;;  %v4927_v1 = vpop.f32.mrf.mxu0 }
 0x388   :  { %v4824_v33 = vadd.f32 %v9132_v8, %v4811_v36  ;;  %v8413_v8 = vld [vmem:[%s9315_s11 + $0xe8] sm:$0xff] }
 0x389   :  { %5396 = vmatpush.bf16.msrb.mxu1 %v8413_v8 }
 0x38a   :  { %5376 = vmatmul.bf16.vlgmr.msrb.gmra.mxu2 %v5041_v46  ;;  %v4837_v51 = vadd.f32 %v4836_v27, %v4824_v33  ;;  %v8408_v27 = vld [vmem:[%s9315_s11 + $0xc0] sm:$0xff] }
 0x38c   :  { %v4850_v28 = vadd.f32 %v4849_v18, %v4837_v51 }
 0x38d   :  { %v4812_v12 = vpop.f32.mrf.mxu2  ;;  %5397 = vmatpush.bf16.msrb.mxu1 %v8412_v59 }
 0x38e   :  { %v5037_v47 = vmax.f32 %v4850_v28, 0.0 }
 0x38f   :  { %v4929_v49 = vpop.f32.mrf.mxu0 }
 0x390   :  { %v5042_v10 = vpack.c.bf16 %v5037_v47, %v5037_v47 }
 0x391   :  { %5398 = vmatpush.bf16.msrb.mxu1 %v8411_v14 }
 0x392   :  { %5389 = vmatmul.bf16.vlgmr.msra.gmra.mxu3 %v5042_v10 }
 0x393   :  { %v4953_v56 = vpop.f32.mrf.mxu3 }
 0x394   :  { %v4954_v57 = vadd.f32 %v4953_v56, %v3271_v52 }
 0x395   :  { %5399 = vmatpush.bf16.msrb.mxu1 %v8410_v60 }
 0x396   :  { %v4967_v19 = vadd.f32 %v4966_v7, %v4954_v57  ;;  %v5273_v7 = vunpack.c.l.b16 %v5119_v4 }
 0x398   :  { %v5311_v5 = vpack.c.b16 %v5273_v7, %v5273_v7 }
 0x399   :  { %5400 = vmatpush.bf16.msrb.mxu1 %v8409_v63 }
 0x39a   :  { %v5353_v13 = vsel %vm169_vm0, %v5311_v5, 0 }
 0x39b   :  { %v4955_v21 = vpop.f32.mrf.mxu3  ;;  %5409 = vmatpush.bf16.msra.mxu0 %v5353_v13 }
 0x39d   :  { %5401 = vmatpush.bf16.msrb.mxu1 %v8408_v27 }
 0x39f   :  { %5410 = vmatpush.bf16.msra.mxu0 %v8420_v26 }
 0x3a3   :  { %5411 = vmatpush.bf16.msra.mxu0 %v8419_v20 }
 0x3a5   :  { %v4862_v44 = vpop.f32.mrf.mxu2 }
 0x3a6   :  { %v4863_v3 = vadd.f32 %v4862_v44, %v3270_v30 }
 0x3a7   :  { %v4992_v61 = vpop.f32.mrf.mxu0  ;;  %5412 = vmatpush.bf16.msra.mxu0 %v8418_v24 }
 0x3a8   :  { %v4876_v23 = vadd.f32 %v9216_v22, %v4863_v3 }
 0x3aa   :  { %v4889_v18 = vadd.f32 %v9173_v32, %v4876_v23 }
 0x3ab   :  { %5413 = vmatpush.bf16.msra.mxu0 %v8417_v38 }
 0x3ac   :  { %v4902_v48 = vadd.f32 %v4901_v29, %v4889_v18 }
 0x3ad   :  { %v4864_v2 = vpop.f32.mrf.mxu2 }
 0x3af   :  { %v4994_v54 = vpop.f32.mrf.mxu0 }
 0x3b3   :  { %v5005_v17 = vpop.f32.mrf.mxu3 }
 0x3bb   :  { %v5007_v6 = vpop.f32.mrf.mxu3 }
 0x3c5   :  { %v4914_v32 = vpop.f32.mrf.mxu2 }
 0x3c6   :  { %v4915_v35 = vadd.f32 %v4914_v32, %v4902_v48 }
 0x3c7   :  { %v5364_v16 = vpop.f32.mrf.mxu0 }
 0x3c8   :  { %v4928_v0 = vadd.f32 %v4927_v1, %v4915_v35  ;;  %v8428_v1 = vld [vmem:[%s9316_s12] ss:$0 sm:$0xff] }
 0x3ca   :  { %v4941_v22 = vadd.f32 %v9180_v55, %v4928_v0  ;;  %v8416_v55 = vld [vmem:[%s9315_s11 + $0x100] sm:$0xff]  ;;  %s5428_s11 = sshll.u32 %s9317_s13, 4  ;;  %s5429_s11 = int_to_ptr.hbm [resolvable:$true] %s5428_s11 }
 0x3cb   :  { %5414 = vmatpush.bf16.msra.mxu0 %v8416_v55  ;;  %5431 = dma.vmem_to_hbm [thread:$0]  %s5427_s6, 128, %s5429_s11, [#allocation4]  }
 0x3cc   :  { %v5038_v31 = vmax.f32 %v4941_v22, 0.0 }
 0x3cd   :  { %v4916_v43 = vpop.f32.mrf.mxu2 }
 0x3ce   :  { %v5043_v42 = vpack.c.bf16 %v5038_v31, %v5038_v31 }
 0x3cf   :  { %v5366_v34 = vpop.f32.mrf.mxu0 }
 0x3d0   :  { %5402 = vmatmul.bf16.vlgmr.msrb.gmra.mxu1 %v5043_v42 }
 0x3e5   :  { %v4979_v58 = vpop.f32.mrf.mxu2 }
 0x3e6   :  { %v4980_v62 = vadd.f32 %v4979_v58, %v4967_v19 }
 0x3e8   :  { %v4993_v25 = vadd.f32 %v4992_v61, %v4980_v62 }
 0x3ea   :  { %v5006_v29 = vadd.f32 %v5005_v17, %v4993_v25 }
 0x3ec   :  { %v5019_v40 = vadd.f32 %v9239_v15, %v5006_v29  ;;  %v5365_v15 = vadd.f32 %v8428_v1, %v5364_v16 }
 0x3ed   :  { %v4981_v39 = vpop.f32.mrf.mxu2 }
 0x3f5   :  { %v5031_v41 = vpop.f32.mrf.mxu2 }
 0x3f6   :  { %v5032_v46 = vadd.f32 %v5031_v41, %v5019_v40 }
 0x3f8   :  { %v5039_v11 = vmax.f32 %v5032_v46, 0.0 }
 0x3fa   :  { %v5044_v45 = vpack.c.bf16 %v5039_v11, %v5039_v11 }
 0x3fc   :  { %7832 = vmatmul.msk.bf16.vlgmr.msra.gmra.mxu0 %vm2681_vm3, %v5044_v45 }
 0x3fd   :  { %v5033_v9 = vpop.f32.mrf.mxu2 }
 0x40d   :  { %v5377_v37 = vpop.f32.mrf.mxu2 }
 0x40e   :  { %v5378_v36 = vadd.f32 %v5377_v37, %v5365_v15 }
 0x415   :  { %v5379_v33 = vpop.f32.mrf.mxu2  ;;  %v5390_v50 = vpop.f32.mrf.mxu3 }
 0x416   :  { %v5391_v51 = vadd.f32 %v5390_v50, %v5378_v36 }
 0x41d   :  { %v5392_v28 = vpop.f32.mrf.mxu3 }
 0x44d   :  { %v5403_v49 = vpop.f32.mrf.mxu1 }
 0x44e   :  { %v5404_v53 = vadd.f32 %v5403_v49, %v5391_v51 }
 0x455   :  { %v5405_v52 = vpop.f32.mrf.mxu1 }
 0x479   :  { %v5416_v12 = vpop.f32.mrf.mxu0 }
 0x47a   :  { %v5417_v47 = vadd.f32 %v5416_v12, %v5404_v53 }
 0x47c   :  { %5420 = vst.msk [vmem:[#allocation8] sm:$0xff] %vm2755_vm4, %v5417_v47 }
 0x47d   :  { %5442 = dma.vmem_to_hbm [thread:$0]  %s5438_s30, 128, %s5440_s15, [#allocation9]  }
 0x481   :  { %v5418_v56 = vpop.f32.mrf.mxu0 }
 0x482   :  { %8531 = dma.done.wait [#allocation4], 128  }
 0x483   :  { %8532 = vsyncadd [#allocation4], 4294967168 }
 0x484   :  { %8533 = dma.done.wait [#allocation9], 128  }
 0x485   :  { %8534 = vsyncadd [#allocation9], 4294967168 }
 0x486   :  { %5451 = vsyncpa [#allocation3], 1 }
 0x487   :  { %5452 = vsyncpa [#allocation6], 1 }
 0x488   :  { %5453 = vsyncpa [#allocation4], 1 }
 0x489   :  { %5454 = vsyncpa [#allocation9], 1 }

</bundles_post_ra>
